<compile_context>
chip_gen: v6e
topology: v6e:2x2x1
jax: 0.10.0
libtpu: 0.0.40
codegen_flags: <defaults>
</compile_context>

<pallas_src>
import jax
import jax.numpy as jnp
from jax import lax
from jax.experimental import pallas as pl
from jax.experimental.pallas import tpu as pltpu

HIGHEST = lax.Precision.HIGHEST  # only used by the pure-JAX reference

N_FC_BLOCKS = 2  # shallow grid over fc out-features (pipelines the wfc DMA)


# ---------------------------------------------------------------------------
# Fused kernel: 1x1 conv stack + LeakyReLU(0.2) + gram + fc out-feature slice
# ---------------------------------------------------------------------------
def cnnv1_fused_kernel(x_ref, w1_ref, b1_ref, w2_ref, b2_ref, w3_ref, b3_ref,
                       wfc_ref, bfc_ref, o_ref, flat_scr):
    B, MM = flat_scr.shape
    M = w3_ref.shape[0]
    BHW = x_ref.shape[1]
    HW = BHW // B
    inv_hw = 1.0 / HW

    # ---- conv stack, batch folded into lanes: one matmul per layer ----------
    x = x_ref[...].astype(jnp.bfloat16)                          # [Cin, B*HW]

    h1 = jnp.dot(w1_ref[...], x,
                 preferred_element_type=jnp.float32) + b1_ref[...]
    h1 = jnp.maximum(h1, 0.2 * h1)                               # LeakyReLU, f32

    h2 = jnp.dot(w2_ref[...], h1.astype(jnp.bfloat16),
                 preferred_element_type=jnp.float32) + b2_ref[...]
    h2 = jnp.maximum(h2, 0.2 * h2)

    f = jnp.dot(w3_ref[...], h2.astype(jnp.bfloat16),
                preferred_element_type=jnp.float32) + b3_ref[...]  # [M, B*HW] f32

    # ---- per-batch gram (f32) + lane-dense flatten --------------------------
    for b in range(B):                                           # B small & static
        fb = f[:, b * HW:(b + 1) * HW]                           # [M, HW], aligned
        gram = lax.dot_general(fb, fb, (((1,), (1,)), ((), ())),
                               preferred_element_type=jnp.float32) * inv_hw
        # Sublane->lane retile of a (M, M) tile into (1, M*M) lanes is not a
        # supported in-register reshape on Mosaic, so write row-by-row into a
        # lane-dense scratch; these 2*M small stores hide under the pipelined
        # wfc-block DMA.
        for i in range(M):
            flat_scr[b:b + 1, i * M:(i + 1) * M] = gram[i:i + 1, :]

    # ---- fc slice for this grid step: flat [B, MM] @ wfc_blk[mm_blk, MM]^T --
    flat = flat_scr[...].astype(jnp.bfloat16)
    o_ref[...] = lax.dot_general(flat, wfc_ref[...], (((1,), (1,)), ((), ())),
                                 preferred_element_type=jnp.float32) + bfc_ref[...]


# ---------------------------------------------------------------------------
# One-time parameter preprocessing (hoisted out of the per-call path)
# ---------------------------------------------------------------------------
def prepare_params(params):
    return {
        "w1": params["w1"].astype(jnp.bfloat16),               # [128, Cin]
        "b1": params["b1"].reshape(-1, 1).astype(jnp.float32),
        "w2": params["w2"].astype(jnp.bfloat16),               # [64, 128]
        "b2": params["b2"].reshape(-1, 1).astype(jnp.float32),
        "w3": params["w3"].astype(jnp.bfloat16),               # [M, 64]
        "b3": params["b3"].reshape(-1, 1).astype(jnp.float32),
        "wfc": params["wfc"].astype(jnp.bfloat16),             # [MM, MM] (out, in)
        "bfc": params["bfc"].reshape(1, -1).astype(jnp.float32),
    }


# ---------------------------------------------------------------------------
# Wrapper
# ---------------------------------------------------------------------------
def cnnv1_forward(x_nchw, p):
    B, Cin, H, W = x_nchw.shape
    HW = H * W
    C1 = p["w1"].shape[0]
    C2 = p["w2"].shape[0]
    M = p["w3"].shape[0]
    MM = M * M
    assert MM % (N_FC_BLOCKS * 128) == 0
    mm_blk = MM // N_FC_BLOCKS

    # NCHW -> [Cin, B*HW]: batch folded into the lane axis (tiny transpose).
    x = x_nchw.transpose(1, 0, 2, 3).reshape(Cin, B * HW)

    cost = pl.CostEstimate(
        flops=2 * (C1 * Cin + C2 * C1 + M * C2) * B * HW    # conv stack
              + 2 * B * M * M * HW                          # gram
              + 2 * B * MM * MM,                            # fc
        transcendentals=0,
        bytes_accessed=(x.size * 4 + p["wfc"].size * 2 + p["w1"].size * 2
                        + p["w2"].size * 2 + p["w3"].size * 2 + B * MM * 4),
    )

    return pl.pallas_call(
        cnnv1_fused_kernel,
        out_shape=jax.ShapeDtypeStruct((B, MM), jnp.float32),
        grid_spec=pltpu.PrefetchScalarGridSpec(
            num_scalar_prefetch=0,
            grid=(N_FC_BLOCKS,),
            in_specs=[
                pl.BlockSpec((Cin, B * HW), lambda k: (0, 0)),   # x
                pl.BlockSpec((C1, Cin), lambda k: (0, 0)),       # w1
                pl.BlockSpec((C1, 1), lambda k: (0, 0)),         # b1
                pl.BlockSpec((C2, C1), lambda k: (0, 0)),        # w2
                pl.BlockSpec((C2, 1), lambda k: (0, 0)),         # b2
                pl.BlockSpec((M, C2), lambda k: (0, 0)),         # w3
                pl.BlockSpec((M, 1), lambda k: (0, 0)),          # b3
                pl.BlockSpec((mm_blk, MM), lambda k: (k, 0)),    # wfc (out-row blk)
                pl.BlockSpec((1, mm_blk), lambda k: (0, k)),     # bfc
            ],
            out_specs=pl.BlockSpec((B, mm_blk), lambda k: (0, k)),
            scratch_shapes=[pltpu.VMEM((B, MM), jnp.float32)],
        ),
        compiler_params=pltpu.CompilerParams(
            dimension_semantics=("parallel",)),
        cost_estimate=cost,
    )(x, p["w1"], p["b1"], p["w2"], p["b2"], p["w3"], p["b3"],
      p["wfc"], p["bfc"])


# ---------------------------------------------------------------------------
# Pure-JAX reference (mirrors the PyTorch forward exactly, f32 HIGHEST)
# ---------------------------------------------------------------------------
def cnnv1_reference(x_nchw, params):
    def conv1x1(x, w, b):  # x [B,C,H,W], w [O,C], b [O]
        return jnp.einsum("bchw,oc->bohw", x, w, precision=HIGHEST) \
            + b[None, :, None, None]

    h = conv1x1(x_nchw, params["w1"], params["b1"])
    h = jnp.where(h > 0, h, 0.2 * h)
    h = conv1x1(h, params["w2"], params["b2"])
    h = jnp.where(h > 0, h, 0.2 * h)
    f = conv1x1(h, params["w3"], params["b3"])
    B, C, H, W = f.shape
    out = f.reshape(B, C, H * W)
    gram = jnp.einsum("bcp,bdp->bcd", out, out, precision=HIGHEST) / (H * W)
    flat = gram.reshape(B, -1)
    return jnp.dot(flat, params["wfc"].T, precision=HIGHEST) + params["bfc"]


# ---------------------------------------------------------------------------
# Main
# ---------------------------------------------------------------------------
if __name__ == "__main__":
    matrixSize = 32
    in_channel = 64
    B, H, W = 2, 16, 16
    MM = matrixSize * matrixSize

    key = jax.random.PRNGKey(0)
    ks = jax.random.split(key, 9)

    def init(k, shape, fan_in):
        return jax.random.normal(k, shape, jnp.float32) / jnp.sqrt(fan_in)

    params = {
        "w1": init(ks[0], (128, in_channel), in_channel),
        "b1": init(ks[1], (128,), in_channel),
        "w2": init(ks[2], (64, 128), 128),
        "b2": init(ks[3], (64,), 128),
        "w3": init(ks[4], (matrixSize, 64), 64),
        "b3": init(ks[5], (matrixSize,), 64),
        "wfc": init(ks[6], (MM, MM), MM),
        "bfc": init(ks[7], (MM,), MM),
    }

    x = jax.random.normal(ks[8], (B, in_channel, H, W), jnp.float32)

    prepared = prepare_params(params)          # one-time (init-time) preprocessing
    fwd = jax.jit(cnnv1_forward)

    out = jax.block_until_ready(fwd(x, prepared))
    ref = jax.block_until_ready(cnnv1_reference(x, params))

    assert out.shape == (B, MM), out.shape
    # bf16 conv/fc matmuls (f32 accumulation, f32 gram) vs f32 HIGHEST reference
    assert jnp.allclose(out, ref, rtol=1e-2, atol=1e-2), \
        float(jnp.max(jnp.abs(out - ref)))

    print("KERNEL_OK")
</pallas_src>

<mosaic_0001>
module attributes {stable_mosaic.version = 11 : i64} {
  func.func @cnnv1_fused_kernel(%arg0: i32, %arg1: memref<64x512xf32, #tpu.memory_space<vmem>>, %arg2: memref<128x64xbf16, #tpu.memory_space<vmem>>, %arg3: memref<128x1xf32, #tpu.memory_space<vmem>>, %arg4: memref<64x128xbf16, #tpu.memory_space<vmem>>, %arg5: memref<64x1xf32, #tpu.memory_space<vmem>>, %arg6: memref<32x64xbf16, #tpu.memory_space<vmem>>, %arg7: memref<32x1xf32, #tpu.memory_space<vmem>>, %arg8: memref<512x1024xbf16, #tpu.memory_space<vmem>>, %arg9: memref<1x512xf32, #tpu.memory_space<vmem>>, %arg10: memref<2x512xf32, #tpu.memory_space<vmem>>, %arg11: memref<2x1024xf32, #tpu.memory_space<vmem>>) attributes {dimension_semantics = [#tpu.dimension_semantics<parallel>], iteration_bounds = array<i64: 2>, scalar_prefetch = 0 : i64, scratch_operands = 1 : i64, tpu.core_type = #tpu.core_type<tc>, window_params = [{pipeline_mode = #tpu.pipeline_mode<synchronous>, transform_indices = @transform_0, window_bounds = array<i64: 64, 512>}, {pipeline_mode = #tpu.pipeline_mode<synchronous>, transform_indices = @transform_1, window_bounds = array<i64: 128, 64>}, {pipeline_mode = #tpu.pipeline_mode<synchronous>, transform_indices = @transform_2, window_bounds = array<i64: 128, 1>}, {pipeline_mode = #tpu.pipeline_mode<synchronous>, transform_indices = @transform_3, window_bounds = array<i64: 64, 128>}, {pipeline_mode = #tpu.pipeline_mode<synchronous>, transform_indices = @transform_4, window_bounds = array<i64: 64, 1>}, {pipeline_mode = #tpu.pipeline_mode<synchronous>, transform_indices = @transform_5, window_bounds = array<i64: 32, 64>}, {pipeline_mode = #tpu.pipeline_mode<synchronous>, transform_indices = @transform_6, window_bounds = array<i64: 32, 1>}, {transform_indices = @transform_7, window_bounds = array<i64: 512, 1024>}, {transform_indices = @transform_8, window_bounds = array<i64: 1, 512>}, {transform_indices = @transform_9, window_bounds = array<i64: 2, 512>}]} {
    %c0 = arith.constant 0 : index
    %c0_0 = arith.constant 0 : index
    %0 = vector.load %arg1[%c0, %c0_0] : memref<64x512xf32, #tpu.memory_space<vmem>>, vector<64x512xf32>
    %1 = arith.truncf %0 : vector<64x512xf32> to vector<64x512xbf16>
    %c0_1 = arith.constant 0 : index
    %c0_2 = arith.constant 0 : index
    %2 = vector.load %arg2[%c0_1, %c0_2] : memref<128x64xbf16, #tpu.memory_space<vmem>>, vector<128x64xbf16>
    %cst = arith.constant dense<0.000000e+00> : vector<128x512xf32>
    %3 = tpu.matmul %2, %1, %cst {dimension_numbers = #tpu.dot_dimension_numbers<[1], [0], [0], [1], [0, 0, 1, 1], [], []>} : vector<128x64xbf16>, vector<64x512xbf16>, vector<128x512xf32> -> vector<128x512xf32>
    %c0_3 = arith.constant 0 : index
    %c0_4 = arith.constant 0 : index
    %4 = vector.load %arg3[%c0_3, %c0_4] : memref<128x1xf32, #tpu.memory_space<vmem>>, vector<128x1xf32>
    %5 = vector.broadcast %4 : vector<128x1xf32> to vector<128x512xf32>
    %6 = arith.addf %3, %5 : vector<128x512xf32>
    %cst_5 = arith.constant 2.000000e-01 : f32
    %7 = vector.broadcast %cst_5 : f32 to vector<128x512xf32>
    %8 = arith.mulf %7, %6 : vector<128x512xf32>
    %9 = arith.maximumf %6, %8 : vector<128x512xf32>
    %c0_6 = arith.constant 0 : index
    %c0_7 = arith.constant 0 : index
    %10 = vector.load %arg4[%c0_6, %c0_7] : memref<64x128xbf16, #tpu.memory_space<vmem>>, vector<64x128xbf16>
    %11 = arith.truncf %9 : vector<128x512xf32> to vector<128x512xbf16>
    %cst_8 = arith.constant dense<0.000000e+00> : vector<64x512xf32>
    %12 = tpu.matmul %10, %11, %cst_8 {dimension_numbers = #tpu.dot_dimension_numbers<[1], [0], [0], [1], [0, 0, 1, 1], [], []>} : vector<64x128xbf16>, vector<128x512xbf16>, vector<64x512xf32> -> vector<64x512xf32>
    %c0_9 = arith.constant 0 : index
    %c0_10 = arith.constant 0 : index
    %13 = vector.load %arg5[%c0_9, %c0_10] : memref<64x1xf32, #tpu.memory_space<vmem>>, vector<64x1xf32>
    %14 = vector.broadcast %13 : vector<64x1xf32> to vector<64x512xf32>
    %15 = arith.addf %12, %14 : vector<64x512xf32>
    %cst_11 = arith.constant 2.000000e-01 : f32
    %16 = vector.broadcast %cst_11 : f32 to vector<64x512xf32>
    %17 = arith.mulf %16, %15 : vector<64x512xf32>
    %18 = arith.maximumf %15, %17 : vector<64x512xf32>
    %c0_12 = arith.constant 0 : index
    %c0_13 = arith.constant 0 : index
    %19 = vector.load %arg6[%c0_12, %c0_13] : memref<32x64xbf16, #tpu.memory_space<vmem>>, vector<32x64xbf16>
    %20 = arith.truncf %18 : vector<64x512xf32> to vector<64x512xbf16>
    %cst_14 = arith.constant dense<0.000000e+00> : vector<32x512xf32>
    %21 = tpu.matmul %19, %20, %cst_14 {dimension_numbers = #tpu.dot_dimension_numbers<[1], [0], [0], [1], [0, 0, 1, 1], [], []>} : vector<32x64xbf16>, vector<64x512xbf16>, vector<32x512xf32> -> vector<32x512xf32>
    %c0_15 = arith.constant 0 : index
    %c0_16 = arith.constant 0 : index
    %22 = vector.load %arg7[%c0_15, %c0_16] : memref<32x1xf32, #tpu.memory_space<vmem>>, vector<32x1xf32>
    %23 = vector.broadcast %22 : vector<32x1xf32> to vector<32x512xf32>
    %24 = arith.addf %21, %23 : vector<32x512xf32>
    %25 = vector.extract_strided_slice %24 {offsets = [0, 0], sizes = [32, 256], strides = [1, 1]} : vector<32x512xf32> to vector<32x256xf32>
    %cst_17 = arith.constant dense<0.000000e+00> : vector<32x32xf32>
    %26 = tpu.matmul %25, %25, %cst_17 {dimension_numbers = #tpu.dot_dimension_numbers<[1], [1], [0], [0], [0, 0, 1, 0], [], []>} : vector<32x256xf32>, vector<32x256xf32>, vector<32x32xf32> -> vector<32x32xf32>
    %cst_18 = arith.constant 3.906250e-03 : f32
    %27 = vector.broadcast %cst_18 : f32 to vector<32x32xf32>
    %28 = arith.mulf %26, %27 : vector<32x32xf32>
    %29 = vector.extract_strided_slice %28 {offsets = [0, 0], sizes = [1, 32], strides = [1, 1]} : vector<32x32xf32> to vector<1x32xf32>
    %c0_19 = arith.constant 0 : index
    %c0_20 = arith.constant 0 : index
    %30 = vector.load %arg11[%c0_19, %c0_20] : memref<2x1024xf32, #tpu.memory_space<vmem>>, vector<1x32xf32>
    tpu.vector_store %arg11[%c0_19, %c0_20], %29 {strides = array<i32>} : memref<2x1024xf32, #tpu.memory_space<vmem>>, vector<1x32xf32>,
    %31 = vector.extract_strided_slice %28 {offsets = [1, 0], sizes = [1, 32], strides = [1, 1]} : vector<32x32xf32> to vector<1x32xf32>
    %c0_21 = arith.constant 0 : index
    %c32 = arith.constant 32 : index
    %32 = vector.load %arg11[%c0_21, %c32] : memref<2x1024xf32, #tpu.memory_space<vmem>>, vector<1x32xf32>
    tpu.vector_store %arg11[%c0_21, %c32], %31 {strides = array<i32>} : memref<2x1024xf32, #tpu.memory_space<vmem>>, vector<1x32xf32>,
    %33 = vector.extract_strided_slice %28 {offsets = [2, 0], sizes = [1, 32], strides = [1, 1]} : vector<32x32xf32> to vector<1x32xf32>
    %c0_22 = arith.constant 0 : index
    %c64 = arith.constant 64 : index
    %34 = vector.load %arg11[%c0_22, %c64] : memref<2x1024xf32, #tpu.memory_space<vmem>>, vector<1x32xf32>
    tpu.vector_store %arg11[%c0_22, %c64], %33 {strides = array<i32>} : memref<2x1024xf32, #tpu.memory_space<vmem>>, vector<1x32xf32>,
    %35 = vector.extract_strided_slice %28 {offsets = [3, 0], sizes = [1, 32], strides = [1, 1]} : vector<32x32xf32> to vector<1x32xf32>
    %c0_23 = arith.constant 0 : index
    %c96 = arith.constant 96 : index
    %36 = vector.load %arg11[%c0_23, %c96] : memref<2x1024xf32, #tpu.memory_space<vmem>>, vector<1x32xf32>
    tpu.vector_store %arg11[%c0_23, %c96], %35 {strides = array<i32>} : memref<2x1024xf32, #tpu.memory_space<vmem>>, vector<1x32xf32>,
    %37 = vector.extract_strided_slice %28 {offsets = [4, 0], sizes = [1, 32], strides = [1, 1]} : vector<32x32xf32> to vector<1x32xf32>
    %c0_24 = arith.constant 0 : index
    %c128 = arith.constant 128 : index
    %38 = vector.load %arg11[%c0_24, %c128] : memref<2x1024xf32, #tpu.memory_space<vmem>>, vector<1x32xf32>
    tpu.vector_store %arg11[%c0_24, %c128], %37 {strides = array<i32>} : memref<2x1024xf32, #tpu.memory_space<vmem>>, vector<1x32xf32>,
    %39 = vector.extract_strided_slice %28 {offsets = [5, 0], sizes = [1, 32], strides = [1, 1]} : vector<32x32xf32> to vector<1x32xf32>
    %c0_25 = arith.constant 0 : index
    %c160 = arith.constant 160 : index
    %40 = vector.load %arg11[%c0_25, %c160] : memref<2x1024xf32, #tpu.memory_space<vmem>>, vector<1x32xf32>
    tpu.vector_store %arg11[%c0_25, %c160], %39 {strides = array<i32>} : memref<2x1024xf32, #tpu.memory_space<vmem>>, vector<1x32xf32>,
    %41 = vector.extract_strided_slice %28 {offsets = [6, 0], sizes = [1, 32], strides = [1, 1]} : vector<32x32xf32> to vector<1x32xf32>
    %c0_26 = arith.constant 0 : index
    %c192 = arith.constant 192 : index
    %42 = vector.load %arg11[%c0_26, %c192] : memref<2x1024xf32, #tpu.memory_space<vmem>>, vector<1x32xf32>
    tpu.vector_store %arg11[%c0_26, %c192], %41 {strides = array<i32>} : memref<2x1024xf32, #tpu.memory_space<vmem>>, vector<1x32xf32>,
    %43 = vector.extract_strided_slice %28 {offsets = [7, 0], sizes = [1, 32], strides = [1, 1]} : vector<32x32xf32> to vector<1x32xf32>
    %c0_27 = arith.constant 0 : index
    %c224 = arith.constant 224 : index
    %44 = vector.load %arg11[%c0_27, %c224] : memref<2x1024xf32, #tpu.memory_space<vmem>>, vector<1x32xf32>
    tpu.vector_store %arg11[%c0_27, %c224], %43 {strides = array<i32>} : memref<2x1024xf32, #tpu.memory_space<vmem>>, vector<1x32xf32>,
    %45 = vector.extract_strided_slice %28 {offsets = [8, 0], sizes = [1, 32], strides = [1, 1]} : vector<32x32xf32> to vector<1x32xf32>
    %c0_28 = arith.constant 0 : index
    %c256 = arith.constant 256 : index
    %46 = vector.load %arg11[%c0_28, %c256] : memref<2x1024xf32, #tpu.memory_space<vmem>>, vector<1x32xf32>
    tpu.vector_store %arg11[%c0_28, %c256], %45 {strides = array<i32>} : memref<2x1024xf32, #tpu.memory_space<vmem>>, vector<1x32xf32>,
    %47 = vector.extract_strided_slice %28 {offsets = [9, 0], sizes = [1, 32], strides = [1, 1]} : vector<32x32xf32> to vector<1x32xf32>
    %c0_29 = arith.constant 0 : index
    %c288 = arith.constant 288 : index
    %48 = vector.load %arg11[%c0_29, %c288] : memref<2x1024xf32, #tpu.memory_space<vmem>>, vector<1x32xf32>
    tpu.vector_store %arg11[%c0_29, %c288], %47 {strides = array<i32>} : memref<2x1024xf32, #tpu.memory_space<vmem>>, vector<1x32xf32>,
    %49 = vector.extract_strided_slice %28 {offsets = [10, 0], sizes = [1, 32], strides = [1, 1]} : vector<32x32xf32> to vector<1x32xf32>
    %c0_30 = arith.constant 0 : index
    %c320 = arith.constant 320 : index
    %50 = vector.load %arg11[%c0_30, %c320] : memref<2x1024xf32, #tpu.memory_space<vmem>>, vector<1x32xf32>
    tpu.vector_store %arg11[%c0_30, %c320], %49 {strides = array<i32>} : memref<2x1024xf32, #tpu.memory_space<vmem>>, vector<1x32xf32>,
    %51 = vector.extract_strided_slice %28 {offsets = [11, 0], sizes = [1, 32], strides = [1, 1]} : vector<32x32xf32> to vector<1x32xf32>
    %c0_31 = arith.constant 0 : index
    %c352 = arith.constant 352 : index
    %52 = vector.load %arg11[%c0_31, %c352] : memref<2x1024xf32, #tpu.memory_space<vmem>>, vector<1x32xf32>
    tpu.vector_store %arg11[%c0_31, %c352], %51 {strides = array<i32>} : memref<2x1024xf32, #tpu.memory_space<vmem>>, vector<1x32xf32>,
    %53 = vector.extract_strided_slice %28 {offsets = [12, 0], sizes = [1, 32], strides = [1, 1]} : vector<32x32xf32> to vector<1x32xf32>
    %c0_32 = arith.constant 0 : index
    %c384 = arith.constant 384 : index
    %54 = vector.load %arg11[%c0_32, %c384] : memref<2x1024xf32, #tpu.memory_space<vmem>>, vector<1x32xf32>
    tpu.vector_store %arg11[%c0_32, %c384], %53 {strides = array<i32>} : memref<2x1024xf32, #tpu.memory_space<vmem>>, vector<1x32xf32>,
    %55 = vector.extract_strided_slice %28 {offsets = [13, 0], sizes = [1, 32], strides = [1, 1]} : vector<32x32xf32> to vector<1x32xf32>
    %c0_33 = arith.constant 0 : index
    %c416 = arith.constant 416 : index
    %56 = vector.load %arg11[%c0_33, %c416] : memref<2x1024xf32, #tpu.memory_space<vmem>>, vector<1x32xf32>
    tpu.vector_store %arg11[%c0_33, %c416], %55 {strides = array<i32>} : memref<2x1024xf32, #tpu.memory_space<vmem>>, vector<1x32xf32>,
    %57 = vector.extract_strided_slice %28 {offsets = [14, 0], sizes = [1, 32], strides = [1, 1]} : vector<32x32xf32> to vector<1x32xf32>
    %c0_34 = arith.constant 0 : index
    %c448 = arith.constant 448 : index
    %58 = vector.load %arg11[%c0_34, %c448] : memref<2x1024xf32, #tpu.memory_space<vmem>>, vector<1x32xf32>
    tpu.vector_store %arg11[%c0_34, %c448], %57 {strides = array<i32>} : memref<2x1024xf32, #tpu.memory_space<vmem>>, vector<1x32xf32>,
    %59 = vector.extract_strided_slice %28 {offsets = [15, 0], sizes = [1, 32], strides = [1, 1]} : vector<32x32xf32> to vector<1x32xf32>
    %c0_35 = arith.constant 0 : index
    %c480 = arith.constant 480 : index
    %60 = vector.load %arg11[%c0_35, %c480] : memref<2x1024xf32, #tpu.memory_space<vmem>>, vector<1x32xf32>
    tpu.vector_store %arg11[%c0_35, %c480], %59 {strides = array<i32>} : memref<2x1024xf32, #tpu.memory_space<vmem>>, vector<1x32xf32>,
    %61 = vector.extract_strided_slice %28 {offsets = [16, 0], sizes = [1, 32], strides = [1, 1]} : vector<32x32xf32> to vector<1x32xf32>
    %c0_36 = arith.constant 0 : index
    %c512 = arith.constant 512 : index
    %62 = vector.load %arg11[%c0_36, %c512] : memref<2x1024xf32, #tpu.memory_space<vmem>>, vector<1x32xf32>
    tpu.vector_store %arg11[%c0_36, %c512], %61 {strides = array<i32>} : memref<2x1024xf32, #tpu.memory_space<vmem>>, vector<1x32xf32>,
    %63 = vector.extract_strided_slice %28 {offsets = [17, 0], sizes = [1, 32], strides = [1, 1]} : vector<32x32xf32> to vector<1x32xf32>
    %c0_37 = arith.constant 0 : index
    %c544 = arith.constant 544 : index
    %64 = vector.load %arg11[%c0_37, %c544] : memref<2x1024xf32, #tpu.memory_space<vmem>>, vector<1x32xf32>
    tpu.vector_store %arg11[%c0_37, %c544], %63 {strides = array<i32>} : memref<2x1024xf32, #tpu.memory_space<vmem>>, vector<1x32xf32>,
    %65 = vector.extract_strided_slice %28 {offsets = [18, 0], sizes = [1, 32], strides = [1, 1]} : vector<32x32xf32> to vector<1x32xf32>
    %c0_38 = arith.constant 0 : index
    %c576 = arith.constant 576 : index
    %66 = vector.load %arg11[%c0_38, %c576] : memref<2x1024xf32, #tpu.memory_space<vmem>>, vector<1x32xf32>
    tpu.vector_store %arg11[%c0_38, %c576], %65 {strides = array<i32>} : memref<2x1024xf32, #tpu.memory_space<vmem>>, vector<1x32xf32>,
    %67 = vector.extract_strided_slice %28 {offsets = [19, 0], sizes = [1, 32], strides = [1, 1]} : vector<32x32xf32> to vector<1x32xf32>
    %c0_39 = arith.constant 0 : index
    %c608 = arith.constant 608 : index
    %68 = vector.load %arg11[%c0_39, %c608] : memref<2x1024xf32, #tpu.memory_space<vmem>>, vector<1x32xf32>
    tpu.vector_store %arg11[%c0_39, %c608], %67 {strides = array<i32>} : memref<2x1024xf32, #tpu.memory_space<vmem>>, vector<1x32xf32>,
    %69 = vector.extract_strided_slice %28 {offsets = [20, 0], sizes = [1, 32], strides = [1, 1]} : vector<32x32xf32> to vector<1x32xf32>
    %c0_40 = arith.constant 0 : index
    %c640 = arith.constant 640 : index
    %70 = vector.load %arg11[%c0_40, %c640] : memref<2x1024xf32, #tpu.memory_space<vmem>>, vector<1x32xf32>
    tpu.vector_store %arg11[%c0_40, %c640], %69 {strides = array<i32>} : memref<2x1024xf32, #tpu.memory_space<vmem>>, vector<1x32xf32>,
    %71 = vector.extract_strided_slice %28 {offsets = [21, 0], sizes = [1, 32], strides = [1, 1]} : vector<32x32xf32> to vector<1x32xf32>
    %c0_41 = arith.constant 0 : index
    %c672 = arith.constant 672 : index
    %72 = vector.load %arg11[%c0_41, %c672] : memref<2x1024xf32, #tpu.memory_space<vmem>>, vector<1x32xf32>
    tpu.vector_store %arg11[%c0_41, %c672], %71 {strides = array<i32>} : memref<2x1024xf32, #tpu.memory_space<vmem>>, vector<1x32xf32>,
    %73 = vector.extract_strided_slice %28 {offsets = [22, 0], sizes = [1, 32], strides = [1, 1]} : vector<32x32xf32> to vector<1x32xf32>
    %c0_42 = arith.constant 0 : index
    %c704 = arith.constant 704 : index
    %74 = vector.load %arg11[%c0_42, %c704] : memref<2x1024xf32, #tpu.memory_space<vmem>>, vector<1x32xf32>
    tpu.vector_store %arg11[%c0_42, %c704], %73 {strides = array<i32>} : memref<2x1024xf32, #tpu.memory_space<vmem>>, vector<1x32xf32>,
    %75 = vector.extract_strided_slice %28 {offsets = [23, 0], sizes = [1, 32], strides = [1, 1]} : vector<32x32xf32> to vector<1x32xf32>
    %c0_43 = arith.constant 0 : index
    %c736 = arith.constant 736 : index
    %76 = vector.load %arg11[%c0_43, %c736] : memref<2x1024xf32, #tpu.memory_space<vmem>>, vector<1x32xf32>
    tpu.vector_store %arg11[%c0_43, %c736], %75 {strides = array<i32>} : memref<2x1024xf32, #tpu.memory_space<vmem>>, vector<1x32xf32>,
    %77 = vector.extract_strided_slice %28 {offsets = [24, 0], sizes = [1, 32], strides = [1, 1]} : vector<32x32xf32> to vector<1x32xf32>
    %c0_44 = arith.constant 0 : index
    %c768 = arith.constant 768 : index
    %78 = vector.load %arg11[%c0_44, %c768] : memref<2x1024xf32, #tpu.memory_space<vmem>>, vector<1x32xf32>
    tpu.vector_store %arg11[%c0_44, %c768], %77 {strides = array<i32>} : memref<2x1024xf32, #tpu.memory_space<vmem>>, vector<1x32xf32>,
    %79 = vector.extract_strided_slice %28 {offsets = [25, 0], sizes = [1, 32], strides = [1, 1]} : vector<32x32xf32> to vector<1x32xf32>
    %c0_45 = arith.constant 0 : index
    %c800 = arith.constant 800 : index
    %80 = vector.load %arg11[%c0_45, %c800] : memref<2x1024xf32, #tpu.memory_space<vmem>>, vector<1x32xf32>
    tpu.vector_store %arg11[%c0_45, %c800], %79 {strides = array<i32>} : memref<2x1024xf32, #tpu.memory_space<vmem>>, vector<1x32xf32>,
    %81 = vector.extract_strided_slice %28 {offsets = [26, 0], sizes = [1, 32], strides = [1, 1]} : vector<32x32xf32> to vector<1x32xf32>
    %c0_46 = arith.constant 0 : index
    %c832 = arith.constant 832 : index
    %82 = vector.load %arg11[%c0_46, %c832] : memref<2x1024xf32, #tpu.memory_space<vmem>>, vector<1x32xf32>
    tpu.vector_store %arg11[%c0_46, %c832], %81 {strides = array<i32>} : memref<2x1024xf32, #tpu.memory_space<vmem>>, vector<1x32xf32>,
    %83 = vector.extract_strided_slice %28 {offsets = [27, 0], sizes = [1, 32], strides = [1, 1]} : vector<32x32xf32> to vector<1x32xf32>
    %c0_47 = arith.constant 0 : index
    %c864 = arith.constant 864 : index
    %84 = vector.load %arg11[%c0_47, %c864] : memref<2x1024xf32, #tpu.memory_space<vmem>>, vector<1x32xf32>
    tpu.vector_store %arg11[%c0_47, %c864], %83 {strides = array<i32>} : memref<2x1024xf32, #tpu.memory_space<vmem>>, vector<1x32xf32>,
    %85 = vector.extract_strided_slice %28 {offsets = [28, 0], sizes = [1, 32], strides = [1, 1]} : vector<32x32xf32> to vector<1x32xf32>
    %c0_48 = arith.constant 0 : index
    %c896 = arith.constant 896 : index
    %86 = vector.load %arg11[%c0_48, %c896] : memref<2x1024xf32, #tpu.memory_space<vmem>>, vector<1x32xf32>
    tpu.vector_store %arg11[%c0_48, %c896], %85 {strides = array<i32>} : memref<2x1024xf32, #tpu.memory_space<vmem>>, vector<1x32xf32>,
    %87 = vector.extract_strided_slice %28 {offsets = [29, 0], sizes = [1, 32], strides = [1, 1]} : vector<32x32xf32> to vector<1x32xf32>
    %c0_49 = arith.constant 0 : index
    %c928 = arith.constant 928 : index
    %88 = vector.load %arg11[%c0_49, %c928] : memref<2x1024xf32, #tpu.memory_space<vmem>>, vector<1x32xf32>
    tpu.vector_store %arg11[%c0_49, %c928], %87 {strides = array<i32>} : memref<2x1024xf32, #tpu.memory_space<vmem>>, vector<1x32xf32>,
    %89 = vector.extract_strided_slice %28 {offsets = [30, 0], sizes = [1, 32], strides = [1, 1]} : vector<32x32xf32> to vector<1x32xf32>
    %c0_50 = arith.constant 0 : index
    %c960 = arith.constant 960 : index
    %90 = vector.load %arg11[%c0_50, %c960] : memref<2x1024xf32, #tpu.memory_space<vmem>>, vector<1x32xf32>
    tpu.vector_store %arg11[%c0_50, %c960], %89 {strides = array<i32>} : memref<2x1024xf32, #tpu.memory_space<vmem>>, vector<1x32xf32>,
    %91 = vector.extract_strided_slice %28 {offsets = [31, 0], sizes = [1, 32], strides = [1, 1]} : vector<32x32xf32> to vector<1x32xf32>
    %c0_51 = arith.constant 0 : index
    %c992 = arith.constant 992 : index
    %92 = vector.load %arg11[%c0_51, %c992] : memref<2x1024xf32, #tpu.memory_space<vmem>>, vector<1x32xf32>
    tpu.vector_store %arg11[%c0_51, %c992], %91 {strides = array<i32>} : memref<2x1024xf32, #tpu.memory_space<vmem>>, vector<1x32xf32>,
    %93 = vector.extract_strided_slice %24 {offsets = [0, 256], sizes = [32, 256], strides = [1, 1]} : vector<32x512xf32> to vector<32x256xf32>
    %cst_52 = arith.constant dense<0.000000e+00> : vector<32x32xf32>
    %94 = tpu.matmul %93, %93, %cst_52 {dimension_numbers = #tpu.dot_dimension_numbers<[1], [1], [0], [0], [0, 0, 1, 0], [], []>} : vector<32x256xf32>, vector<32x256xf32>, vector<32x32xf32> -> vector<32x32xf32>
    %cst_53 = arith.constant 3.906250e-03 : f32
    %95 = vector.broadcast %cst_53 : f32 to vector<32x32xf32>
    %96 = arith.mulf %94, %95 : vector<32x32xf32>
    %97 = vector.extract_strided_slice %96 {offsets = [0, 0], sizes = [1, 32], strides = [1, 1]} : vector<32x32xf32> to vector<1x32xf32>
    %c1 = arith.constant 1 : index
    %c0_54 = arith.constant 0 : index
    %98 = vector.load %arg11[%c1, %c0_54] : memref<2x1024xf32, #tpu.memory_space<vmem>>, vector<1x32xf32>
    tpu.vector_store %arg11[%c1, %c0_54], %97 {strides = array<i32>} : memref<2x1024xf32, #tpu.memory_space<vmem>>, vector<1x32xf32>,
    %99 = vector.extract_strided_slice %96 {offsets = [1, 0], sizes = [1, 32], strides = [1, 1]} : vector<32x32xf32> to vector<1x32xf32>
    %c1_55 = arith.constant 1 : index
    %c32_56 = arith.constant 32 : index
    %100 = vector.load %arg11[%c1_55, %c32_56] : memref<2x1024xf32, #tpu.memory_space<vmem>>, vector<1x32xf32>
    tpu.vector_store %arg11[%c1_55, %c32_56], %99 {strides = array<i32>} : memref<2x1024xf32, #tpu.memory_space<vmem>>, vector<1x32xf32>,
    %101 = vector.extract_strided_slice %96 {offsets = [2, 0], sizes = [1, 32], strides = [1, 1]} : vector<32x32xf32> to vector<1x32xf32>
    %c1_57 = arith.constant 1 : index
    %c64_58 = arith.constant 64 : index
    %102 = vector.load %arg11[%c1_57, %c64_58] : memref<2x1024xf32, #tpu.memory_space<vmem>>, vector<1x32xf32>
    tpu.vector_store %arg11[%c1_57, %c64_58], %101 {strides = array<i32>} : memref<2x1024xf32, #tpu.memory_space<vmem>>, vector<1x32xf32>,
    %103 = vector.extract_strided_slice %96 {offsets = [3, 0], sizes = [1, 32], strides = [1, 1]} : vector<32x32xf32> to vector<1x32xf32>
    %c1_59 = arith.constant 1 : index
    %c96_60 = arith.constant 96 : index
    %104 = vector.load %arg11[%c1_59, %c96_60] : memref<2x1024xf32, #tpu.memory_space<vmem>>, vector<1x32xf32>
    tpu.vector_store %arg11[%c1_59, %c96_60], %103 {strides = array<i32>} : memref<2x1024xf32, #tpu.memory_space<vmem>>, vector<1x32xf32>,
    %105 = vector.extract_strided_slice %96 {offsets = [4, 0], sizes = [1, 32], strides = [1, 1]} : vector<32x32xf32> to vector<1x32xf32>
    %c1_61 = arith.constant 1 : index
    %c128_62 = arith.constant 128 : index
    %106 = vector.load %arg11[%c1_61, %c128_62] : memref<2x1024xf32, #tpu.memory_space<vmem>>, vector<1x32xf32>
    tpu.vector_store %arg11[%c1_61, %c128_62], %105 {strides = array<i32>} : memref<2x1024xf32, #tpu.memory_space<vmem>>, vector<1x32xf32>,
    %107 = vector.extract_strided_slice %96 {offsets = [5, 0], sizes = [1, 32], strides = [1, 1]} : vector<32x32xf32> to vector<1x32xf32>
    %c1_63 = arith.constant 1 : index
    %c160_64 = arith.constant 160 : index
    %108 = vector.load %arg11[%c1_63, %c160_64] : memref<2x1024xf32, #tpu.memory_space<vmem>>, vector<1x32xf32>
    tpu.vector_store %arg11[%c1_63, %c160_64], %107 {strides = array<i32>} : memref<2x1024xf32, #tpu.memory_space<vmem>>, vector<1x32xf32>,
    %109 = vector.extract_strided_slice %96 {offsets = [6, 0], sizes = [1, 32], strides = [1, 1]} : vector<32x32xf32> to vector<1x32xf32>
    %c1_65 = arith.constant 1 : index
    %c192_66 = arith.constant 192 : index
    %110 = vector.load %arg11[%c1_65, %c192_66] : memref<2x1024xf32, #tpu.memory_space<vmem>>, vector<1x32xf32>
    tpu.vector_store %arg11[%c1_65, %c192_66], %109 {strides = array<i32>} : memref<2x1024xf32, #tpu.memory_space<vmem>>, vector<1x32xf32>,
    %111 = vector.extract_strided_slice %96 {offsets = [7, 0], sizes = [1, 32], strides = [1, 1]} : vector<32x32xf32> to vector<1x32xf32>
    %c1_67 = arith.constant 1 : index
    %c224_68 = arith.constant 224 : index
    %112 = vector.load %arg11[%c1_67, %c224_68] : memref<2x1024xf32, #tpu.memory_space<vmem>>, vector<1x32xf32>
    tpu.vector_store %arg11[%c1_67, %c224_68], %111 {strides = array<i32>} : memref<2x1024xf32, #tpu.memory_space<vmem>>, vector<1x32xf32>,
    %113 = vector.extract_strided_slice %96 {offsets = [8, 0], sizes = [1, 32], strides = [1, 1]} : vector<32x32xf32> to vector<1x32xf32>
    %c1_69 = arith.constant 1 : index
    %c256_70 = arith.constant 256 : index
    %114 = vector.load %arg11[%c1_69, %c256_70] : memref<2x1024xf32, #tpu.memory_space<vmem>>, vector<1x32xf32>
    tpu.vector_store %arg11[%c1_69, %c256_70], %113 {strides = array<i32>} : memref<2x1024xf32, #tpu.memory_space<vmem>>, vector<1x32xf32>,
    %115 = vector.extract_strided_slice %96 {offsets = [9, 0], sizes = [1, 32], strides = [1, 1]} : vector<32x32xf32> to vector<1x32xf32>
    %c1_71 = arith.constant 1 : index
    %c288_72 = arith.constant 288 : index
    %116 = vector.load %arg11[%c1_71, %c288_72] : memref<2x1024xf32, #tpu.memory_space<vmem>>, vector<1x32xf32>
    tpu.vector_store %arg11[%c1_71, %c288_72], %115 {strides = array<i32>} : memref<2x1024xf32, #tpu.memory_space<vmem>>, vector<1x32xf32>,
    %117 = vector.extract_strided_slice %96 {offsets = [10, 0], sizes = [1, 32], strides = [1, 1]} : vector<32x32xf32> to vector<1x32xf32>
    %c1_73 = arith.constant 1 : index
    %c320_74 = arith.constant 320 : index
    %118 = vector.load %arg11[%c1_73, %c320_74] : memref<2x1024xf32, #tpu.memory_space<vmem>>, vector<1x32xf32>
    tpu.vector_store %arg11[%c1_73, %c320_74], %117 {strides = array<i32>} : memref<2x1024xf32, #tpu.memory_space<vmem>>, vector<1x32xf32>,
    %119 = vector.extract_strided_slice %96 {offsets = [11, 0], sizes = [1, 32], strides = [1, 1]} : vector<32x32xf32> to vector<1x32xf32>
    %c1_75 = arith.constant 1 : index
    %c352_76 = arith.constant 352 : index
    %120 = vector.load %arg11[%c1_75, %c352_76] : memref<2x1024xf32, #tpu.memory_space<vmem>>, vector<1x32xf32>
    tpu.vector_store %arg11[%c1_75, %c352_76], %119 {strides = array<i32>} : memref<2x1024xf32, #tpu.memory_space<vmem>>, vector<1x32xf32>,
    %121 = vector.extract_strided_slice %96 {offsets = [12, 0], sizes = [1, 32], strides = [1, 1]} : vector<32x32xf32> to vector<1x32xf32>
    %c1_77 = arith.constant 1 : index
    %c384_78 = arith.constant 384 : index
    %122 = vector.load %arg11[%c1_77, %c384_78] : memref<2x1024xf32, #tpu.memory_space<vmem>>, vector<1x32xf32>
    tpu.vector_store %arg11[%c1_77, %c384_78], %121 {strides = array<i32>} : memref<2x1024xf32, #tpu.memory_space<vmem>>, vector<1x32xf32>,
    %123 = vector.extract_strided_slice %96 {offsets = [13, 0], sizes = [1, 32], strides = [1, 1]} : vector<32x32xf32> to vector<1x32xf32>
    %c1_79 = arith.constant 1 : index
    %c416_80 = arith.constant 416 : index
    %124 = vector.load %arg11[%c1_79, %c416_80] : memref<2x1024xf32, #tpu.memory_space<vmem>>, vector<1x32xf32>
    tpu.vector_store %arg11[%c1_79, %c416_80], %123 {strides = array<i32>} : memref<2x1024xf32, #tpu.memory_space<vmem>>, vector<1x32xf32>,
    %125 = vector.extract_strided_slice %96 {offsets = [14, 0], sizes = [1, 32], strides = [1, 1]} : vector<32x32xf32> to vector<1x32xf32>
    %c1_81 = arith.constant 1 : index
    %c448_82 = arith.constant 448 : index
    %126 = vector.load %arg11[%c1_81, %c448_82] : memref<2x1024xf32, #tpu.memory_space<vmem>>, vector<1x32xf32>
    tpu.vector_store %arg11[%c1_81, %c448_82], %125 {strides = array<i32>} : memref<2x1024xf32, #tpu.memory_space<vmem>>, vector<1x32xf32>,
    %127 = vector.extract_strided_slice %96 {offsets = [15, 0], sizes = [1, 32], strides = [1, 1]} : vector<32x32xf32> to vector<1x32xf32>
    %c1_83 = arith.constant 1 : index
    %c480_84 = arith.constant 480 : index
    %128 = vector.load %arg11[%c1_83, %c480_84] : memref<2x1024xf32, #tpu.memory_space<vmem>>, vector<1x32xf32>
    tpu.vector_store %arg11[%c1_83, %c480_84], %127 {strides = array<i32>} : memref<2x1024xf32, #tpu.memory_space<vmem>>, vector<1x32xf32>,
    %129 = vector.extract_strided_slice %96 {offsets = [16, 0], sizes = [1, 32], strides = [1, 1]} : vector<32x32xf32> to vector<1x32xf32>
    %c1_85 = arith.constant 1 : index
    %c512_86 = arith.constant 512 : index
    %130 = vector.load %arg11[%c1_85, %c512_86] : memref<2x1024xf32, #tpu.memory_space<vmem>>, vector<1x32xf32>
    tpu.vector_store %arg11[%c1_85, %c512_86], %129 {strides = array<i32>} : memref<2x1024xf32, #tpu.memory_space<vmem>>, vector<1x32xf32>,
    %131 = vector.extract_strided_slice %96 {offsets = [17, 0], sizes = [1, 32], strides = [1, 1]} : vector<32x32xf32> to vector<1x32xf32>
    %c1_87 = arith.constant 1 : index
    %c544_88 = arith.constant 544 : index
    %132 = vector.load %arg11[%c1_87, %c544_88] : memref<2x1024xf32, #tpu.memory_space<vmem>>, vector<1x32xf32>
    tpu.vector_store %arg11[%c1_87, %c544_88], %131 {strides = array<i32>} : memref<2x1024xf32, #tpu.memory_space<vmem>>, vector<1x32xf32>,
    %133 = vector.extract_strided_slice %96 {offsets = [18, 0], sizes = [1, 32], strides = [1, 1]} : vector<32x32xf32> to vector<1x32xf32>
    %c1_89 = arith.constant 1 : index
    %c576_90 = arith.constant 576 : index
    %134 = vector.load %arg11[%c1_89, %c576_90] : memref<2x1024xf32, #tpu.memory_space<vmem>>, vector<1x32xf32>
    tpu.vector_store %arg11[%c1_89, %c576_90], %133 {strides = array<i32>} : memref<2x1024xf32, #tpu.memory_space<vmem>>, vector<1x32xf32>,
    %135 = vector.extract_strided_slice %96 {offsets = [19, 0], sizes = [1, 32], strides = [1, 1]} : vector<32x32xf32> to vector<1x32xf32>
    %c1_91 = arith.constant 1 : index
    %c608_92 = arith.constant 608 : index
    %136 = vector.load %arg11[%c1_91, %c608_92] : memref<2x1024xf32, #tpu.memory_space<vmem>>, vector<1x32xf32>
    tpu.vector_store %arg11[%c1_91, %c608_92], %135 {strides = array<i32>} : memref<2x1024xf32, #tpu.memory_space<vmem>>, vector<1x32xf32>,
    %137 = vector.extract_strided_slice %96 {offsets = [20, 0], sizes = [1, 32], strides = [1, 1]} : vector<32x32xf32> to vector<1x32xf32>
    %c1_93 = arith.constant 1 : index
    %c640_94 = arith.constant 640 : index
    %138 = vector.load %arg11[%c1_93, %c640_94] : memref<2x1024xf32, #tpu.memory_space<vmem>>, vector<1x32xf32>
    tpu.vector_store %arg11[%c1_93, %c640_94], %137 {strides = array<i32>} : memref<2x1024xf32, #tpu.memory_space<vmem>>, vector<1x32xf32>,
    %139 = vector.extract_strided_slice %96 {offsets = [21, 0], sizes = [1, 32], strides = [1, 1]} : vector<32x32xf32> to vector<1x32xf32>
    %c1_95 = arith.constant 1 : index
    %c672_96 = arith.constant 672 : index
    %140 = vector.load %arg11[%c1_95, %c672_96] : memref<2x1024xf32, #tpu.memory_space<vmem>>, vector<1x32xf32>
    tpu.vector_store %arg11[%c1_95, %c672_96], %139 {strides = array<i32>} : memref<2x1024xf32, #tpu.memory_space<vmem>>, vector<1x32xf32>,
    %141 = vector.extract_strided_slice %96 {offsets = [22, 0], sizes = [1, 32], strides = [1, 1]} : vector<32x32xf32> to vector<1x32xf32>
    %c1_97 = arith.constant 1 : index
    %c704_98 = arith.constant 704 : index
    %142 = vector.load %arg11[%c1_97, %c704_98] : memref<2x1024xf32, #tpu.memory_space<vmem>>, vector<1x32xf32>
    tpu.vector_store %arg11[%c1_97, %c704_98], %141 {strides = array<i32>} : memref<2x1024xf32, #tpu.memory_space<vmem>>, vector<1x32xf32>,
    %143 = vector.extract_strided_slice %96 {offsets = [23, 0], sizes = [1, 32], strides = [1, 1]} : vector<32x32xf32> to vector<1x32xf32>
    %c1_99 = arith.constant 1 : index
    %c736_100 = arith.constant 736 : index
    %144 = vector.load %arg11[%c1_99, %c736_100] : memref<2x1024xf32, #tpu.memory_space<vmem>>, vector<1x32xf32>
    tpu.vector_store %arg11[%c1_99, %c736_100], %143 {strides = array<i32>} : memref<2x1024xf32, #tpu.memory_space<vmem>>, vector<1x32xf32>,
    %145 = vector.extract_strided_slice %96 {offsets = [24, 0], sizes = [1, 32], strides = [1, 1]} : vector<32x32xf32> to vector<1x32xf32>
    %c1_101 = arith.constant 1 : index
    %c768_102 = arith.constant 768 : index
    %146 = vector.load %arg11[%c1_101, %c768_102] : memref<2x1024xf32, #tpu.memory_space<vmem>>, vector<1x32xf32>
    tpu.vector_store %arg11[%c1_101, %c768_102], %145 {strides = array<i32>} : memref<2x1024xf32, #tpu.memory_space<vmem>>, vector<1x32xf32>,
    %147 = vector.extract_strided_slice %96 {offsets = [25, 0], sizes = [1, 32], strides = [1, 1]} : vector<32x32xf32> to vector<1x32xf32>
    %c1_103 = arith.constant 1 : index
    %c800_104 = arith.constant 800 : index
    %148 = vector.load %arg11[%c1_103, %c800_104] : memref<2x1024xf32, #tpu.memory_space<vmem>>, vector<1x32xf32>
    tpu.vector_store %arg11[%c1_103, %c800_104], %147 {strides = array<i32>} : memref<2x1024xf32, #tpu.memory_space<vmem>>, vector<1x32xf32>,
    %149 = vector.extract_strided_slice %96 {offsets = [26, 0], sizes = [1, 32], strides = [1, 1]} : vector<32x32xf32> to vector<1x32xf32>
    %c1_105 = arith.constant 1 : index
    %c832_106 = arith.constant 832 : index
    %150 = vector.load %arg11[%c1_105, %c832_106] : memref<2x1024xf32, #tpu.memory_space<vmem>>, vector<1x32xf32>
    tpu.vector_store %arg11[%c1_105, %c832_106], %149 {strides = array<i32>} : memref<2x1024xf32, #tpu.memory_space<vmem>>, vector<1x32xf32>,
    %151 = vector.extract_strided_slice %96 {offsets = [27, 0], sizes = [1, 32], strides = [1, 1]} : vector<32x32xf32> to vector<1x32xf32>
    %c1_107 = arith.constant 1 : index
    %c864_108 = arith.constant 864 : index
    %152 = vector.load %arg11[%c1_107, %c864_108] : memref<2x1024xf32, #tpu.memory_space<vmem>>, vector<1x32xf32>
    tpu.vector_store %arg11[%c1_107, %c864_108], %151 {strides = array<i32>} : memref<2x1024xf32, #tpu.memory_space<vmem>>, vector<1x32xf32>,
    %153 = vector.extract_strided_slice %96 {offsets = [28, 0], sizes = [1, 32], strides = [1, 1]} : vector<32x32xf32> to vector<1x32xf32>
    %c1_109 = arith.constant 1 : index
    %c896_110 = arith.constant 896 : index
    %154 = vector.load %arg11[%c1_109, %c896_110] : memref<2x1024xf32, #tpu.memory_space<vmem>>, vector<1x32xf32>
    tpu.vector_store %arg11[%c1_109, %c896_110], %153 {strides = array<i32>} : memref<2x1024xf32, #tpu.memory_space<vmem>>, vector<1x32xf32>,
    %155 = vector.extract_strided_slice %96 {offsets = [29, 0], sizes = [1, 32], strides = [1, 1]} : vector<32x32xf32> to vector<1x32xf32>
    %c1_111 = arith.constant 1 : index
    %c928_112 = arith.constant 928 : index
    %156 = vector.load %arg11[%c1_111, %c928_112] : memref<2x1024xf32, #tpu.memory_space<vmem>>, vector<1x32xf32>
    tpu.vector_store %arg11[%c1_111, %c928_112], %155 {strides = array<i32>} : memref<2x1024xf32, #tpu.memory_space<vmem>>, vector<1x32xf32>,
    %157 = vector.extract_strided_slice %96 {offsets = [30, 0], sizes = [1, 32], strides = [1, 1]} : vector<32x32xf32> to vector<1x32xf32>
    %c1_113 = arith.constant 1 : index
    %c960_114 = arith.constant 960 : index
    %158 = vector.load %arg11[%c1_113, %c960_114] : memref<2x1024xf32, #tpu.memory_space<vmem>>, vector<1x32xf32>
    tpu.vector_store %arg11[%c1_113, %c960_114], %157 {strides = array<i32>} : memref<2x1024xf32, #tpu.memory_space<vmem>>, vector<1x32xf32>,
    %159 = vector.extract_strided_slice %96 {offsets = [31, 0], sizes = [1, 32], strides = [1, 1]} : vector<32x32xf32> to vector<1x32xf32>
    %c1_115 = arith.constant 1 : index
    %c992_116 = arith.constant 992 : index
    %160 = vector.load %arg11[%c1_115, %c992_116] : memref<2x1024xf32, #tpu.memory_space<vmem>>, vector<1x32xf32>
    tpu.vector_store %arg11[%c1_115, %c992_116], %159 {strides = array<i32>} : memref<2x1024xf32, #tpu.memory_space<vmem>>, vector<1x32xf32>,
    %c0_117 = arith.constant 0 : index
    %c0_118 = arith.constant 0 : index
    %161 = vector.load %arg11[%c0_117, %c0_118] : memref<2x1024xf32, #tpu.memory_space<vmem>>, vector<2x1024xf32>
    %162 = arith.truncf %161 : vector<2x1024xf32> to vector<2x1024xbf16>
    %c0_119 = arith.constant 0 : index
    %c0_120 = arith.constant 0 : index
    %163 = vector.load %arg8[%c0_119, %c0_120] : memref<512x1024xbf16, #tpu.memory_space<vmem>>, vector<512x1024xbf16>
    %cst_121 = arith.constant dense<0.000000e+00> : vector<2x512xf32>
    %164 = tpu.matmul %162, %163, %cst_121 {dimension_numbers = #tpu.dot_dimension_numbers<[1], [1], [0], [0], [0, 0, 1, 0], [], []>} : vector<2x1024xbf16>, vector<512x1024xbf16>, vector<2x512xf32> -> vector<2x512xf32>
    %c0_122 = arith.constant 0 : index
    %c0_123 = arith.constant 0 : index
    %165 = vector.load %arg9[%c0_122, %c0_123] : memref<1x512xf32, #tpu.memory_space<vmem>>, vector<1x512xf32>
    %166 = vector.broadcast %165 : vector<1x512xf32> to vector<2x512xf32>
    %167 = arith.addf %164, %166 : vector<2x512xf32>
    %c0_124 = arith.constant 0 : index
    %c0_125 = arith.constant 0 : index
    %168 = vector.load %arg10[%c0_124, %c0_125] : memref<2x512xf32, #tpu.memory_space<vmem>>, vector<2x512xf32>
    tpu.vector_store %arg10[%c0_124, %c0_125], %167 {strides = array<i32>} : memref<2x512xf32, #tpu.memory_space<vmem>>, vector<2x512xf32>,
    return
  }
  func.func @transform_0(%arg0: i32) -> (i32, i32) {
    %c0_i32 = arith.constant 0 : i32
    %c0_i32_0 = arith.constant 0 : i32
    %c0_i32_1 = arith.constant 0 : i32
    return %c0_i32, %c0_i32_0 : i32, i32
  }
  func.func @transform_1(%arg0: i32) -> (i32, i32) {
    %c0_i32 = arith.constant 0 : i32
    %c0_i32_0 = arith.constant 0 : i32
    %c0_i32_1 = arith.constant 0 : i32
    return %c0_i32, %c0_i32_0 : i32, i32
  }
  func.func @transform_2(%arg0: i32) -> (i32, i32) {
    %c0_i32 = arith.constant 0 : i32
    %c0_i32_0 = arith.constant 0 : i32
    %c0_i32_1 = arith.constant 0 : i32
    return %c0_i32, %c0_i32_0 : i32, i32
  }
  func.func @transform_3(%arg0: i32) -> (i32, i32) {
    %c0_i32 = arith.constant 0 : i32
    %c0_i32_0 = arith.constant 0 : i32
    %c0_i32_1 = arith.constant 0 : i32
    return %c0_i32, %c0_i32_0 : i32, i32
  }
  func.func @transform_4(%arg0: i32) -> (i32, i32) {
    %c0_i32 = arith.constant 0 : i32
    %c0_i32_0 = arith.constant 0 : i32
    %c0_i32_1 = arith.constant 0 : i32
    return %c0_i32, %c0_i32_0 : i32, i32
  }
  func.func @transform_5(%arg0: i32) -> (i32, i32) {
    %c0_i32 = arith.constant 0 : i32
    %c0_i32_0 = arith.constant 0 : i32
    %c0_i32_1 = arith.constant 0 : i32
    return %c0_i32, %c0_i32_0 : i32, i32
  }
  func.func @transform_6(%arg0: i32) -> (i32, i32) {
    %c0_i32 = arith.constant 0 : i32
    %c0_i32_0 = arith.constant 0 : i32
    %c0_i32_1 = arith.constant 0 : i32
    return %c0_i32, %c0_i32_0 : i32, i32
  }
  func.func @transform_7(%arg0: i32) -> (i32, i32) {
    %c0_i32 = arith.constant 0 : i32
    %c0_i32_0 = arith.constant 0 : i32
    return %arg0, %c0_i32 : i32, i32
  }
  func.func @transform_8(%arg0: i32) -> (i32, i32) {
    %c0_i32 = arith.constant 0 : i32
    %c0_i32_0 = arith.constant 0 : i32
    return %c0_i32, %arg0 : i32, i32
  }
  func.func @transform_9(%arg0: i32) -> (i32, i32) {
    %c0_i32 = arith.constant 0 : i32
    %c0_i32_0 = arith.constant 0 : i32
    return %c0_i32, %arg0 : i32, i32
  }
}

</mosaic_0001>

<bundles_post_ra>
// kernel: cnnv1_forward.1
= control target key start
LH: loop header
LB: loop body
LE: loop exit
PB: predicated region body
PF: predicated region fallthrough
CT: control target
= control target key end

     0   :  { %s6331_s0 = inlined_call_operand.vmem [shape: f32[64,512], index: 0, kind: input, shape index: {}]   ;;  %s6332_s1 = inlined_call_operand.vmem [shape: bf16[128,64], index: 1, kind: input, shape index: {}]   ;;  %s6333_s2 = inlined_call_operand.vmem [shape: f32[128,1], index: 2, kind: input, shape index: {}]   ;;  %s6334_s3 = inlined_call_operand.hbm [shape: bf16[64,128], index: 3, kind: input, shape index: {}]   ;;  %s6335_s4 = inlined_call_operand.vmem [shape: f32[64,1], index: 4, kind: input, shape index: {}]   ;;  %s6336_s5 = inlined_call_operand.hbm [shape: bf16[32,64], index: 5, kind: input, shape index: {}]   ;;  %s6337_s6 = inlined_call_operand.vmem [shape: f32[32,1], index: 6, kind: input, shape index: {}]   ;;  %s6338_s7 = inlined_call_operand.hbm [shape: bf16[1024,1024], index: 7, kind: input, shape index: {}]   ;;  %s6339_s8 = inlined_call_operand.hbm [shape: f32[1,1024], index: 8, kind: input, shape index: {}]   ;;  %s6340_s9 = inlined_call_operand.hbm [shape: f32[2,1024], index: 9, kind: output, shape index: {}]  }
   0x1   :  { %6384 = sst [smem:[#allocation61_spill]] %s6334_s3 }
   0x2   :  { %6385 = sst [smem:[#allocation62_spill]] %s6338_s7 }
   0x3   :  { %6386 = sst [smem:[#allocation63_spill]] %s6340_s9 }
   0x4   :  { %14 = vsyncpa [#allocation4], 0 }
   0x5   :  { %15 = vsyncpa [#allocation7], 0 }
   0x6   :  { %16 = vsyncpa [#allocation5], 0 }
   0x7   :  { %18 = vsyncpa [#allocation5 + $0x1], 0  ;;  %s4871_s30 = smov 0   ;;  %s4873_s10 = smov 0  }
   0x8   :  { %s4875_s11 = smov 0   ;;  %s4877_s12 = smov 0  }
   0x9 LB: > { %6387 = sst [smem:[#allocation15_spill]] %s4793_s30  ;;  %s4892_s13 = sadd.s32 4294967295, %s4805_s12   ;;  %s4805_s12 = sphi %s4877_s12, %s6521_s12   ;;  %s4801_s11 = sphi %s4875_s11, %s6525_s11   ;;  %s4797_s10 = sphi %s4873_s10, %s6524_s10   ;;  %s4793_s30 = sphi %s4871_s30, %s6523_s30  }
   0xa   : > { %s4178_s14 = sadd.s32 4294967294, %s4805_s12   ;;  %s4896_s15 = sadd.s32 1, %s4805_s12  }
   0xb   : > { %6388 = sst [smem:[#allocation16_spill]] %s4896_s15  ;;  %s178_s16 = sadd.s32 1, %s4801_s11 }
   0xc   : > { %s175_s17 = ssub.s32 %s4805_s12, %s4896_s15  ;;  %p185_p0 = scmp.ne.s32.totalorder %s4801_s11, %s4797_s10 }
   0xd   : > { %p176_p1 = scmp.eq.s32.totalorder %s175_s17, 0  ;;  %p186_p2 = scmp.eq.s32.totalorder %s4805_s12, 0 }
   0xe   : > { %p191_p3 = scmp.ne.s32.totalorder %s4797_s10, %s4793_s30  ;;  %p6350_p4 = scmp.eq.s32.totalorder %s4892_s13, 0 }
   0xf   : > { %s4908_s18 = scalar_select %p176_p1, %s4801_s11, %s178_s16  }
  0x10   : > { %p4910_p5 = por %p186_p2, %p185_p0  ;;  %p4916_p6 = por %p6350_p4, %p191_p3 }
  0x11   : > { %6389 = sst [smem:[#allocation17_spill]] %s4908_s18  ;;  %p241_p7 = scmp.eq.s32.totalorder %s4892_s13, 1 }
  0x12   : > { %s6391_s20 = scalar_select %p4916_p6, 1, 0 }
  0x13   : > { %p247_p8 = scmp.eq.s32.totalorder %s4178_s14, 1  ;;  %p4179_p9 = scmp.ge.s32.totalorder %s4805_s12, 1 }
  0x14   : > { %p254_p10 = scmp.lt.s32.totalorder %s4805_s12, 3  ;;  %p4923_p11 = por %p241_p7, %p185_p0 }
  0x15   : > { %p4927_p12 = por %p247_p8, %p191_p3  ;;  %s4807_s24 = smov [#allocation3]  }
  0x16   : > { %s6392_s21 = scalar_select %p4923_p11, 1, 0 }
  0x17   : > { %s6393_s22 = scalar_select %p4927_p12, 1, 0 }
  0x18   : > { %p4931_p13 = pnand %p4179_p9, %p254_p10  ;;  %s275_s25 = sshll.u32 %s4807_s24, 4  ;;  %s276_s25 = int_to_ptr.vmem [resolvable:$true] %s275_s25 }
  0x19   : > { %6394 = sst [smem:[#allocation18_spill]] %s6393_s22  ;;  %p4561_p3 = scmp.lt.s32.totalorder %s4805_s12, 2 }
  0x1a   : > { %s6395_s23 = scalar_select %p4931_p13, 1, 0 }
  0x1b   : > { %p4541_p1 = pneg %p4931_p13  ;;  %s308_s27 = sand.u32 1, %s4805_s12  }
  0x1c   : > { %s4636_s28 = scalar_lea.vmem %s276_s25, 512  ;;  %p4644_p12 = scmp.lt.s32.totalorder %s276_s25, %s276_s25 }
  0x1d   : > { %p4939_p2 = pnand %p4541_p1, %p6350_p4  ;;  %p4637_p8 = scmp.ne.s32.totalorder %s276_s25, %s4636_s28 }
  0x1e   : > { %p4645_p11 = scmp.lt.s32.totalorder %s4636_s28, %s4636_s28 }
  0x1f   : > { %p6351_p7 = pneg %p4939_p2 }
  0x20   : > { %p4646_p6 = por %p4645_p11, %p4644_p12 }
  0x21   : > { %p4639_p9 = pnand %p4637_p8, %p6351_p7 }
  0x23   : > { %p4640_p10 = pneg %p4639_p9 }
  0x25   : > { %p4647_p1 = pnand %p4646_p6, %p4640_p10 }
  0x27   : > { %4650 = shalt.err (!%p4647_p1)
}
  0x28   : > { %s6348_s29 = smov 64   ;;  %s6349_s14 = smov 4  }
  0x29   : > { %s6397_s3 = sld [smem:[#allocation61_spill]]  ;;  %p4963_p6 = pnand %p4561_p3, %p4910_p5 }
  0x2a   : > { %s310_s28 = sand.u32 1, %s4801_s11   ;;  %s4524_s15 = sshll.u32 %s4805_s12, 15 }
  0x2b   : > { %s4183_s18 = sshll.u32 %s310_s28, 11  ;;  %s6399_s7 = sld [smem:[#allocation62_spill]] }
  0x2c   : > { %s312_s19 = scalar_lea.vmem [#allocation8], %s4183_s18  ;;  %s4978_s16 = scalar_lea.sflag [#allocation4], %s308_s27 }
  0x2d   : > { %p4653_p11 = pneg %p4963_p6 }
  0x2f   : > { %4544 = dma.hbm_to_vmem [thread:$0]  (!%p4939_p2), %s6397_s3, 512, %s276_s25, [#allocation4], %s6348_s29, %s6348_s29, %s6349_s14  }
  0x30   : > { %s320_s25 = sshll.u32 %s312_s19, 4  ;;  %s4976_s25 = int_to_ptr.vmem [resolvable:$true] %s320_s25 }
  0x31   : > { %s4974_s9 = scalar_lea.hbm %s6399_s7, %s4524_s15  ;;  %s4656_s22 = scalar_lea.hbm %s6399_s7, 65536 }
  0x32   : > { %s4651_s17 = scalar_lea.hbm %s4974_s9, 32768  ;;  %p4657_p8 = scmp.lt.s32.totalorder %s4974_s9, %s6399_s7 }
  0x33   : > { %p4652_p5 = scmp.ne.s32.totalorder %s4974_s9, %s4651_s17  ;;  %p4658_p9 = scmp.lt.s32.totalorder %s4656_s22, %s4651_s17 }
  0x35   : > { %p4654_p12 = pnand %p4653_p11, %p4652_p5  ;;  %p4659_p10 = por %p4658_p9, %p4657_p8 }
  0x37   : > { %p4655_p3 = pneg %p4654_p12 }
  0x39   : > { %p4660_p1 = pnand %p4659_p10, %p4655_p3 }
  0x3b   : > { %4663 = shalt.err (!%p4660_p1)
}
  0x3c   : > { %s4664_s18 = scalar_lea.vmem %s4976_s25, 32768  ;;  %s4810_s27 = smov [#allocation8]  }
  0x3d   : > { %p4665_p0 = scmp.ne.s32.totalorder %s4976_s25, %s4664_s18  ;;  %s4669_s19 = sshll.u32 %s4810_s27, 4  ;;  %s4670_s19 = int_to_ptr.vmem [resolvable:$false] %s4669_s19 }
  0x3e   : > { %s4671_s30 = scalar_lea.vmem %s4670_s19, 65536  ;;  %p4672_p4 = scmp.lt.s32.totalorder %s4976_s25, %s4670_s19 }
  0x3f   : > { %p4667_p5 = pnand %p4665_p0, %p4653_p11  ;;  %p4673_p7 = scmp.lt.s32.totalorder %s4671_s30, %s4664_s18 }
  0x41   : > { %p4668_p12 = pneg %p4667_p5  ;;  %p4674_p13 = por %p4673_p7, %p4672_p4 }
  0x43   : > { %p4675_p8 = pnand %p4674_p13, %p4668_p12 }
  0x45   : > { %4678 = shalt.err (!%p4675_p8)
}
  0x46   : > { %s4811_s29 = smov 512   ;;  %s4812_s14 = smov 32  }
  0x47   : > { %4551 = dma.hbm_to_vmem [thread:$0]  (!%p4963_p6), %s4974_s9, 32768, %s4976_s25, %s4978_s16, %s4811_s29, %s4811_s29, %s4812_s14  }
  0x48   : > { %s4813_s17 = smov [#allocation6]   ;;  %s4187_s22 = sshll.u32 %s310_s28, 2 }
  0x49   : > { %s291_s15 = sshll.u32 %s4813_s17, 4  ;;  %p6400_p4 = pneg %p4939_p2  ;;  %s292_s15 = int_to_ptr.vmem [resolvable:$true] %s291_s15 }
  0x4a   : > { %s4690_s27 = scalar_lea.vmem %s292_s15, 256  ;;  %p4698_p3 = scmp.lt.s32.totalorder %s292_s15, %s292_s15 }
  0x4b   : > { %p4691_p0 = scmp.ne.s32.totalorder %s292_s15, %s4690_s27  ;;  %p4699_p9 = scmp.lt.s32.totalorder %s4690_s27, %s4690_s27 }
  0x4d   : > { %p4693_p13 = pnand %p4691_p0, %p6400_p4  ;;  %p4700_p10 = por %p4699_p9, %p4698_p3 }
  0x4f   : > { %p4694_p7 = pneg %p4693_p13 }
  0x51   : > { %p4701_p1 = pnand %p4700_p10, %p4694_p7 }
  0x53   : > { %4704 = shalt.err (!%p4701_p1)
}
  0x54   : > { %s6401_s18 = smov 4   ;;  %s6402_s9 = smov 64  }
  0x55   : > { %4547 = dma.hbm_to_vmem [thread:$0]  (!%p4939_p2), %s6336_s5, 256, %s292_s15, [#allocation7], %s6402_s9, %s6402_s9, %s6401_s18  }
  0x56   : > { %s4525_s28 = sshll.u32 %s4805_s12, 6  ;;  %s334_s30 = scalar_lea.vmem [#allocation9], %s4187_s22 }
  0x57   : > { %s342_s29 = sshll.u32 %s334_s30, 4  ;;  %s340_s27 = scalar_lea.hbm %s6339_s8, %s4525_s28  ;;  %s343_s29 = int_to_ptr.vmem [resolvable:$true] %s342_s29 }
  0x58   : > { %s4705_s3 = scalar_lea.hbm %s340_s27, 64  ;;  %s4710_s25 = scalar_lea.hbm %s6339_s8, 128 }
  0x59   : > { %p4706_p5 = scmp.ne.s32.totalorder %s340_s27, %s4705_s3  ;;  %p4711_p2 = scmp.lt.s32.totalorder %s340_s27, %s6339_s8 }
  0x5a   : > { %p4712_p0 = scmp.lt.s32.totalorder %s4710_s25, %s4705_s3 }
  0x5b   : > { %p4708_p12 = pnand %p4706_p5, %p4653_p11 }
  0x5c   : > { %p4713_p4 = por %p4712_p0, %p4711_p2 }
  0x5d   : > { %p4709_p8 = pneg %p4708_p12 }
  0x5f   : > { %p4714_p13 = pnand %p4713_p4, %p4709_p8 }
  0x61   : > { %4717 = shalt.err (!%p4714_p13)
}
  0x62   : > { %s4718_s22 = scalar_lea.vmem %s343_s29, 64  ;;  %s4814_s18 = smov [#allocation9]  }
  0x63   : > { %p4719_p7 = scmp.ne.s32.totalorder %s343_s29, %s4718_s22  ;;  %s4723_s9 = sshll.u32 %s4814_s18, 4  ;;  %s4724_s9 = int_to_ptr.vmem [resolvable:$false] %s4723_s9 }
  0x64   : > { %s4725_s7 = scalar_lea.vmem %s4724_s9, 128  ;;  %p4726_p10 = scmp.lt.s32.totalorder %s343_s29, %s4724_s9 }
  0x65   : > { %p4721_p3 = pnand %p4719_p7, %p4653_p11  ;;  %p4727_p1 = scmp.lt.s32.totalorder %s4725_s7, %s4718_s22 }
  0x67   : > { %p4722_p9 = pneg %p4721_p3  ;;  %p4728_p5 = por %p4727_p1, %p4726_p10 }
  0x69   : > { %p4729_p12 = pnand %p4728_p5, %p4722_p9 }
  0x6b   : > { %4732 = shalt.err (!%p4729_p12)
}
  0x6c   : > { %4554 = dma.hbm_to_vmem [thread:$0]  (!%p4963_p6), %s340_s27, 64, %s343_s29, %s4978_s16  }
  0x6d   : > { %p6403_p8 = scmp.ne.s32.totalorder %s6395_s23, 0 }
  0x6f   : > { %351 = sbr.rel (%p6403_p8) target bundleno = 1891 (0x763), region = 56 }
  0x74   : > { %p6404_p2 = scmp.eq.s32.totalorder %s4892_s13, 0 }
  0x76   : > { %4776 = dma.done.wait (%p6404_p2), [#allocation4], 512   ;;  %p6405_p11 = pmov %p6404_p2 }
  0x77   : > { %p6406_p0 = pmov %p6404_p2 }
  0x78   : > { %4778 = vsyncadd (%p6405_p11), [#allocation4], 4294966784 }
  0x79   : > { %4780 = dma.done.wait (%p6406_p0), [#allocation7], 256   ;;  %p6407_p4 = pmov %p6406_p0 }
  0x7a   : > { %s361_s3 = sand.u32 1, %s4892_s13   ;;  %s5049_s24 = sand.u32 1, %s4797_s10  }
  0x7b   : > { %4782 = vsyncadd (%p6407_p4), [#allocation7], 4294967040  ;;  %s4193_s23 = sshll.u32 %s5049_s24, 11  ;;  %s362_s16 = scalar_lea.sflag [#allocation4], %s361_s3 }
  0x7c   : > { %s5052_s28 = scalar_lea.vmem [#allocation8], %s4193_s23  ;;  %p6408_p6 = scmp.ne.s32.totalorder %s6391_s20, 0 }
  0x7e   : > { %4784 = dma.done.wait (%p6408_p6), %s362_s16, 32832  }
  0x7f   : > { %4786 = vsyncadd (%p6408_p6), %s362_s16, 4294934464  ;;  %v6353_v0 = vmov 0   ;;  %v443_v1 = vld [vmem:[%s6331_s0 + $0xc8] sm:$0xff]  ;;  %v445_v3 = vld [vmem:[%s6331_s0 + $0xd8] sm:$0xff]  ;;  %vm618_vm0 = vcmask 523264   ;;  %vm1574_vm1 = vcmask 253952  }
  0x80   : > { %675 = vmatprep.mubr.bf16.mxu0 %v6353_v0  ;;  %788 = vmatprep.mubr.bf16.mxu1 %v6353_v0  ;;  %v447_v2 = vld [vmem:[%s6331_s0 + $0xe8] sm:$0xff]  ;;  %v449_v5 = vld [vmem:[%s6331_s0 + $0xf8] sm:$0xff]  ;;  %v442_v6 = vld [vmem:[%s6331_s0 + $0xc0] sm:$0xff]  ;;  %s4817_s30 = smov 32   ;;  %s4818_s29 = smov 64   ;;  %vm1589_vm2 = vcmask 516352  }
  0x81   : > { %4608 = vset.pattern.permute.xlu0 %v6353_v0  ;;  %4609 = vset.pattern.permute.xlu1 %v6353_v0  ;;  %v463_v4 = vpack.c.bf16 %v447_v2, %v443_v1  ;;  %v446_v7 = vld [vmem:[%s6331_s0 + $0xe0] sm:$0xff]  ;;  %v465_v8 = vpack.c.bf16 %v449_v5, %v445_v3  ;;  %v444_v10 = vld [vmem:[%s6331_s0 + $0xd0] sm:$0xff]  ;;  %v435_v12 = vld [vmem:[%s6331_s0 + $0x88] sm:$0xff]  ;;  %s4819_s14 = smov 96   ;;  %vm1595_vm3 = vcmask 778752   ;;  %vm1602_vm4 = vcmask 1041152  }
  0x82   : > { %v462_v9 = vpack.c.bf16 %v446_v7, %v442_v6  ;;  %v448_v11 = vld [vmem:[%s6331_s0 + $0xf0] sm:$0xff]  ;;  %v439_v14 = vld [vmem:[%s6331_s0 + $0xa8] sm:$0xff]  ;;  %v437_v15 = vld [vmem:[%s6331_s0 + $0x98] sm:$0xff]  ;;  %s4194_s17 = sshll.u32 %s5049_s24, 2  ;;  %s4526_s20 = sshll.u32 %s4892_s13, 7 }
  0x83   : > { %651 = vmatprep.subr.bf16.mxu0 %v463_v4  ;;  %v464_v13 = vpack.c.bf16 %v448_v11, %v444_v10  ;;  %v441_v16 = vld [vmem:[%s6331_s0 + $0xb8] sm:$0xff]  ;;  %764 = vmatprep.subr.bf16.mxu1 %v465_v8  ;;  %v459_v17 = vpack.c.bf16 %v439_v14, %v435_v12  ;;  %v434_v19 = vld [vmem:[%s6331_s0 + $0x80] sm:$0xff]  ;;  %v436_v21 = vld [vmem:[%s6331_s0 + $0x90] sm:$0xff]  ;;  %s374_s27 = scalar_lea.vmem [#allocation9], %s4194_s17  ;;  %s6515_s22 = sld [smem:[#allocation63_spill]] }
  0x84   : > { %652 = vmatpush1.bf16.msra.mxu0 %v462_v9  ;;  %v461_v18 = vpack.c.bf16 %v441_v16, %v437_v15  ;;  %v438_v20 = vld [vmem:[%s6331_s0 + $0xa0] sm:$0xff]  ;;  %v440_v23 = vld [vmem:[%s6331_s0 + $0xb0] sm:$0xff]  ;;  %v427_v24 = vld [vmem:[%s6331_s0 + $0x48] sm:$0xff]  ;;  %s4055_s9 = scalar_lea.sflag [#allocation5], %s5049_s24  ;;  %p6516_p7 = scmp.ne.s32.totalorder %s6392_s21, 0 }
  0x85   : > { %765 = vmatpush1.bf16.msra.mxu1 %v464_v13  ;;  %v458_v22 = vpack.c.bf16 %v438_v20, %v434_v19  ;;  %v431_v25 = vld [vmem:[%s6331_s0 + $0x68] sm:$0xff]  ;;  %653 = vmatprep.subr.bf16.mxu0 %v459_v17  ;;  %v460_v26 = vpack.c.bf16 %v440_v23, %v436_v21  ;;  %v429_v28 = vld [vmem:[%s6331_s0 + $0x58] sm:$0xff]  ;;  %v426_v30 = vld [vmem:[%s6331_s0 + $0x40] sm:$0xff]  ;;  %s4820_s13 = smov [#allocation10]  }
  0x86   : > { %766 = vmatprep.subr.bf16.mxu1 %v461_v18  ;;  %v455_v27 = vpack.c.bf16 %v431_v25, %v427_v24  ;;  %v433_v29 = vld [vmem:[%s6331_s0 + $0x78] sm:$0xff]  ;;  %v430_v32 = vld [vmem:[%s6331_s0 + $0x60] sm:$0xff]  ;;  %v428_v33 = vld [vmem:[%s6331_s0 + $0x50] sm:$0xff]  ;;  %s4737_s3 = sshll.u32 %s4820_s13, 4  ;;  %s4738_s3 = int_to_ptr.vmem [resolvable:$false] %s4737_s3 }
  0x87   : > { %v457_v31 = vpack.c.bf16 %v433_v29, %v429_v28  ;;  %v432_v34 = vld [vmem:[%s6331_s0 + $0x70] sm:$0xff]  ;;  %v454_v35 = vpack.c.bf16 %v430_v32, %v426_v30  ;;  %v419_v36 = vld [vmem:[%s6331_s0 + $0x8] sm:$0xff]  ;;  %v421_v38 = vld [vmem:[%s6331_s0 + $0x18] sm:$0xff]  ;;  %s4739_s23 = scalar_lea.vmem %s4738_s3, 256 }
  0x88   : > { %654 = vmatpush1.bf16.msra.mxu0 %v458_v22  ;;  %v423_v37 = vld [vmem:[%s6331_s0 + $0x28] sm:$0xff]  ;;  %v456_v39 = vpack.c.bf16 %v432_v34, %v428_v33  ;;  %v425_v41 = vld [vmem:[%s6331_s0 + $0x38] sm:$0xff]  ;;  %v418_v42 = vld [vmem:[%s6331_s0] sm:$0xff] }
  0x89   : > { %767 = vmatpush1.bf16.msra.mxu1 %v460_v26  ;;  %655 = vmatprep.subr.bf16.mxu0 %v455_v27  ;;  %v451_v40 = vpack.c.bf16 %v423_v37, %v419_v36  ;;  %v422_v43 = vld [vmem:[%s6331_s0 + $0x20] sm:$0xff]  ;;  %v453_v44 = vpack.c.bf16 %v425_v41, %v421_v38  ;;  %v420_v45 = vld [vmem:[%s6331_s0 + $0x10] sm:$0xff]  ;;  %v497_v52 = vld [vmem:[%s6333_s2 + $0x78] sm:$0xff]  ;;  %s4067_s18 = scalar_lea.hbm %s6515_s22, %s4526_s20 }
  0x8a   : > { %768 = vmatprep.subr.bf16.mxu1 %v457_v31  ;;  %v424_v46 = vld [vmem:[%s6331_s0 + $0x30] sm:$0xff]  ;;  %v450_v47 = vpack.c.bf16 %v422_v43, %v418_v42  ;;  %v4610_v49 = vld [vmem:[%s6332_s1] sm:$0xff]   ;;  %v495_v53 = vld [vmem:[%s6333_s2 + $0x68] sm:$0xff] }
  0x8b   : > { %v452_v48 = vpack.c.bf16 %v424_v46, %v420_v45  ;;  %v496_v50 = vld [vmem:[%s6333_s2 + $0x70] sm:$0xff]  ;;  %v494_v51 = vld [vmem:[%s6333_s2 + $0x60] sm:$0xff]  ;;  %v4611_v55 = vld [vmem:[%s6332_s1 + $0x8] sm:$0xff]  }
  0x8c   : > { %656 = vmatpush1.bf16.msra.mxu0 %v454_v35  ;;  %570 = vperm.xlu0 %4608, %v496_v50   ;;  %v492_v54 = vld [vmem:[%s6333_s2 + $0x50] sm:$0xff]  ;;  %v493_v56 = vld [vmem:[%s6333_s2 + $0x58] sm:$0xff]  ;;  %v490_v57 = vld [vmem:[%s6333_s2 + $0x40] sm:$0xff] }
  0x8d   : > { %769 = vmatpush1.bf16.msra.mxu1 %v456_v39  ;;  %657 = vmatprep.subr.bf16.mxu0 %v451_v40  ;;  %v491_v58 = vld [vmem:[%s6333_s2 + $0x48] sm:$0xff]  ;;  %v488_v59 = vld [vmem:[%s6333_s2 + $0x30] sm:$0xff]  ;;  %v489_v61 = vld [vmem:[%s6333_s2 + $0x38] sm:$0xff] }
  0x8e   : > { %770 = vmatprep.subr.bf16.mxu1 %v453_v44  ;;  %560 = vperm.xlu1 %4609, %v494_v51   ;;  %v4612_v60 = vld [vmem:[%s6332_s1 + $0x10] sm:$0xff]   ;;  %v486_v62 = vld [vmem:[%s6333_s2 + $0x20] sm:$0xff]  ;;  %v487_v63 = vld [vmem:[%s6333_s2 + $0x28] sm:$0xff] }
  0x8f   : > { %v484_v1 = vld [vmem:[%s6333_s2 + $0x10] sm:$0xff]  ;;  %v4613_v2 = vld [vmem:[%s6332_s1 + $0x18] sm:$0xff]   ;;  %v482_v4 = vld [vmem:[%s6333_s2] sm:$0xff] }
  0x90   : > { %658 = vmatpush1.bf16.msra.mxu0 %v450_v47  ;;  %575 = vperm.xlu0 %4608, %v497_v52   ;;  %v485_v3 = vld [vmem:[%s6333_s2 + $0x18] sm:$0xff]  ;;  %v483_v5 = vld [vmem:[%s6333_s2 + $0x8] sm:$0xff]  ;;  %v1043_v6 = vld [vmem:[%s6335_s4 + $0x30] sm:$0xff] }
  0x91   : > { %771 = vmatpush1.bf16.msra.mxu1 %v452_v48  ;;  %v4614_v7 = vld [vmem:[%s6332_s1 + $0x20] sm:$0xff]   ;;  %v1044_v8 = vld [vmem:[%s6335_s4 + $0x38] sm:$0xff]  ;;  %v1042_v10 = vld [vmem:[%s6335_s4 + $0x28] sm:$0xff] }
  0x92   : > { %565 = vperm.xlu1 %4609, %v495_v53   ;;  %v1041_v9 = vld [vmem:[%s6335_s4 + $0x20] sm:$0xff]  ;;  %v1039_v11 = vld [vmem:[%s6335_s4 + $0x10] sm:$0xff]  ;;  %v4615_v12 = vld [vmem:[%s6332_s1 + $0x28] sm:$0xff]  }
  0x93   : > { %4204 = vmatmul.mubr.msk.bf16.vlgmr.msra.gmra.mxu0 %vm618_vm0, %v4610_v49  ;;  %v1040_v13 = vld [vmem:[%s6335_s4 + $0x18] sm:$0xff]  ;;  %v1037_v14 = vld [vmem:[%s6335_s4] sm:$0xff]  ;;  %v1038_v15 = vld [vmem:[%s6335_s4 + $0x8] sm:$0xff] }
  0x94   : > { %4212 = vmatmul.mubr.msk.bf16.vlgmr.msra.gmra.mxu1 %vm618_vm0, %v4610_v49  ;;  %685 = vmatprep.mubr.bf16.mxu0 %v6353_v0  ;;  %v1342_v16 = vld [vmem:[%s6337_s6 + $0x18] sm:$0xff]  ;;  %v4616_v17 = vld [vmem:[%s6332_s1 + $0x30] sm:$0xff]   ;;  %v1340_v19 = vld [vmem:[%s6337_s6 + $0x8] sm:$0xff] }
  0x95   : > { %798 = vmatprep.mubr.bf16.mxu1 %v6353_v0  ;;  %550 = vperm.xlu0 %4608, %v492_v54   ;;  %v1341_v18 = vld [vmem:[%s6337_s6 + $0x10] sm:$0xff]  ;;  %v1339_v20 = vld [vmem:[%s6337_s6] sm:$0xff]  ;;  %v4617_v21 = vld [vmem:[%s6332_s1 + $0x38] sm:$0xff]  }
  0x96   : > { %555 = vperm.xlu1 %4609, %v493_v56  }
  0x99   : > { %540 = vperm.xlu0 %4608, %v490_v57  }
  0x9a   : > { %545 = vperm.xlu1 %4609, %v491_v58  }
  0x9b   : > { %4205 = vmatmul.mubr.msk.bf16.gmra.mxu0 %vm618_vm0, %v4611_v55 }
  0x9c   : > { %4213 = vmatmul.mubr.msk.bf16.gmra.mxu1 %vm618_vm0, %v4611_v55  ;;  %695 = vmatprep.mubr.bf16.mxu0 %v6353_v0 }
  0x9d   : > { %808 = vmatprep.mubr.bf16.mxu1 %v6353_v0  ;;  %530 = vperm.xlu0 %4608, %v488_v59  }
  0x9e   : > { %535 = vperm.xlu1 %4609, %v489_v61  }
  0xa1   : > { %520 = vperm.xlu0 %4608, %v486_v62  }
  0xa2   : > { %525 = vperm.xlu1 %4609, %v487_v63  }
  0xa3   : > { %4206 = vmatmul.mubr.msk.bf16.gmra.mxu0 %vm618_vm0, %v4612_v60 }
  0xa4   : > { %4214 = vmatmul.mubr.msk.bf16.gmra.mxu1 %vm618_vm0, %v4612_v60  ;;  %705 = vmatprep.mubr.bf16.mxu0 %v6353_v0 }
  0xa5   : > { %818 = vmatprep.mubr.bf16.mxu1 %v6353_v0  ;;  %510 = vperm.xlu0 %4608, %v484_v1  }
  0xa6   : > { %515 = vperm.xlu1 %4609, %v485_v3  }
  0xa9   : > { %500 = vperm.xlu0 %4608, %v482_v4  }
  0xaa   : > { %505 = vperm.xlu1 %4609, %v483_v5  }
  0xab   : > { %4207 = vmatmul.mubr.msk.bf16.gmra.mxu0 %vm618_vm0, %v4613_v2 }
  0xac   : > { %4215 = vmatmul.mubr.msk.bf16.gmra.mxu1 %vm618_vm0, %v4613_v2  ;;  %715 = vmatprep.mubr.bf16.mxu0 %v6353_v0 }
  0xad   : > { %828 = vmatprep.mubr.bf16.mxu1 %v6353_v0  ;;  %1077 = vperm.xlu0 %4608, %v1043_v6  }
  0xae   : > { %1082 = vperm.xlu1 %4609, %v1044_v8  }
  0xb1   : > { %1067 = vperm.xlu0 %4608, %v1041_v9  }
  0xb2   : > { %1072 = vperm.xlu1 %4609, %v1042_v10  }
  0xb3   : > { %4208 = vmatmul.mubr.msk.bf16.gmra.mxu0 %vm618_vm0, %v4614_v7 }
  0xb4   : > { %4216 = vmatmul.mubr.msk.bf16.gmra.mxu1 %vm618_vm0, %v4614_v7  ;;  %725 = vmatprep.mubr.bf16.mxu0 %v6353_v0 }
  0xb5   : > { %838 = vmatprep.mubr.bf16.mxu1 %v6353_v0  ;;  %1057 = vperm.xlu0 %4608, %v1039_v11  }
  0xb6   : > { %1062 = vperm.xlu1 %4609, %v1040_v13  }
  0xb9   : > { %1047 = vperm.xlu0 %4608, %v1037_v14  }
  0xba   : > { %1052 = vperm.xlu1 %4609, %v1038_v15  }
  0xbb   : > { %4209 = vmatmul.mubr.msk.bf16.gmra.mxu0 %vm618_vm0, %v4615_v12 }
  0xbc   : > { %4217 = vmatmul.mubr.msk.bf16.gmra.mxu1 %vm618_vm0, %v4615_v12  ;;  %735 = vmatprep.mubr.bf16.mxu0 %v6353_v0 }
  0xbd   : > { %848 = vmatprep.mubr.bf16.mxu1 %v6353_v0  ;;  %1360 = vperm.xlu0 %4608, %v1342_v16  }
  0xbe   : > { %1355 = vperm.xlu1 %4609, %v1341_v18  }
  0xc1   : > { %1350 = vperm.xlu0 %4608, %v1340_v19  }
  0xc2   : > { %1345 = vperm.xlu1 %4609, %v1339_v20  }
  0xc3   : > { %4210 = vmatmul.mubr.msk.bf16.gmra.mxu0 %vm618_vm0, %v4616_v17 }
  0xc4   : > { %4218 = vmatmul.mubr.msk.bf16.gmra.mxu1 %vm618_vm0, %v4616_v17  ;;  %745 = vmatprep.mubr.bf16.mxu0 %v6353_v0 }
  0xc5   : > { %858 = vmatprep.mubr.bf16.mxu1 %v6353_v0 }
  0xcb   : > { %4211 = vmatmul.mubr.msk.bf16.gmra.mxu0 %vm618_vm0, %v4617_v21 }
  0xcc   : > { %4219 = vmatmul.mubr.msk.bf16.gmra.mxu1 %vm618_vm0, %v4617_v21  ;;  %1141 = vmatprep.mubr.bf16.mxu0 %v6353_v0 }
  0xcd   : > { %1214 = vmatprep.mubr.bf16.mxu1 %v6353_v0 }
 0x107   : > { %v5298_v22 = vpop.permute.xlu0 %570 }
 0x109   : > { %v5300_v23 = vpop.permute.xlu1 %560 }
 0x10b   : > { %v5302_v24 = vpop.permute.xlu0 %575 }
 0x10d   : > { %v5304_v25 = vpop.permute.xlu1 %565 }
 0x110   : > { %v5306_v26 = vpop.permute.xlu0 %550 }
 0x111   : > { %v5308_v27 = vpop.permute.xlu1 %555 }
 0x114   : > { %v5310_v28 = vpop.permute.xlu0 %540 }
 0x115   : > { %v5312_v29 = vpop.permute.xlu1 %545 }
 0x118   : > { %v5314_v30 = vpop.permute.xlu0 %530 }
 0x119   : > { %v5316_v31 = vpop.permute.xlu1 %535 }
 0x11c   : > { %v5318_v32 = vpop.permute.xlu0 %520 }
 0x11d   : > { %v5320_v33 = vpop.permute.xlu1 %525 }
 0x120   : > { %v511_v34 = vpop.permute.xlu0 %510 }
 0x121   : > { %v516_v35 = vpop.permute.xlu1 %515 }
 0x124   : > { %v501_v36 = vpop.permute.xlu0 %500 }
 0x125   : > { %v506_v42 = vpop.permute.xlu1 %505 }
 0x153   : > { %v677_v37 = vpop.f32.mrf.mxu0 }
 0x154   : > { %v678_v38 = vadd.f32 %v677_v37, %v501_v36  ;;  %v790_v39 = vpop.f32.mrf.mxu1 }
 0x155   : > { %v791_v40 = vadd.f32 %v790_v39, %v501_v36  ;;  %v679_v41 = vpop.f32.mrf.mxu0 }
 0x156   : > { %v680_v43 = vadd.f32 %v679_v41, %v501_v36  ;;  %v792_v44 = vpop.f32.mrf.mxu1  ;;  %v869_v47 = vmul.f32 0.2, %v678_v38 }
 0x157   : > { %v793_v45 = vadd.f32 %v792_v44, %v501_v36  ;;  %v681_v46 = vpop.f32.mrf.mxu0  ;;  %v871_v50 = vmul.f32 0.2, %v791_v40 }
 0x158   : > { %v682_v48 = vadd.f32 %v681_v46, %v506_v42  ;;  %v794_v49 = vpop.f32.mrf.mxu1  ;;  %v870_v53 = vmul.f32 0.2, %v680_v43  ;;  %v933_v61 = vmax.f32 %v678_v38, %v869_v47 }
 0x159   : > { %v795_v51 = vadd.f32 %v794_v49, %v506_v42  ;;  %v683_v52 = vpop.f32.mrf.mxu0  ;;  %v872_v57 = vmul.f32 0.2, %v793_v45  ;;  %v935_v3 = vmax.f32 %v791_v40, %v871_v50 }
 0x15a   : > { %v873_v54 = vmul.f32 0.2, %v682_v48  ;;  %v684_v55 = vadd.f32 %v683_v52, %v506_v42  ;;  %v796_v56 = vpop.f32.mrf.mxu1  ;;  %v934_v8 = vmax.f32 %v680_v43, %v870_v53 }
 0x15b   : > { %v875_v58 = vmul.f32 0.2, %v795_v51  ;;  %v797_v59 = vadd.f32 %v796_v56, %v506_v42  ;;  %v687_v60 = vpop.f32.mrf.mxu0  ;;  %v936_v13 = vmax.f32 %v793_v45, %v872_v57 }
 0x15c   : > { %v937_v62 = vmax.f32 %v682_v48, %v873_v54  ;;  %v874_v63 = vmul.f32 0.2, %v684_v55  ;;  %v688_v1 = vadd.f32 %v687_v60, %v511_v34  ;;  %v800_v2 = vpop.f32.mrf.mxu1 }
 0x15d   : > { %v939_v4 = vmax.f32 %v795_v51, %v875_v58  ;;  %v876_v5 = vmul.f32 0.2, %v797_v59  ;;  %v801_v6 = vadd.f32 %v800_v2, %v511_v34  ;;  %v689_v7 = vpop.f32.mrf.mxu0 }
 0x15e   : > { %v5322_v9 = vpack.c.bf16 %v937_v62, %v933_v61  ;;  %v938_v10 = vmax.f32 %v684_v55, %v874_v63  ;;  %v690_v11 = vadd.f32 %v689_v7, %v511_v34  ;;  %v802_v12 = vpop.f32.mrf.mxu1  ;;  %v877_v18 = vmul.f32 0.2, %v688_v1 }
 0x15f   : > { %v5324_v14 = vpack.c.bf16 %v939_v4, %v935_v3  ;;  %v940_v15 = vmax.f32 %v797_v59, %v876_v5  ;;  %v803_v16 = vadd.f32 %v802_v12, %v511_v34  ;;  %v691_v17 = vpop.f32.mrf.mxu0  ;;  %v879_v36 = vmul.f32 0.2, %v801_v6 }
 0x160   : > { %6409 = vst [vmem:[#allocation19_spill] sm:$0xff] %v5322_v9  ;;  %v692_v19 = vadd.f32 %v691_v17, %v516_v35  ;;  %v804_v20 = vpop.f32.mrf.mxu1  ;;  %v5326_v21 = vpack.c.bf16 %v938_v10, %v934_v8  ;;  %v878_v40 = vmul.f32 0.2, %v690_v11  ;;  %v941_v34 = vmax.f32 %v688_v1, %v877_v18 }
 0x161   : > { %6410 = vst [vmem:[#allocation20_spill] sm:$0xff] %v5324_v14  ;;  %v805_v37 = vadd.f32 %v804_v20, %v516_v35  ;;  %v693_v38 = vpop.f32.mrf.mxu0  ;;  %v5328_v39 = vpack.c.bf16 %v940_v15, %v936_v13  ;;  %v880_v44 = vmul.f32 0.2, %v803_v16  ;;  %v943_v51 = vmax.f32 %v801_v6, %v879_v36 }
 0x162   : > { %6411 = vst [vmem:[#allocation21_spill] sm:$0xff] %v5326_v21  ;;  %v881_v41 = vmul.f32 0.2, %v692_v19  ;;  %v694_v42 = vadd.f32 %v693_v38, %v516_v35  ;;  %v806_v43 = vpop.f32.mrf.mxu1  ;;  %v942_v55 = vmax.f32 %v690_v11, %v878_v40 }
 0x163   : > { %6412 = vst [vmem:[#allocation22_spill] sm:$0xff] %v5328_v39  ;;  %v883_v45 = vmul.f32 0.2, %v805_v37  ;;  %v807_v46 = vadd.f32 %v806_v43, %v516_v35  ;;  %v697_v47 = vpop.f32.mrf.mxu0  ;;  %v944_v59 = vmax.f32 %v803_v16, %v880_v44 }
 0x164   : > { %v945_v48 = vmax.f32 %v692_v19, %v881_v41  ;;  %v882_v49 = vmul.f32 0.2, %v694_v42  ;;  %v810_v50 = vpop.f32.mrf.mxu1 }
 0x165   : > { %v947_v52 = vmax.f32 %v805_v37, %v883_v45  ;;  %v884_v53 = vmul.f32 0.2, %v807_v46  ;;  %v699_v54 = vpop.f32.mrf.mxu0 }
 0x166   : > { %v5330_v56 = vpack.c.bf16 %v945_v48, %v941_v34  ;;  %v946_v57 = vmax.f32 %v694_v42, %v882_v49  ;;  %v812_v58 = vpop.f32.mrf.mxu1  ;;  %v5339_v42 = vadd.f32 %v699_v54, %v5318_v32  ;;  %v5351_v49 = vadd.f32 %v697_v47, %v5318_v32 }
 0x167   : > { %v5332_v60 = vpack.c.bf16 %v947_v52, %v943_v51  ;;  %v948_v61 = vmax.f32 %v807_v46, %v884_v53  ;;  %v701_v62 = vpop.f32.mrf.mxu0  ;;  %v5342_v44 = vadd.f32 %v812_v58, %v5318_v32  ;;  %v5357_v53 = vadd.f32 %v810_v50, %v5318_v32 }
 0x168   : > { %6413 = vst [vmem:[#allocation23_spill] sm:$0xff] %v5330_v56  ;;  %v814_v35 = vpop.f32.mrf.mxu1  ;;  %v5334_v63 = vpack.c.bf16 %v946_v57, %v942_v55  ;;  %6417 = vst [vmem:[#allocation27_spill] sm:$0xff] %v5339_v42  ;;  %v5360_v54 = vmul.f32 0.2, %v5339_v42 }
 0x169   : > { %6414 = vst [vmem:[#allocation24_spill] sm:$0xff] %v5332_v60  ;;  %v703_v1 = vpop.f32.mrf.mxu0  ;;  %v5336_v2 = vpack.c.bf16 %v948_v61, %v944_v59  ;;  %6418 = vst [vmem:[#allocation28_spill] sm:$0xff] %v5342_v44  ;;  %v5369_v47 = vmul.f32 0.2, %v5342_v44  ;;  %v5372_v59 = vadd.f32 %v701_v62, %v5320_v33  ;;  %v5375_v61 = vadd.f32 %v814_v35, %v5320_v33 }
 0x16a   : > { %6415 = vst [vmem:[#allocation25_spill] sm:$0xff] %v5334_v63  ;;  %v816_v3 = vpop.f32.mrf.mxu1  ;;  %v5345_v46 = vadd.f32 %v703_v1, %v5320_v33  ;;  %6421 = vst [vmem:[#allocation31_spill] sm:$0xff] %v5351_v49 }
 0x16b   : > { %6416 = vst [vmem:[#allocation26_spill] sm:$0xff] %v5336_v2  ;;  %v707_v4 = vpop.f32.mrf.mxu0  ;;  %v5348_v34 = vadd.f32 %v816_v3, %v5320_v33  ;;  %6423 = vst [vmem:[#allocation33_spill] sm:$0xff] %v5357_v53 }
 0x16c   : > { %v820_v5 = vpop.f32.mrf.mxu1  ;;  %6419 = vst [vmem:[#allocation29_spill] sm:$0xff] %v5345_v46  ;;  %6424 = vst [vmem:[#allocation34_spill] sm:$0xff] %v5360_v54  ;;  %v5383_v1 = vmul.f32 0.2, %v5345_v46 }
 0x16d   : > { %v709_v6 = vpop.f32.mrf.mxu0  ;;  %6420 = vst [vmem:[#allocation30_spill] sm:$0xff] %v5348_v34  ;;  %6427 = vst [vmem:[#allocation37_spill] sm:$0xff] %v5369_v47  ;;  %v5386_v3 = vmul.f32 0.2, %v5348_v34  ;;  %v5395_v33 = vadd.f32 %v820_v5, %v5314_v30 }
 0x16e   : > { %v822_v7 = vpop.f32.mrf.mxu1  ;;  %v5354_v51 = vadd.f32 %v709_v6, %v5314_v30  ;;  %6428 = vst [vmem:[#allocation38_spill] sm:$0xff] %v5372_v59  ;;  %6429 = vst [vmem:[#allocation39_spill] sm:$0xff] %v5375_v61  ;;  %v5389_v6 = vadd.f32 %v707_v4, %v5314_v30 }
 0x16f   : > { %v711_v8 = vpop.f32.mrf.mxu0  ;;  %v5363_v55 = vadd.f32 %v822_v7, %v5314_v30  ;;  %6431 = vst [vmem:[#allocation41_spill] sm:$0xff] %v5383_v1  ;;  %6432 = vst [vmem:[#allocation42_spill] sm:$0xff] %v5386_v3 }
 0x170   : > { %v824_v10 = vpop.f32.mrf.mxu1  ;;  %6422 = vst [vmem:[#allocation32_spill] sm:$0xff] %v5354_v51  ;;  %6433 = vst [vmem:[#allocation43_spill] sm:$0xff] %v5389_v6  ;;  %v5398_v35 = vmul.f32 0.2, %v5354_v51 }
 0x171   : > { %v713_v11 = vpop.f32.mrf.mxu0  ;;  %6425 = vst [vmem:[#allocation35_spill] sm:$0xff] %v5363_v55  ;;  %6435 = vst [vmem:[#allocation45_spill] sm:$0xff] %v5395_v33  ;;  %v5407_v4 = vmul.f32 0.2, %v5363_v55 }
 0x172   : > { %v826_v12 = vpop.f32.mrf.mxu1  ;;  %v5366_v57 = vadd.f32 %v713_v11, %v5316_v31  ;;  %6436 = vst [vmem:[#allocation46_spill] sm:$0xff] %v5398_v35  ;;  %v5401_v11 = vadd.f32 %v711_v8, %v5316_v31 }
 0x173   : > { %v717_v13 = vpop.f32.mrf.mxu0  ;;  %v5378_v32 = vadd.f32 %v826_v12, %v5316_v31  ;;  %6439 = vst [vmem:[#allocation49_spill] sm:$0xff] %v5407_v4 }
 0x174   : > { %v830_v15 = vpop.f32.mrf.mxu1  ;;  %6426 = vst [vmem:[#allocation36_spill] sm:$0xff] %v5366_v57  ;;  %6437 = vst [vmem:[#allocation47_spill] sm:$0xff] %v5401_v11  ;;  %v5413_v14 = vmul.f32 0.2, %v5366_v57 }
 0x175   : > { %v719_v16 = vpop.f32.mrf.mxu0  ;;  %6430 = vst [vmem:[#allocation40_spill] sm:$0xff] %v5378_v32  ;;  %v5419_v8 = vmul.f32 0.2, %v5378_v32  ;;  %v5425_v9 = vadd.f32 %v830_v15, %v5310_v28 }
 0x176   : > { %v832_v17 = vpop.f32.mrf.mxu1  ;;  %v5392_v62 = vadd.f32 %v719_v16, %v5310_v28  ;;  %v5410_v16 = vadd.f32 %v824_v10, %v5316_v31  ;;  %6441 = vst [vmem:[#allocation51_spill] sm:$0xff] %v5413_v14 }
 0x177   : > { %v721_v18 = vpop.f32.mrf.mxu0  ;;  %v5404_v12 = vadd.f32 %v832_v17, %v5310_v28  ;;  %6442 = vst [vmem:[#allocation52_spill] sm:$0xff] %v5419_v8  ;;  %v5422_v17 = vadd.f32 %v717_v13, %v5310_v28  ;;  %6444 = vst [vmem:[#allocation54_spill] sm:$0xff] %v5425_v9 }
 0x178   : > { %v834_v19 = vpop.f32.mrf.mxu1  ;;  %6434 = vst [vmem:[#allocation44_spill] sm:$0xff] %v5392_v62  ;;  %6440 = vst [vmem:[#allocation50_spill] sm:$0xff] %v5410_v16  ;;  %v5431_v10 = vmul.f32 0.2, %v5392_v62  ;;  %v5446_v15 = vadd.f32 %v721_v18, %v5312_v29 }
 0x179   : > { %v723_v20 = vpop.f32.mrf.mxu0  ;;  %6438 = vst [vmem:[#allocation48_spill] sm:$0xff] %v5404_v12  ;;  %6443 = vst [vmem:[#allocation53_spill] sm:$0xff] %v5422_v17  ;;  %v5443_v28 = vmul.f32 0.2, %v5404_v12 }
 0x17a   : > { %v836_v36 = vpop.f32.mrf.mxu1  ;;  %v5416_v30 = vadd.f32 %v723_v20, %v5312_v29  ;;  %6446 = vst [vmem:[#allocation56_spill] sm:$0xff] %v5431_v10 }
 0x17b   : > { %v727_v37 = vpop.f32.mrf.mxu0  ;;  %v5428_v39 = vadd.f32 %v836_v36, %v5312_v29  ;;  %6447 = vst [vmem:[#allocation57_spill] sm:$0xff] %v5443_v28 }
 0x17c   : > { %v840_v38 = vpop.f32.mrf.mxu1 }
 0x17d   : > { %v729_v40 = vpop.f32.mrf.mxu0  ;;  %6445 = vst [vmem:[#allocation55_spill] sm:$0xff] %v5428_v39  ;;  %v5473_v44 = vadd.f32 %v840_v38, %v5306_v26 }
 0x17e   : > { %v842_v41 = vpop.f32.mrf.mxu1  ;;  %v5434_v20 = vadd.f32 %v729_v40, %v5306_v26 }
 0x17f   : > { %v731_v43 = vpop.f32.mrf.mxu0  ;;  %v5437_v21 = vadd.f32 %v842_v41, %v5306_v26  ;;  %v5455_v41 = vadd.f32 %v834_v19, %v5312_v29 }
 0x180   : > { %v844_v45 = vpop.f32.mrf.mxu1  ;;  %v5440_v60 = vadd.f32 %v731_v43, %v5308_v27  ;;  %v5458_v43 = vmul.f32 0.2, %v5416_v30 }
 0x181   : > { %v733_v48 = vpop.f32.mrf.mxu0  ;;  %v5449_v36 = vadd.f32 %v844_v45, %v5308_v27  ;;  %v5467_v45 = vmul.f32 0.2, %v5428_v39 }
 0x182   : > { %v846_v52 = vpop.f32.mrf.mxu1  ;;  %v5452_v56 = vadd.f32 %v733_v48, %v5308_v27  ;;  %v5470_v48 = vadd.f32 %v727_v37, %v5306_v26 }
 0x183   : > { %v737_v58 = vpop.f32.mrf.mxu0  ;;  %6448 = vst [vmem:[#allocation58_spill] sm:$0xff] %v5449_v36  ;;  %v5461_v2 = vadd.f32 %v846_v52, %v5308_v27  ;;  %6449 = vst [vmem:[#allocation59_spill] sm:$0xff] %v5467_v45  ;;  %v5479_v27 = vmul.f32 0.2, %v5434_v20  ;;  %v5482_v52 = vmul.f32 0.2, %v5437_v21 }
 0x184   : > { %v5380_v50 = vpop.f32.mrf.mxu1  ;;  %v5464_v63 = vadd.f32 %v737_v58, %v5300_v23  ;;  %v5485_v58 = vmul.f32 0.2, %v5440_v60  ;;  %v5489_v42 = vmul.f32 0.2, %v5449_v36  ;;  %v5492_v26 = vmul.f32 0.2, %v5452_v56 }
 0x185   : > { %v739_v7 = vpop.f32.mrf.mxu0  ;;  %v5497_v53 = vmul.f32 0.2, %v5461_v2 }
 0x186   : > { %v852_v0 = vpop.f32.mrf.mxu1  ;;  %v5476_v29 = vadd.f32 %v739_v7, %v5300_v23  ;;  %6450 = vst [vmem:[#allocation60_spill] sm:$0xff] %v5489_v42  ;;  %v5500_v34 = vmul.f32 0.2, %v5464_v63 }
 0x187   : > { %v741_v5 = vpop.f32.mrf.mxu0  ;;  %v853_v1 = vadd.f32 %v852_v0, %v5300_v23 }
 0x188   : > { %v854_v31 = vpop.f32.mrf.mxu1  ;;  %v918_v46 = vmul.f32 0.2, %v5476_v29  ;;  %v742_v4 = vadd.f32 %v741_v5, %v5304_v25  ;;  %v851_v5 = vadd.f32 %v5380_v50, %v5300_v23 }
 0x189   : > { %v743_v13 = vpop.f32.mrf.mxu0  ;;  %v855_v61 = vadd.f32 %v854_v31, %v5304_v25 }
 0x18a   : > { %v856_v40 = vpop.f32.mrf.mxu1  ;;  %v744_v47 = vadd.f32 %v743_v13, %v5304_v25  ;;  %v921_v57 = vmul.f32 0.2, %v742_v4  ;;  %v919_v45 = vmul.f32 0.2, %v851_v5 }
 0x18b   : > { %v747_v18 = vpop.f32.mrf.mxu0  ;;  %v857_v38 = vadd.f32 %v856_v40, %v5304_v25 }
 0x18c   : > { %v860_v19 = vpop.f32.mrf.mxu1  ;;  %v748_v13 = vadd.f32 %v747_v18, %v5298_v22  ;;  %v922_v51 = vmul.f32 0.2, %v744_v47  ;;  %v985_v17 = vmax.f32 %v742_v4, %v921_v57  ;;  %v6454_v4 = vld [vmem:[#allocation59_spill] sm:$0xff] }
 0x18d   : > { %v749_v37 = vpop.f32.mrf.mxu0  ;;  %v861_v40 = vadd.f32 %v860_v19, %v5298_v22  ;;  %v924_v33 = vmul.f32 0.2, %v857_v38  ;;  %v920_v19 = vmul.f32 0.2, %v853_v1 }
 0x18e   : > { %v750_v7 = vadd.f32 %v749_v37, %v5298_v22  ;;  %v862_v54 = vpop.f32.mrf.mxu1  ;;  %v925_v0 = vmul.f32 0.2, %v748_v13  ;;  %v986_v28 = vmax.f32 %v744_v47, %v922_v51 }
 0x18f   : > { %v863_v3 = vadd.f32 %v862_v54, %v5298_v22  ;;  %v751_v49 = vpop.f32.mrf.mxu0  ;;  %v927_v25 = vmul.f32 0.2, %v861_v40  ;;  %v988_v10 = vmax.f32 %v857_v38, %v924_v33  ;;  %v984_v50 = vmax.f32 %v853_v1, %v920_v19  ;;  %v6452_v1 = vld [vmem:[#allocation58_spill] sm:$0xff]  ;;  %v6467_v19 = vld [vmem:[#allocation40_spill] sm:$0xff] }
 0x190   : > { %v752_v37 = vadd.f32 %v751_v49, %v5302_v24  ;;  %v864_v55 = vpop.f32.mrf.mxu1  ;;  %v926_v54 = vmul.f32 0.2, %v750_v7  ;;  %v989_v9 = vmax.f32 %v748_v13, %v925_v0  ;;  %v909_v33 = vmul.f32 0.2, %v5470_v48  ;;  %v6463_v13 = vld [vmem:[#allocation51_spill] sm:$0xff] }
 0x191   : > { %v865_v35 = vadd.f32 %v864_v55, %v5302_v24  ;;  %v753_v18 = vpop.f32.mrf.mxu0  ;;  %v928_v6 = vmul.f32 0.2, %v863_v3  ;;  %v923_v55 = vmul.f32 0.2, %v855_v61  ;;  %v1032_v57 = vpack.c.bf16 %v988_v10, %v984_v50  ;;  %v6471_v50 = vld [vmem:[#allocation32_spill] sm:$0xff] }
 0x192   : > { %v929_v59 = vmul.f32 0.2, %v752_v37  ;;  %v754_v32 = vadd.f32 %v753_v18, %v5302_v24  ;;  %v866_v8 = vpop.f32.mrf.mxu1  ;;  %v990_v16 = vmax.f32 %v750_v7, %v926_v54 }
 0x193   : > { %v931_v22 = vmul.f32 0.2, %v865_v35  ;;  %v867_v49 = vadd.f32 %v866_v8, %v5302_v24  ;;  %v992_v11 = vmax.f32 %v863_v3, %v928_v6  ;;  %v982_v24 = vmax.f32 %v5476_v29, %v918_v46 }
 0x194   : > { %v930_v31 = vmul.f32 0.2, %v754_v32  ;;  %v993_v14 = vmax.f32 %v752_v37, %v929_v59  ;;  %v991_v8 = vmax.f32 %v861_v40, %v927_v25  ;;  %v978_v59 = vmax.f32 %v5452_v56, %v5492_v26  ;;  %v6462_v26 = vld [vmem:[#allocation48_spill] sm:$0xff] }
 0x195   : > { %v932_v12 = vmul.f32 0.2, %v867_v49  ;;  %v995_v62 = vmax.f32 %v865_v35, %v931_v22  ;;  %v987_v51 = vmax.f32 %v855_v61, %v923_v55  ;;  %v980_v3 = vmax.f32 %v5461_v2, %v5497_v53  ;;  %v6451_v53 = vld [vmem:[#allocation60_spill] sm:$0xff] }
 0x196   : > { %v994_v18 = vmax.f32 %v754_v32, %v930_v31  ;;  %v1033_v36 = vpack.c.bf16 %v993_v14, %v989_v9  ;;  %v1030_v32 = vpack.c.bf16 %v986_v28, %v982_v24  ;;  %v981_v46 = vmax.f32 %v5464_v63, %v5500_v34  ;;  %v6457_v28 = vld [vmem:[#allocation54_spill] sm:$0xff]  ;;  %v6464_v40 = vld [vmem:[#allocation36_spill] sm:$0xff]  ;;  %v6469_v24 = vld [vmem:[#allocation45_spill] sm:$0xff] }
 0x197   : > { %v996_v39 = vmax.f32 %v867_v49, %v932_v12  ;;  %v1035_v47 = vpack.c.bf16 %v995_v62, %v991_v8  ;;  %v905_v9 = vmul.f32 0.2, %v5446_v15  ;;  %v911_v14 = vmul.f32 0.2, %v5473_v44  ;;  %v6465_v49 = vld [vmem:[#allocation43_spill] sm:$0xff] }
 0x198   : > { %v1034_v23 = vpack.c.bf16 %v994_v18, %v990_v16  ;;  %v983_v56 = vmax.f32 %v851_v5, %v919_v45  ;;  %v907_v61 = vmul.f32 0.2, %v5455_v41  ;;  %v976_v2 = vmax.f32 %v5437_v21, %v5482_v52  ;;  %v6455_v16 = vld [vmem:[#allocation55_spill] sm:$0xff]  ;;  %v6458_v45 = vld [vmem:[#allocation56_spill] sm:$0xff]  ;;  %v6468_v18 = vld [vmem:[#allocation38_spill] sm:$0xff] }
 0x199   : > { %v1036_v42 = vpack.c.bf16 %v996_v39, %v992_v11  ;;  %v974_v39 = vmax.f32 %v5434_v20, %v5479_v27  ;;  %v977_v63 = vmax.f32 %v5440_v60, %v5485_v58  ;;  %v970_v34 = vmax.f32 %v5416_v30, %v5458_v43  ;;  %v6453_v11 = vld [vmem:[#allocation53_spill] sm:$0xff]  ;;  %v6456_v60 = vld [vmem:[#allocation47_spill] sm:$0xff]  ;;  %v6459_v30 = vld [vmem:[#allocation44_spill] sm:$0xff] }
 0x19a   : > { %1109 = vmatprep.subr.bf16.mxu0 %v1034_v23  ;;  %v979_v6 = vmax.f32 %v6452_v1, %v6451_v53  ;;  %v1031_v62 = vpack.c.bf16 %v987_v51, %v983_v56  ;;  %v901_v12 = vmul.f32 0.2, %v6453_v11  ;;  %v972_v10 = vmax.f32 %v6455_v16, %v6454_v4  ;;  %v6460_v27 = vld [vmem:[#allocation50_spill] sm:$0xff]  ;;  %v6461_v58 = vld [vmem:[#allocation57_spill] sm:$0xff]  ;;  %v6466_v5 = vld [vmem:[#allocation52_spill] sm:$0xff] }
 0x19b   : > { %1182 = vmatprep.subr.bf16.mxu1 %v1036_v42  ;;  %1110 = vmatpush1.bf16.msra.mxu0 %v1033_v36  ;;  %v1029_v42 = vpack.c.bf16 %v985_v17, %v981_v46  ;;  %v1026_v35 = vpack.c.bf16 %v978_v59, %v974_v39  ;;  %v973_v21 = vmax.f32 %v5470_v48, %v909_v33  ;;  %v897_v17 = vmul.f32 0.2, %v6456_v60  ;;  %v6470_v23 = vld [vmem:[#allocation46_spill] sm:$0xff]  ;;  %v6472_v51 = vld [vmem:[#allocation39_spill] sm:$0xff] }
 0x19c   : > { %1183 = vmatpush1.bf16.msra.mxu1 %v1035_v47  ;;  %1111 = vmatprep.subr.bf16.mxu0 %v1030_v32  ;;  %v1028_v20 = vpack.c.bf16 %v980_v3, %v976_v2  ;;  %v903_v36 = vmul.f32 0.2, %v6457_v28  ;;  %v966_v43 = vmax.f32 %v6459_v30, %v6458_v45  ;;  %v975_v29 = vmax.f32 %v5473_v44, %v911_v14  ;;  %v6473_v32 = vld [vmem:[#allocation49_spill] sm:$0xff]  ;;  %v6474_v33 = vld [vmem:[#allocation35_spill] sm:$0xff]  ;;  %v6479_v53 = vld [vmem:[#allocation30_spill] sm:$0xff] }
 0x19d   : > { %1184 = vmatprep.subr.bf16.mxu1 %v1032_v57  ;;  %v899_v52 = vmul.f32 0.2, %v6460_v27  ;;  %v968_v38 = vmax.f32 %v6462_v26, %v6461_v58  ;;  %v969_v48 = vmax.f32 %v5446_v15, %v905_v9  ;;  %v1025_v7 = vpack.c.bf16 %v977_v63, %v973_v21  ;;  %v6475_v9 = vld [vmem:[#allocation41_spill] sm:$0xff]  ;;  %v6477_v63 = vld [vmem:[#allocation31_spill] sm:$0xff] }
 0x19e   : > { %v962_v37 = vmax.f32 %v6464_v40, %v6463_v13  ;;  %v971_v54 = vmax.f32 %v5455_v41, %v907_v61  ;;  %v1027_v0 = vpack.c.bf16 %v979_v6, %v975_v29  ;;  %v1022_v22 = vpack.c.bf16 %v970_v34, %v966_v43  ;;  %v6476_v14 = vld [vmem:[#allocation29_spill] sm:$0xff]  ;;  %v6478_v34 = vld [vmem:[#allocation42_spill] sm:$0xff]  ;;  %v6482_v4 = vld [vmem:[#allocation27_spill] sm:$0xff] }
 0x19f   : > { %1112 = vmatpush1.bf16.msra.mxu0 %v1029_v42  ;;  %v893_v44 = vmul.f32 0.2, %v6465_v49  ;;  %v964_v25 = vmax.f32 %v6467_v19, %v6466_v5  ;;  %v965_v31 = vmax.f32 %v6453_v11, %v901_v12  ;;  %v1024_v55 = vpack.c.bf16 %v972_v10, %v968_v38  ;;  %v6481_v12 = vld [vmem:[#allocation34_spill] sm:$0xff]  ;;  %v6483_v21 = vld [vmem:[#allocation37_spill] sm:$0xff]  ;;  %v5598_v19 = vpop.permute.xlu0 %1077 }
 0x1a0   : > { %1185 = vmatpush1.bf16.msra.mxu1 %v1031_v62  ;;  %1113 = vmatprep.subr.bf16.mxu0 %v1026_v35  ;;  %v889_v15 = vmul.f32 0.2, %v6468_v18  ;;  %v895_v8 = vmul.f32 0.2, %v6469_v24  ;;  %v958_v59 = vmax.f32 %v6471_v50, %v6470_v23  ;;  %v967_v41 = vmax.f32 %v6457_v28, %v903_v36  ;;  %v6480_v35 = vld [vmem:[#allocation33_spill] sm:$0xff]  ;;  %v6486_v38 = vld [vmem:[#allocation26_spill] sm:$0xff] }
 0x1a1   : > { %1186 = vmatprep.subr.bf16.mxu1 %v1028_v20  ;;  %v891_v47 = vmul.f32 0.2, %v6472_v51  ;;  %v960_v3 = vmax.f32 %v6474_v33, %v6473_v32  ;;  %v961_v46 = vmax.f32 %v6456_v60, %v897_v17  ;;  %v1021_v57 = vpack.c.bf16 %v969_v48, %v965_v31  ;;  %v6484_v20 = vld [vmem:[#allocation28_spill] sm:$0xff]  ;;  %v6485_v26 = vld [vmem:[#allocation25_spill] sm:$0xff]  ;;  %v6487_v48 = vld [vmem:[#allocation23_spill] sm:$0xff]  ;;  %v5600_v31 = vpop.permute.xlu1 %1082 }
 0x1a2   : > { %v954_v39 = vmax.f32 %v6476_v14, %v6475_v9  ;;  %v963_v56 = vmax.f32 %v6460_v27, %v899_v52  ;;  %v1023_v61 = vpack.c.bf16 %v971_v54, %v967_v41  ;;  %v1018_v2 = vpack.c.bf16 %v962_v37, %v958_v59  ;;  %v6489_v13 = vld [vmem:[#allocation21_spill] sm:$0xff]  ;;  %v6490_v40 = vld [vmem:[#allocation22_spill] sm:$0xff]  ;;  %v6491_v54 = vld [vmem:[#allocation19_spill] sm:$0xff] }
 0x1a3   : > { %1114 = vmatpush1.bf16.msra.mxu0 %v1025_v7  ;;  %v885_v42 = vmul.f32 0.2, %v6477_v63  ;;  %v956_v1 = vmax.f32 %v6479_v53, %v6478_v34  ;;  %v957_v6 = vmax.f32 %v6465_v49, %v893_v44  ;;  %v1020_v62 = vpack.c.bf16 %v964_v25, %v960_v3  ;;  %v6488_v7 = vld [vmem:[#allocation24_spill] sm:$0xff]  ;;  %v4618_v37 = vld [vmem:[#allocation3] sm:$0xff]   ;;  %v4619_v49 = vld [vmem:[#allocation3 + $0x8] sm:$0xff]  }
 0x1a4   : > { %1187 = vmatpush1.bf16.msra.mxu1 %v1027_v0  ;;  %1115 = vmatprep.subr.bf16.mxu0 %v1022_v22  ;;  %v887_v11 = vmul.f32 0.2, %v6480_v35  ;;  %v950_v16 = vmax.f32 %v6482_v4, %v6481_v12  ;;  %v959_v10 = vmax.f32 %v6469_v24, %v895_v8  ;;  %v952_v60 = vmax.f32 %v6484_v20, %v6483_v21  ;;  %v6492_v0 = vld [vmem:[#allocation20_spill] sm:$0xff]  ;;  %v4621_v5 = vld [vmem:[#allocation3 + $0x18] sm:$0xff]   ;;  %v5602_v8 = vpop.permute.xlu0 %1067 }
 0x1a5   : > { %1188 = vmatprep.subr.bf16.mxu1 %v1024_v55  ;;  %v953_v17 = vmax.f32 %v6468_v18, %v889_v15  ;;  %v1017_v28 = vpack.c.bf16 %v961_v46, %v957_v6  ;;  %v955_v36 = vmax.f32 %v6472_v51, %v891_v47  ;;  %v949_v43 = vmax.f32 %v6477_v63, %v885_v42  ;;  %v4620_v44 = vld [vmem:[#allocation3 + $0x10] sm:$0xff]   ;;  %v5604_v59 = vpop.permute.xlu1 %1072 }
 0x1a6   : > { %v1019_v45 = vpack.c.bf16 %v963_v56, %v959_v10  ;;  %v1014_v30 = vpack.c.bf16 %v954_v39, %v950_v16  ;;  %v1016_v29 = vpack.c.bf16 %v956_v1, %v952_v60  ;;  %v951_v27 = vmax.f32 %v6480_v35, %v887_v11 }
 0x1a7   : > { %1116 = vmatpush1.bf16.msra.mxu0 %v1021_v57  ;;  %v1013_v52 = vpack.c.bf16 %v953_v17, %v949_v43  ;;  %v6493_v22 = vmov 0  }
 0x1a8   : > { %1189 = vmatpush1.bf16.msra.mxu1 %v1023_v61  ;;  %1117 = vmatprep.subr.bf16.mxu0 %v1018_v2  ;;  %v1015_v58 = vpack.c.bf16 %v955_v36, %v951_v27  ;;  %v1058_v33 = vpop.permute.xlu0 %1057 }
 0x1a9   : > { %1190 = vmatprep.subr.bf16.mxu1 %v1020_v62  ;;  %v1063_v57 = vpop.permute.xlu1 %1062 }
 0x1ab   : > { %1118 = vmatpush1.bf16.msra.mxu0 %v1017_v28 }
 0x1ac   : > { %1191 = vmatpush1.bf16.msra.mxu1 %v1019_v45  ;;  %1119 = vmatprep.subr.bf16.mxu0 %v1014_v30  ;;  %v1048_v61 = vpop.permute.xlu0 %1047 }
 0x1ad   : > { %1192 = vmatprep.subr.bf16.mxu1 %v1016_v29  ;;  %v1053_v34 = vpop.permute.xlu1 %1052 }
 0x1af   : > { %1120 = vmatpush1.bf16.msra.mxu0 %v1013_v52 }
 0x1b0   : > { %1193 = vmatpush1.bf16.msra.mxu1 %v1015_v58  ;;  %1121 = vmatprep.subr.bf16.mxu0 %v6485_v26 }
 0x1b1   : > { %1194 = vmatprep.subr.bf16.mxu1 %v6486_v38 }
 0x1b3   : > { %1122 = vmatpush1.bf16.msra.mxu0 %v6487_v48 }
 0x1b4   : > { %1195 = vmatpush1.bf16.msra.mxu1 %v6488_v7  ;;  %1123 = vmatprep.subr.bf16.mxu0 %v6489_v13 }
 0x1b5   : > { %1196 = vmatprep.subr.bf16.mxu1 %v6490_v40 }
 0x1b7   : > { %1124 = vmatpush1.bf16.msra.mxu0 %v6491_v54 }
 0x1b8   : > { %1197 = vmatpush1.bf16.msra.mxu1 %v6492_v0 }
 0x1ba   : > { %1142 = vmatmul.mubr.bf16.vlgmr.msra.gmra.mxu0 %v4618_v37 }
 0x1bb   : > { %1215 = vmatmul.mubr.bf16.vlgmr.msra.gmra.mxu1 %v4618_v37  ;;  %1151 = vmatprep.mubr.bf16.mxu0 %v6493_v22 }
 0x1bc   : > { %1224 = vmatprep.mubr.bf16.mxu1 %v6493_v22 }
 0x1c2   : > { %1152 = vmatmul.mubr.bf16.gmra.mxu0 %v4619_v49 }
 0x1c3   : > { %1225 = vmatmul.mubr.bf16.gmra.mxu1 %v4619_v49  ;;  %1161 = vmatprep.mubr.bf16.mxu0 %v6493_v22 }
 0x1c4   : > { %1234 = vmatprep.mubr.bf16.mxu1 %v6493_v22 }
 0x1ca   : > { %1162 = vmatmul.mubr.bf16.gmra.mxu0 %v4620_v44 }
 0x1cb   : > { %1235 = vmatmul.mubr.bf16.gmra.mxu1 %v4620_v44  ;;  %1171 = vmatprep.mubr.bf16.mxu0 %v6493_v22 }
 0x1cc   : > { %1244 = vmatprep.mubr.bf16.mxu1 %v6493_v22 }
 0x1d2   : > { %1172 = vmatmul.mubr.bf16.gmra.mxu0 %v4621_v5 }
 0x1d3   : > { %1245 = vmatmul.mubr.bf16.gmra.mxu1 %v4621_v5  ;;  %1411 = vmatprep.mubr.bf16.mxu0 %v6493_v22 }
 0x1d4   : > { %1464 = vmatprep.mubr.bf16.mxu1 %v6493_v22 }
 0x27a   : > { %v1143_v25 = vpop.f32.mrf.mxu0 }
 0x27b   : > { %v1216_v55 = vpop.f32.mrf.mxu1  ;;  %v5614_v35 = vadd.f32 %v1143_v25, %v1048_v61 }
 0x27c   : > { %v1145_v18 = vpop.f32.mrf.mxu0  ;;  %v5616_v11 = vadd.f32 %v1216_v55, %v1048_v61 }
 0x27d   : > { %v1218_v15 = vpop.f32.mrf.mxu1  ;;  %v5608_v63 = vadd.f32 %v1145_v18, %v1048_v61  ;;  %6496 = vst [vmem:[#allocation53_spill] sm:$0xff] %v5614_v35 }
 0x27e   : > { %v1147_v24 = vpop.f32.mrf.mxu0  ;;  %v5610_v53 = vadd.f32 %v1218_v15, %v1048_v61  ;;  %6497 = vst [vmem:[#allocation59_spill] sm:$0xff] %v5616_v11 }
 0x27f   : > { %v1220_v23 = vpop.f32.mrf.mxu1  ;;  %6494 = vst [vmem:[#allocation60_spill] sm:$0xff] %v5608_v63  ;;  %v5621_v16 = vmul.f32 0.2, %v5608_v63  ;;  %v5632_v28 = vadd.f32 %v1147_v24, %v1053_v34 }
 0x280   : > { %v1149_v50 = vpop.f32.mrf.mxu0  ;;  %6495 = vst [vmem:[#allocation58_spill] sm:$0xff] %v5610_v53  ;;  %v5630_v17 = vmul.f32 0.2, %v5610_v53  ;;  %v5638_v43 = vadd.f32 %v1220_v23, %v1053_v34 }
 0x281   : > { %v1222_v41 = vpop.f32.mrf.mxu1  ;;  %v5612_v6 = vadd.f32 %v1149_v50, %v1053_v34  ;;  %6499 = vst [vmem:[#allocation47_spill] sm:$0xff] %v5621_v16 }
 0x282   : > { %v1153_v51 = vpop.f32.mrf.mxu0  ;;  %v5618_v12 = vadd.f32 %v1222_v41, %v1053_v34  ;;  %6500 = vst [vmem:[#allocation54_spill] sm:$0xff] %v5630_v17 }
 0x283   : > { %v1226_v47 = vpop.f32.mrf.mxu1  ;;  %v5641_v29 = vmul.f32 0.2, %v5612_v6  ;;  %v5651_v38 = vadd.f32 %v1153_v51, %v1058_v33 }
 0x284   : > { %v1155_v32 = vpop.f32.mrf.mxu0  ;;  %6498 = vst [vmem:[#allocation55_spill] sm:$0xff] %v5618_v12  ;;  %v5649_v26 = vmul.f32 0.2, %v5618_v12  ;;  %v5653_v48 = vadd.f32 %v1226_v47, %v1058_v33 }
 0x285   : > { %v1228_v3 = vpop.f32.mrf.mxu1  ;;  %v5623_v10 = vadd.f32 %v1155_v32, %v1058_v33 }
 0x286   : > { %v1157_v46 = vpop.f32.mrf.mxu0  ;;  %v5625_v21 = vadd.f32 %v1228_v3, %v1058_v33  ;;  %6502 = vst [vmem:[#allocation44_spill] sm:$0xff] %v5649_v26 }
 0x287   : > { %v1230_v9 = vpop.f32.mrf.mxu1  ;;  %v5627_v20 = vadd.f32 %v1157_v46, %v1063_v57  ;;  %v5659_v40 = vmul.f32 0.2, %v5623_v10 }
 0x288   : > { %v1159_v14 = vpop.f32.mrf.mxu0  ;;  %v5634_v36 = vadd.f32 %v1230_v9, %v1063_v57  ;;  %v5662_v37 = vmul.f32 0.2, %v5625_v21 }
 0x289   : > { %v1232_v39 = vpop.f32.mrf.mxu1  ;;  %v5636_v45 = vadd.f32 %v1159_v14, %v1063_v57  ;;  %v5665_v54 = vmul.f32 0.2, %v5627_v20 }
 0x28a   : > { %v1163_v56 = vpop.f32.mrf.mxu0  ;;  %6501 = vst [vmem:[#allocation56_spill] sm:$0xff] %v5634_v36  ;;  %v5643_v27 = vadd.f32 %v1232_v39, %v1063_v57  ;;  %v5669_v44 = vmul.f32 0.2, %v5634_v36 }
 0x28b   : > { %v5606_v2 = vpop.f32.mrf.mxu1  ;;  %v5646_v52 = vadd.f32 %v1163_v56, %v5602_v8  ;;  %v5672_v5 = vmul.f32 0.2, %v5636_v45 }
 0x28c   : > { %v1165_v42 = vpop.f32.mrf.mxu0  ;;  %6503 = vst [vmem:[#allocation50_spill] sm:$0xff] %v5669_v44  ;;  %v5677_v15 = vmul.f32 0.2, %v5643_v27 }
 0x28d   : > { %v1238_v1 = vpop.f32.mrf.mxu1  ;;  %v5656_v7 = vadd.f32 %v1165_v42, %v5602_v8  ;;  %v5680_v24 = vmul.f32 0.2, %v5646_v52 }
 0x28e   : > { %v1167_v62 = vpop.f32.mrf.mxu0  ;;  %v1239_v47 = vadd.f32 %v1238_v1, %v5602_v8 }
 0x28f   : > { %v1240_v4 = vpop.f32.mrf.mxu1  ;;  %v1272_v51 = vmul.f32 0.2, %v5656_v7  ;;  %v1168_v46 = vadd.f32 %v1167_v62, %v5604_v59  ;;  %v1237_v62 = vadd.f32 %v5606_v2, %v5602_v8 }
 0x290   : > { %v1169_v60 = vpop.f32.mrf.mxu0  ;;  %v1241_v57 = vadd.f32 %v1240_v4, %v5604_v59 }
 0x291   : > { %v1242_v30 = vpop.f32.mrf.mxu1  ;;  %v1170_v0 = vadd.f32 %v1169_v60, %v5604_v59  ;;  %v1273_v26 = vmul.f32 0.2, %v1237_v62 }
 0x292   : > { %v1173_v58 = vpop.f32.mrf.mxu0  ;;  %v1243_v25 = vadd.f32 %v1242_v30, %v5604_v59 }
 0x293   : > { %v1246_v13 = vpop.f32.mrf.mxu1  ;;  %v1174_v23 = vadd.f32 %v1173_v58, %v5598_v19  ;;  %v1276_v9 = vmul.f32 0.2, %v1170_v0 }
 0x294   : > { %v1175_v49 = vpop.f32.mrf.mxu0  ;;  %v1247_v32 = vadd.f32 %v1246_v13, %v5598_v19  ;;  %v1278_v56 = vmul.f32 0.2, %v1243_v25  ;;  %v1274_v13 = vmul.f32 0.2, %v1239_v47 }
 0x295   : > { %v1176_v55 = vadd.f32 %v1175_v49, %v5598_v19  ;;  %v1248_v18 = vpop.f32.mrf.mxu1  ;;  %v1279_v1 = vmul.f32 0.2, %v1174_v23  ;;  %v1275_v49 = vmul.f32 0.2, %v1168_v46  ;;  %v1308_v22 = vmax.f32 %v1170_v0, %v1276_v9 }
 0x296   : > { %v1249_v50 = vadd.f32 %v1248_v18, %v5598_v19  ;;  %v1177_v41 = vpop.f32.mrf.mxu0  ;;  %v1281_v59 = vmul.f32 0.2, %v1247_v32  ;;  %v1277_v18 = vmul.f32 0.2, %v1241_v57  ;;  %v1310_v63 = vmax.f32 %v1243_v25, %v1278_v56 }
 0x297   : > { %v1178_v33 = vadd.f32 %v1177_v41, %v5600_v31  ;;  %v1250_v3 = vpop.f32.mrf.mxu1  ;;  %v1280_v61 = vmul.f32 0.2, %v1176_v55  ;;  %v1311_v16 = vmax.f32 %v1174_v23, %v1279_v1  ;;  %v1306_v2 = vmax.f32 %v1239_v47, %v1274_v13  ;;  %v6511_v47 = vld [vmem:[#allocation60_spill] sm:$0xff] }
 0x298   : > { %v1251_v14 = vadd.f32 %v1250_v3, %v5600_v31  ;;  %v1179_v39 = vpop.f32.mrf.mxu0  ;;  %v1282_v30 = vmul.f32 0.2, %v1249_v50  ;;  %v1307_v35 = vmax.f32 %v1168_v46, %v1275_v49  ;;  %v1309_v0 = vmax.f32 %v1241_v57, %v1277_v18  ;;  %v6513_v46 = vld [vmem:[#allocation58_spill] sm:$0xff] }
 0x299   : > { %v1283_v42 = vmul.f32 0.2, %v1178_v33  ;;  %v1180_v34 = vadd.f32 %v1179_v39, %v5600_v31  ;;  %v1252_v60 = vpop.f32.mrf.mxu1  ;;  %v1312_v53 = vmax.f32 %v1176_v55, %v1280_v61  ;;  %v1263_v25 = vmul.f32 0.2, %v5651_v38 }
 0x29a   : > { %v1285_v19 = vmul.f32 0.2, %v1251_v14  ;;  %v1253_v58 = vadd.f32 %v1252_v60, %v5600_v31  ;;  %v1314_v11 = vmax.f32 %v1249_v50, %v1282_v30  ;;  %v1304_v31 = vmax.f32 %v5656_v7, %v1272_v51  ;;  %v6508_v50 = vld [vmem:[#allocation55_spill] sm:$0xff] }
 0x29b   : > { %v1284_v4 = vmul.f32 0.2, %v1180_v34  ;;  %v1315_v41 = vmax.f32 %v1178_v33, %v1283_v42  ;;  %v1313_v60 = vmax.f32 %v1247_v32, %v1281_v59  ;;  %v1300_v33 = vmax.f32 %v5636_v45, %v5672_v5 }
 0x29c   : > { %v1286_v3 = vmul.f32 0.2, %v1253_v58  ;;  %v1317_v17 = vmax.f32 %v1251_v14, %v1285_v19  ;;  %v1332_v9 = vpack.c.bf16 %v1308_v22, %v1304_v31  ;;  %v1302_v23 = vmax.f32 %v5643_v27, %v5677_v15 }
 0x29d   : > { %v1316_v39 = vmax.f32 %v1180_v34, %v1284_v4  ;;  %v1335_v36 = vpack.c.bf16 %v1315_v41, %v1311_v16  ;;  %v1303_v7 = vmax.f32 %v5646_v52, %v5680_v24  ;;  %v1296_v16 = vmax.f32 %v5623_v10, %v5659_v40  ;;  %v6504_v52 = vld [vmem:[#allocation50_spill] sm:$0xff]  ;;  %v6506_v40 = vld [vmem:[#allocation53_spill] sm:$0xff]  ;;  %v6507_v24 = vld [vmem:[#allocation44_spill] sm:$0xff] }
 0x29e   : > { %v1318_v12 = vmax.f32 %v1253_v58, %v1286_v3  ;;  %v1337_v55 = vpack.c.bf16 %v1317_v17, %v1313_v60  ;;  %v1305_v17 = vmax.f32 %v1237_v62, %v1273_v26  ;;  %v1261_v22 = vmul.f32 0.2, %v5638_v43  ;;  %v4622_v58 = vld [vmem:[#allocation6] sm:$0xff]   ;;  %v1356_v62 = vpop.permute.xlu1 %1355 }
 0x29f   : > { %v1336_v8 = vpack.c.bf16 %v1316_v39, %v1312_v53  ;;  %v1334_v53 = vpack.c.bf16 %v1310_v63, %v1306_v2  ;;  %v1298_v45 = vmax.f32 %v5625_v21, %v5662_v37  ;;  %v1299_v27 = vmax.f32 %v5627_v20, %v5665_v54  ;;  %v6509_v20 = vld [vmem:[#allocation59_spill] sm:$0xff] }
 0x2a0   : > { %v1338_v44 = vpack.c.bf16 %v1318_v12, %v1314_v11  ;;  %v1259_v11 = vmul.f32 0.2, %v5632_v28  ;;  %v1265_v12 = vmul.f32 0.2, %v5653_v48  ;;  %v1292_v63 = vmax.f32 %v5612_v6, %v5641_v29  ;;  %v6510_v54 = vld [vmem:[#allocation47_spill] sm:$0xff]  ;;  %v6512_v29 = vld [vmem:[#allocation54_spill] sm:$0xff] }
 0x2a1   : > { %1387 = vmatprep.subr.bf16.mxu0 %v1336_v8  ;;  %v1333_v10 = vpack.c.bf16 %v1309_v0, %v1305_v17  ;;  %v1328_v26 = vpack.c.bf16 %v1300_v33, %v1296_v16  ;;  %v1255_v15 = vmul.f32 0.2, %v6506_v40  ;;  %v1294_v51 = vmax.f32 %v6508_v50, %v6507_v24  ;;  %v2205_v24 = vld [vmem:[%s5052_s28 + $0x1e0] sm:$0xff] }
 0x2a2   : > { %1440 = vmatprep.subr.bf16.mxu1 %v1338_v44  ;;  %1388 = vmatpush1.bf16.msra.mxu0 %v1335_v36  ;;  %v1331_v36 = vpack.c.bf16 %v1307_v35, %v1303_v7  ;;  %v6505_v44 = vld [vmem:[#allocation56_spill] sm:$0xff]  ;;  %v1295_v21 = vmax.f32 %v5651_v38, %v1263_v25  ;;  %v1330_v37 = vpack.c.bf16 %v1302_v23, %v1298_v45  ;;  %v1257_v35 = vmul.f32 0.2, %v6509_v20  ;;  %v1346_v4 = vpop.permute.xlu1 %1345  ;;  %v1361_v23 = vpop.permute.xlu0 %1360 }
 0x2a3   : > { %1441 = vmatpush1.bf16.msra.mxu1 %v1337_v55  ;;  %1389 = vmatprep.subr.bf16.mxu0 %v1332_v9  ;;  %v1301_v5 = vmax.f32 %v6505_v44, %v6504_v52  ;;  %v1288_v32 = vmax.f32 %v6511_v47, %v6510_v54  ;;  %v1297_v6 = vmax.f32 %v5653_v48, %v1265_v12  ;;  %v2193_v54 = vld [vmem:[%s5052_s28 + $0x180] sm:$0xff] }
 0x2a4   : > { %1442 = vmatprep.subr.bf16.mxu1 %v1334_v53  ;;  %v1290_v57 = vmax.f32 %v6513_v46, %v6512_v29  ;;  %v1291_v14 = vmax.f32 %v5632_v28, %v1259_v11  ;;  %v1327_v56 = vpack.c.bf16 %v1299_v27, %v1295_v21  ;;  %v1293_v38 = vmax.f32 %v5638_v43, %v1261_v22  ;;  %v4623_v43 = vld [vmem:[#allocation6 + $0x8] sm:$0xff]   ;;  %v2202_v21 = vld [vmem:[%s5052_s28 + $0x1c8] sm:$0xff]  ;;  %v2197_v47 = vld [vmem:[%s5052_s28 + $0x1a0] sm:$0xff] }
 0x2a5   : > { %v1329_v61 = vpack.c.bf16 %v1301_v5, %v1297_v6  ;;  %v1324_v42 = vpack.c.bf16 %v1292_v63, %v1288_v32  ;;  %v1287_v34 = vmax.f32 %v6506_v40, %v1255_v15  ;;  %v1289_v30 = vmax.f32 %v6509_v20, %v1257_v35  ;;  %v2201_v15 = vld [vmem:[%s5052_s28 + $0x1c0] sm:$0xff]  ;;  %v2194_v29 = vld [vmem:[%s5052_s28 + $0x188] sm:$0xff] }
 0x2a6   : > { %1390 = vmatpush1.bf16.msra.mxu0 %v1331_v36  ;;  %v1326_v1 = vpack.c.bf16 %v1294_v51, %v1290_v57  ;;  %v6514_v28 = vmov 0   ;;  %v1351_v27 = vpop.permute.xlu0 %1350  ;;  %v4318_v50 = vcombine.low %v2201_v15, %v2205_v24  ;;  %v4319_v51 = vcombine.high %v2201_v15, %v2205_v24  ;;  %v2198_v46 = vld [vmem:[%s5052_s28 + $0x1a8] sm:$0xff] }
 0x2a7   : > { %1443 = vmatpush1.bf16.msra.mxu1 %v1333_v10  ;;  %1391 = vmatprep.subr.bf16.mxu0 %v1328_v26  ;;  %v1323_v48 = vpack.c.bf16 %v1291_v14, %v1287_v34  ;;  %v1325_v19 = vpack.c.bf16 %v1293_v38, %v1289_v30  ;;  %v4310_v32 = vcombine.low %v2193_v54, %v2197_v47  ;;  %v2189_v38 = vld [vmem:[%s5052_s28 + $0x160] sm:$0xff]  ;;  %v2186_v34 = vld [vmem:[%s5052_s28 + $0x148] sm:$0xff] }
 0x2a8   : > { %1444 = vmatprep.subr.bf16.mxu1 %v1330_v37  ;;  %v2206_v37 = vld [vmem:[%s5052_s28 + $0x1e8] sm:$0xff]  ;;  %v4311_v6 = vcombine.high %v2193_v54, %v2197_v47  ;;  %v4312_v57 = vcombine.low %v2194_v29, %v2198_v46  ;;  %v4313_v14 = vcombine.high %v2194_v29, %v2198_v46  ;;  %v1580_v47 = vlaneseq  ;;  %v2257_v46 = vld [vmem:[%s5052_s28 + $0x380] sm:$0xff] }
 0x2a9   : > { %v4320_v20 = vcombine.low %v2202_v21, %v2206_v37  ;;  %v4321_v35 = vcombine.high %v2202_v21, %v2206_v37  ;;  %v2266_v24 = vld [vmem:[%s5052_s28 + $0x3c8] sm:$0xff] }
 0x2aa   : > { %1392 = vmatpush1.bf16.msra.mxu0 %v1327_v56  ;;  %v2185_v56 = vld [vmem:[%s5052_s28 + $0x140] sm:$0xff]  ;;  %v5772_v29 = vshrl.u32 %v1580_v47, 7 }
 0x2ab   : > { %1445 = vmatpush1.bf16.msra.mxu1 %v1329_v61  ;;  %1393 = vmatprep.subr.bf16.mxu0 %v1324_v42  ;;  %v4302_v61 = vcombine.low %v2185_v56, %v2189_v38  ;;  %v4303_v42 = vcombine.high %v2185_v56, %v2189_v38  ;;  %v2253_v47 = vld [vmem:[%s5052_s28 + $0x360] sm:$0xff] }
 0x2ac   : > { %1446 = vmatprep.subr.bf16.mxu1 %v1326_v1  ;;  %v2190_v1 = vld [vmem:[%s5052_s28 + $0x168] sm:$0xff] }
 0x2ad   : > { %v4304_v30 = vcombine.low %v2186_v34, %v2190_v1 }
 0x2ae   : > { %1394 = vmatpush1.bf16.msra.mxu0 %v1323_v48  ;;  %v4305_v48 = vcombine.high %v2186_v34, %v2190_v1  ;;  %v2262_v34 = vld [vmem:[%s5052_s28 + $0x3a8] sm:$0xff] }
 0x2af   : > { %1447 = vmatpush1.bf16.msra.mxu1 %v1325_v19  ;;  %v2177_v19 = vld [vmem:[%s5052_s28 + $0x100] sm:$0xff] }
 0x2b1   : > { %4226 = vmatmul.mubr.msk.bf16.vlgmr.msra.gmra.mxu0 %vm618_vm0, %v4622_v58 }
 0x2b2   : > { %4228 = vmatmul.mubr.msk.bf16.vlgmr.msra.gmra.mxu1 %vm618_vm0, %v4622_v58  ;;  %1421 = vmatprep.mubr.bf16.mxu0 %v6514_v28  ;;  %v2181_v58 = vld [vmem:[%s5052_s28 + $0x120] sm:$0xff] }
 0x2b3   : > { %1474 = vmatprep.mubr.bf16.mxu1 %v6514_v28  ;;  %v4294_v28 = vcombine.low %v2177_v19, %v2181_v58 }
 0x2b9   : > { %4227 = vmatmul.mubr.msk.bf16.gmra.mxu0 %vm618_vm0, %v4623_v43 }
 0x2ba   : > { %4229 = vmatmul.mubr.msk.bf16.gmra.mxu1 %vm618_vm0, %v4623_v43  ;;  %v4295_v43 = vcombine.high %v2177_v19, %v2181_v58 }
 0x371   : > { %v1413_v13 = vpop.f32.mrf.mxu0 }
 0x372   : > { %v1466_v59 = vpop.f32.mrf.mxu1  ;;  %v1414_v26 = vadd.f32 %v1413_v13, %v1346_v4  ;;  %v2182_v13 = vld [vmem:[%s5052_s28 + $0x128] sm:$0xff] }
 0x373   : > { %v1415_v49 = vpop.f32.mrf.mxu0  ;;  %v1467_v40 = vadd.f32 %v1466_v59, %v1346_v4 }
 0x374   : > { %v1416_v18 = vadd.f32 %v1415_v49, %v1346_v4  ;;  %v1468_v41 = vpop.f32.mrf.mxu1  ;;  %v2169_v49 = vld [vmem:[%s5052_s28 + $0xc0] sm:$0xff] }
 0x375   : > { %v1469_v3 = vadd.f32 %v1468_v41, %v1346_v4  ;;  %v1417_v39 = vpop.f32.mrf.mxu0 }
 0x376   : > { %v1470_v31 = vpop.f32.mrf.mxu1  ;;  %1549 = vmatprep.mubr.f32.mxu0 %v1416_v18  ;;  %v1418_v5 = vadd.f32 %v1417_v39, %v1351_v27  ;;  %v2170_v39 = vld [vmem:[%s5052_s28 + $0xc8] sm:$0xff] }
 0x377   : > { %1854 = vmatprep.mubr.f32.mxu1 %v1469_v3  ;;  %v1419_v60 = vpop.f32.mrf.mxu0  ;;  %v1471_v10 = vadd.f32 %v1470_v31, %v1351_v27  ;;  %v2174_v31 = vld [vmem:[%s5052_s28 + $0xe8] sm:$0xff] }
 0x378   : > { %v1472_v8 = vpop.f32.mrf.mxu1  ;;  %v1420_v63 = vadd.f32 %v1419_v60, %v1351_v27  ;;  %v4288_v60 = vcombine.low %v2170_v39, %v2174_v31 }
 0x379   : > { %v1423_v2 = vpop.f32.mrf.mxu0  ;;  %v1473_v44 = vadd.f32 %v1472_v8, %v1351_v27  ;;  %v4289_v8 = vcombine.high %v2170_v39, %v2174_v31  ;;  %v2149_v27 = vld [vmem:[%s5052_s28 + $0x20] sm:$0xff] }
 0x37a   : > { %v1476_v33 = vpop.f32.mrf.mxu1  ;;  %v1424_v36 = vadd.f32 %v1423_v2, %v1356_v62  ;;  %v2161_v2 = vld [vmem:[%s5052_s28 + $0x80] sm:$0xff] }
 0x37b   : > { %v1425_v0 = vpop.f32.mrf.mxu0  ;;  %v1477_v52 = vadd.f32 %v1476_v33, %v1356_v62  ;;  %v2165_v33 = vld [vmem:[%s5052_s28 + $0xa0] sm:$0xff] }
 0x37c   : > { %v1478_v55 = vpop.f32.mrf.mxu1  ;;  %v1426_v17 = vadd.f32 %v1425_v0, %v1356_v62  ;;  %v4278_v0 = vcombine.low %v2161_v2, %v2165_v33 }
 0x37d   : > { %v1427_v9 = vpop.f32.mrf.mxu0  ;;  %v1479_v45 = vadd.f32 %v1478_v55, %v1356_v62  ;;  %v2178_v62 = vld [vmem:[%s5052_s28 + $0x108] sm:$0xff]  ;;  %v4279_v55 = vcombine.high %v2161_v2, %v2165_v33 }
 0x37e   : > { %v1480_v25 = vpop.f32.mrf.mxu1  ;;  %v1428_v12 = vadd.f32 %v1427_v9, %v1361_v23  ;;  %v4296_v59 = vcombine.low %v2178_v62, %v2182_v13  ;;  %v4297_v4 = vcombine.high %v2178_v62, %v2182_v13  ;;  %v2162_v9 = vld [vmem:[%s5052_s28 + $0x88] sm:$0xff] }
 0x37f   : > { %v1429_v7 = vpop.f32.mrf.mxu0  ;;  %v1481_v22 = vadd.f32 %v1480_v25, %v1361_v23  ;;  %v2166_v25 = vld [vmem:[%s5052_s28 + $0xa8] sm:$0xff] }
 0x380   : > { %v1430_v53 = vadd.f32 %v1429_v7, %v1361_v23  ;;  %v1482_v11 = vpop.f32.mrf.mxu1  ;;  %v4281_v7 = vcombine.high %v2162_v9, %v2166_v25 }
 0x381   : > { %v1483_v16 = vadd.f32 %v1482_v11, %v1361_v23  ;;  %v4280_v23 = vcombine.low %v2162_v9, %v2166_v25  ;;  %v2157_v11 = vld [vmem:[%s5052_s28 + $0x60] sm:$0xff] }
 0x382   : > { %1509 = vmatprep.subr.mxu0 %v1430_v53 }
 0x383   : > { %1814 = vmatprep.subr.mxu1 %v1483_v16  ;;  %1510 = vmatpush1.xpose.msra.mxu0 %v1428_v12 }
 0x384   : > { %1815 = vmatpush1.xpose.msra.mxu1 %v1481_v22  ;;  %1511 = vmatprep.subr.mxu0 %v1426_v17 }
 0x385   : > { %1816 = vmatprep.subr.mxu1 %v1479_v45 }
 0x387   : > { %1512 = vmatpush1.xpose.msra.mxu0 %v1424_v36 }
 0x388   : > { %1817 = vmatpush1.xpose.msra.mxu1 %v1477_v52  ;;  %1513 = vmatprep.subr.mxu0 %v1420_v63 }
 0x389   : > { %1818 = vmatprep.subr.mxu1 %v1473_v44 }
 0x38b   : > { %1514 = vmatpush1.xpose.msra.mxu0 %v1418_v5 }
 0x38c   : > { %1819 = vmatpush1.xpose.msra.mxu1 %v1471_v10  ;;  %1515 = vmatprep.subr.mxu0 %v1416_v18  ;;  %v2173_v18 = vld [vmem:[%s5052_s28 + $0xe0] sm:$0xff] }
 0x38d   : > { %1820 = vmatprep.subr.mxu1 %v1469_v3  ;;  %v4286_v41 = vcombine.low %v2169_v49, %v2173_v18  ;;  %v4287_v3 = vcombine.high %v2169_v49, %v2173_v18 }
 0x38f   : > { %1516 = vmatpush1.xpose.msra.mxu0 %v1414_v26 }
 0x390   : > { %1821 = vmatpush1.xpose.msra.mxu1 %v1467_v40  ;;  %3703 = vmatprep.subr.bf16.mxu0 %v4319_v51 }
 0x391   : > { %3744 = vmatprep.subr.bf16.mxu1 %v4321_v35  ;;  %v4816_v35 = vmov 1983009808  }
 0x392   : > { %1550 = vmatmul.mubr.f32.vlgmr.msra.gmra.mxu0 %v1414_v26  ;;  %v2265_v26 = vld [vmem:[%s5052_s28 + $0x3c0] sm:$0xff]  ;;  %v1578_v54 = vunpack.c.l.s4 %v4816_v35 }
 0x393   : > { %1855 = vmatmul.mubr.f32.vlgmr.msra.gmra.mxu1 %v1467_v40  ;;  %1554 = vmatprep.mubr.f32.mxu0 %v1420_v63  ;;  %v2269_v40 = vld [vmem:[%s5052_s28 + $0x3e0] sm:$0xff] }
 0x394   : > { %1859 = vmatprep.mubr.f32.mxu1 %v1473_v44  ;;  %3704 = vmatpush1.bf16.xpose.msra.mxu0 %v4318_v50  ;;  %v2146_v44 = vld [vmem:[%s5052_s28 + $0x8] sm:$0xff]  ;;  %v4383_v51 = vcombine.high %v2265_v26, %v2269_v40 }
 0x395   : > { %3745 = vmatpush1.bf16.xpose.msra.mxu1 %v4320_v20  ;;  %3705 = vmatprep.subr.bf16.mxu0 %v4311_v6  ;;  %v2270_v50 = vld [vmem:[%s5052_s28 + $0x3e8] sm:$0xff]  ;;  %v4382_v20 = vcombine.low %v2265_v26, %v2269_v40  ;;  %v1579_v6 = vunpack.c.0.s8 %v1578_v54  ;;  %v2249_v54 = vld [vmem:[%s5052_s28 + $0x340] sm:$0xff] }
 0x396   : > { %1555 = vmatmul.mubr.f32.gmra.mxu0 %v1418_v5  ;;  %3746 = vmatprep.subr.bf16.mxu1 %v4313_v14  ;;  %v2150_v5 = vld [vmem:[%s5052_s28 + $0x28] sm:$0xff]  ;;  %v4385_v37 = vcombine.high %v2266_v24, %v2270_v50 }
 0x397   : > { %1860 = vmatmul.mubr.f32.gmra.mxu1 %v1471_v10  ;;  %1559 = vmatprep.mubr.f32.mxu0 %v1426_v17  ;;  %v4265_v10 = vcombine.high %v2146_v44, %v2150_v5  ;;  %v4264_v21 = vcombine.low %v2146_v44, %v2150_v5  ;;  %v5777_v14 = vsub.s32 %v1579_v6, %v5772_v29  ;;  %v2254_v6 = vld [vmem:[%s5052_s28 + $0x368] sm:$0xff] }
 0x398   : > { %1864 = vmatprep.mubr.f32.mxu1 %v1479_v45  ;;  %v2145_v45 = vld [vmem:[%s5052_s28] sm:$0xff] }
 0x399   : > { %v4262_v15 = vcombine.low %v2145_v45, %v2149_v27 }
 0x39a   : > { %1560 = vmatmul.mubr.f32.gmra.mxu0 %v1424_v36 }
 0x39b   : > { %1865 = vmatmul.mubr.f32.gmra.mxu1 %v1477_v52  ;;  %1564 = vmatprep.mubr.f32.mxu0 %v1430_v53  ;;  %v2153_v53 = vld [vmem:[%s5052_s28 + $0x40] sm:$0xff]  ;;  %v4263_v52 = vcombine.high %v2145_v45, %v2149_v27 }
 0x39c   : > { %1869 = vmatprep.mubr.f32.mxu1 %v1483_v16  ;;  %3706 = vmatpush1.bf16.xpose.msra.mxu0 %v4310_v32  ;;  %v4270_v16 = vcombine.low %v2153_v53, %v2157_v11  ;;  %v4271_v17 = vcombine.high %v2153_v53, %v2157_v11  ;;  %v4384_v32 = vcombine.low %v2266_v24, %v2270_v50 }
 0x39d   : > { %3747 = vmatpush1.bf16.xpose.msra.mxu1 %v4312_v57  ;;  %3707 = vmatprep.subr.bf16.mxu0 %v4303_v42  ;;  %v2261_v57 = vld [vmem:[%s5052_s28 + $0x3a0] sm:$0xff]  ;;  %v2258_v42 = vld [vmem:[%s5052_s28 + $0x388] sm:$0xff] }
 0x39e   : > { %1565 = vmatmul.mubr.f32.gmra.mxu0 %v1428_v12  ;;  %3748 = vmatprep.subr.bf16.mxu1 %v4305_v48  ;;  %v2154_v12 = vld [vmem:[%s5052_s28 + $0x48] sm:$0xff]  ;;  %v4374_v56 = vcombine.low %v2257_v46, %v2261_v57  ;;  %v4375_v38 = vcombine.high %v2257_v46, %v2261_v57  ;;  %v4376_v48 = vcombine.low %v2258_v42, %v2262_v34  ;;  %v2241_v57 = vld [vmem:[%s5052_s28 + $0x300] sm:$0xff] }
 0x39f   : > { %1870 = vmatmul.mubr.f32.gmra.mxu1 %v1481_v22  ;;  %v2158_v22 = vld [vmem:[%s5052_s28 + $0x68] sm:$0xff]  ;;  %v4377_v19 = vcombine.high %v2258_v42, %v2262_v34 }
 0x3a0   : > { %v4272_v36 = vcombine.low %v2154_v12, %v2158_v22  ;;  %v4273_v63 = vcombine.high %v2154_v12, %v2158_v22  ;;  %v2242_v42 = vld [vmem:[%s5052_s28 + $0x308] sm:$0xff] }
 0x3a1   : > { %v2246_v34 = vld [vmem:[%s5052_s28 + $0x328] sm:$0xff] }
 0x3a4   : > { %3708 = vmatpush1.bf16.xpose.msra.mxu0 %v4302_v61 }
 0x3a5   : > { %3749 = vmatpush1.bf16.xpose.msra.mxu1 %v4304_v30  ;;  %3709 = vmatprep.subr.bf16.mxu0 %v4295_v43 }
 0x3a6   : > { %3750 = vmatprep.subr.bf16.mxu1 %v4297_v4 }
 0x3ac   : > { %3710 = vmatpush1.bf16.xpose.msra.mxu0 %v4294_v28 }
 0x3ad   : > { %3751 = vmatpush1.bf16.xpose.msra.mxu1 %v4296_v59  ;;  %3711 = vmatprep.subr.bf16.mxu0 %v4287_v3 }
 0x3ae   : > { %3752 = vmatprep.subr.bf16.mxu1 %v4289_v8 }
 0x3b4   : > { %3712 = vmatpush1.bf16.xpose.msra.mxu0 %v4286_v41 }
 0x3b5   : > { %3753 = vmatpush1.bf16.xpose.msra.mxu1 %v4288_v60  ;;  %3713 = vmatprep.subr.bf16.mxu0 %v4279_v55 }
 0x3b6   : > { %3754 = vmatprep.subr.bf16.mxu1 %v4281_v7 }
 0x3bc   : > { %3714 = vmatpush1.bf16.xpose.msra.mxu0 %v4278_v0 }
 0x3bd   : > { %3755 = vmatpush1.bf16.xpose.msra.mxu1 %v4280_v23  ;;  %3715 = vmatprep.subr.bf16.mxu0 %v4271_v17 }
 0x3be   : > { %3756 = vmatprep.subr.bf16.mxu1 %v4273_v63 }
 0x3c4   : > { %3716 = vmatpush1.bf16.xpose.msra.mxu0 %v4270_v16 }
 0x3c5   : > { %3717 = vmatprep.subr.bf16.mxu0 %v4263_v52  ;;  %3757 = vmatpush1.bf16.xpose.msra.mxu1 %v4272_v36 }
 0x3c6   : > { %3758 = vmatprep.subr.bf16.mxu1 %v4265_v10 }
 0x3cc   : > { %3718 = vmatpush1.bf16.xpose.msra.mxu0 %v4262_v15 }
 0x3cd   : > { %3719 = vmatprep.subr.bf16.mxu0 %v4383_v51  ;;  %3759 = vmatpush1.bf16.xpose.msra.mxu1 %v4264_v21 }
 0x3ce   : > { %3760 = vmatprep.subr.bf16.mxu1 %v4385_v37 }
 0x3d4   : > { %3720 = vmatpush2.bf16.xpose.msra.mxu0 %v4382_v20 }
 0x3d5   : > { %3761 = vmatpush2.bf16.xpose.msra.mxu1 %v4384_v32  ;;  %3721 = vmatprep.subr.bf16.mxu0 %v4375_v38  ;;  %v2250_v32 = vld [vmem:[%s5052_s28 + $0x348] sm:$0xff]  ;;  %v4367_v38 = vcombine.high %v2249_v54, %v2253_v47 }
 0x3d6   : > { %3762 = vmatprep.subr.bf16.mxu1 %v4377_v19 }
 0x3dc   : > { %3722 = vmatpush2.bf16.xpose.msra.mxu0 %v4374_v56  ;;  %v4366_v56 = vcombine.low %v2249_v54, %v2253_v47 }
 0x3dd   : > { %3763 = vmatpush2.bf16.xpose.msra.mxu1 %v4376_v48  ;;  %v4369_v48 = vcombine.high %v2250_v32, %v2254_v6  ;;  %3723 = vmatprep.subr.bf16.mxu0 %v4367_v38  ;;  %v2210_v38 = vld [vmem:[%s5052_s28 + $0x208] sm:$0xff] }
 0x3df   : > { %3764 = vmatprep.subr.bf16.mxu1 %v4369_v48 }
 0x3e4   : > { %3724 = vmatpush2.bf16.xpose.msra.mxu0 %v4366_v56 }
 0x452   : > { %v1551_v61 = vpop.f32.mrf.mxu0 }
 0x453   : > { %v1570_v1 = vmul.f32 0.00390625, %v1551_v61  ;;  %v1856_v30 = vpop.f32.mrf.mxu1  ;;  %v2245_v61 = vld [vmem:[%s5052_s28 + $0x320] sm:$0xff] }
 0x454   : > { %v1875_v58 = vmul.f32 0.00390625, %v1856_v30  ;;  %v1553_v28 = vpop.f32.mrf.mxu0  ;;  %v4368_v30 = vcombine.low %v2250_v32, %v2254_v6  ;;  %v2209_v6 = vld [vmem:[%s5052_s28 + $0x200] sm:$0xff] }
 0x455   : > { %1575 = vst.msk [vmem:[#allocation2] sm:$0x1] %vm1574_vm1, %v1570_v1  ;;  %v1583_v43 = vrot.slane %v1570_v1, %v5777_v14  ;;  %v1604_v62 = vcombine.high %v1570_v1, %v1570_v1  ;;  %v1858_v13 = vpop.f32.mrf.mxu1  ;;  %v4359_v28 = vcombine.high %v2241_v57, %v2245_v61 }
 0x456   : > { %1879 = vst.msk [vmem:[#allocation2 + $0x1] sm:$0x1] %vm1574_vm1, %v1875_v58  ;;  %v1905_v59 = vcombine.high %v1875_v58, %v1875_v58  ;;  %v1556_v4 = vpop.f32.mrf.mxu0  ;;  %v1887_v18 = vrot.slane %v1875_v58, %v5777_v14  ;;  %3765 = vmatpush2.bf16.xpose.msra.mxu1 %v4368_v30  ;;  %v2233_v13 = vld [vmem:[%s5052_s28 + $0x2c0] sm:$0xff] }
 0x457   : > { %v1611_v49 = vrot.slane %v1604_v62, %v5777_v14  ;;  %v5786_v41 = vmul.f32 0.00390625, %v1556_v4  ;;  %v1861_v3 = vpop.f32.mrf.mxu1  ;;  %v4230_v39 = vrot.slane %v1583_v43, 9  ;;  %v1591_v5 = vcombine.high %v1583_v43, %v1583_v43  ;;  %3725 = vmatprep.subr.bf16.mxu0 %v4359_v28  ;;  %v5931_v28 = vld [vmem:[%s5052_s28 + $0x1f8] sm:$0xff] }
 0x458   : > { %v1912_v31 = vrot.slane %v1905_v59, %v5777_v14  ;;  %v5789_v60 = vmul.f32 0.00390625, %v1861_v3  ;;  %v1558_v8 = vpop.f32.mrf.mxu0  ;;  %v4246_v53 = vrot.slane %v1887_v18, 9  ;;  %v1894_v37 = vcombine.high %v1887_v18, %v1887_v18  ;;  %v2237_v59 = vld [vmem:[%s5052_s28 + $0x2e0] sm:$0xff]  ;;  %v2238_v3 = vld [vmem:[%s5052_s28 + $0x2e8] sm:$0xff] }
 0x459   : > { %1613 = vst.msk [vmem:[#allocation2 + $0x2] sm:$0x1] %vm1574_vm1, %v1611_v49  ;;  %1631 = vst.msk [vmem:[#allocation2 + $0x4] sm:$0x1] %vm1574_vm1, %v5786_v41  ;;  %v1657_v2 = vcombine.high %v5786_v41, %v5786_v41  ;;  %v1863_v33 = vpop.f32.mrf.mxu1  ;;  %1586 = vrot.lane.b32.xlu0 %v4230_v39, %s4817_s30  ;;  %v4232_v0 = vrot.slane %v1611_v49, 9  ;;  %v1620_v50 = vcombine.high %v1611_v49, %v1611_v49  ;;  %v4231_v46 = vrot.slane %v1591_v5, 9 }
 0x45a   : > { %1914 = vst.msk [vmem:[#allocation2 + $0x3] sm:$0x1] %vm1574_vm1, %v1912_v31  ;;  %1932 = vst.msk [vmem:[#allocation2 + $0x5] sm:$0x1] %vm1574_vm1, %v5789_v60  ;;  %v1958_v55 = vcombine.high %v5789_v60, %v5789_v60  ;;  %v1561_v9 = vpop.f32.mrf.mxu0  ;;  %v4248_v45 = vrot.slane %v1912_v31, 9  ;;  %v1921_v35 = vcombine.high %v1912_v31, %v1912_v31  ;;  %v1639_v19 = vrot.slane %v5786_v41, %v5777_v14  ;;  %v2234_v41 = vld [vmem:[%s5052_s28 + $0x2c8] sm:$0xff] }
 0x45b   : > { %v5803_v25 = vrot.slane %v1657_v2, %v5777_v14  ;;  %v5805_v23 = vmul.f32 0.00390625, %v1561_v9  ;;  %v1866_v7 = vpop.f32.mrf.mxu1  ;;  %1616 = vrot.lane.b32.xlu1 %v4232_v0, %s4817_s30  ;;  %v4233_v1 = vrot.slane %v1620_v50, 9  ;;  %v4247_v58 = vrot.slane %v1894_v37, 9  ;;  %v2225_v0 = vld [vmem:[%s5052_s28 + $0x280] sm:$0xff] }
 0x45c   : > { %v5809_v11 = vrot.slane %v1958_v55, %v5777_v14  ;;  %v5811_v12 = vmul.f32 0.00390625, %v1866_v7  ;;  %v1563_v16 = vpop.f32.mrf.mxu0  ;;  %v4361_v43 = vcombine.high %v2242_v42, %v2246_v34  ;;  %v4249_v62 = vrot.slane %v1921_v35, 9  ;;  %v2229_v55 = vld [vmem:[%s5052_s28 + $0x2a0] sm:$0xff] }
 0x45d   : > { %1666 = vst.msk [vmem:[#allocation2 + $0x6] sm:$0x1] %vm1574_vm1, %v5803_v25  ;;  %1684 = vst.msk [vmem:[#allocation2 + $0x8] sm:$0x1] %vm1574_vm1, %v5805_v23  ;;  %v1710_v17 = vcombine.high %v5805_v23, %v5805_v23  ;;  %v1868_v22 = vpop.f32.mrf.mxu1  ;;  %1890 = vrot.lane.b32.xlu0 %v4246_v53, %s4817_s30  ;;  %v1940_v4 = vrot.slane %v5789_v60, %v5777_v14  ;;  %v4234_v49 = vrot.slane %v1639_v19, 9  ;;  %v4236_v31 = vrot.slane %v5803_v25, 9 }
 0x45e   : > { %1967 = vst.msk [vmem:[#allocation2 + $0x7] sm:$0x1] %vm1574_vm1, %v5809_v11  ;;  %1985 = vst.msk [vmem:[#allocation2 + $0x9] sm:$0x1] %vm1574_vm1, %v5811_v12  ;;  %v2011_v27 = vcombine.high %v5811_v12, %v5811_v12  ;;  %v1566_v36 = vpop.f32.mrf.mxu0  ;;  %3766 = vmatprep.subr.bf16.mxu1 %v4361_v43  ;;  %v4358_v18 = vcombine.low %v2241_v57, %v2245_v61  ;;  %v4351_v39 = vcombine.high %v2233_v13, %v2237_v59  ;;  %v2226_v53 = vld [vmem:[%s5052_s28 + $0x288] sm:$0xff] }
 0x45f   : > { %v5827_v63 = vrot.slane %v1710_v17, %v5777_v14  ;;  %v5829_v52 = vmul.f32 0.00390625, %v1566_v36  ;;  %v1871_v44 = vpop.f32.mrf.mxu1  ;;  %1917 = vrot.lane.b32.xlu1 %v4248_v45, %s4817_s30  ;;  %v4360_v8 = vcombine.low %v2242_v42, %v2246_v34  ;;  %v4353_v2 = vcombine.high %v2234_v41, %v2238_v3  ;;  %v2230_v16 = vld [vmem:[%s5052_s28 + $0x2a8] sm:$0xff]  ;;  %v5918_v34 = vld [vmem:[%s5052_s28 + $0x1d0] sm:$0xff] }
 0x460   : > { %v5833_v10 = vrot.slane %v2011_v27, %v5777_v14  ;;  %v5835_v26 = vmul.f32 0.00390625, %v1871_v44  ;;  %v1568_v40 = vpop.f32.mrf.mxu0  ;;  %v4250_v60 = vrot.slane %v1940_v4, 9  ;;  %3726 = vmatpush2.bf16.xpose.msra.mxu0 %v4358_v18  ;;  %v4252_v33 = vrot.slane %v5809_v11, 9  ;;  %v2214_v61 = vld [vmem:[%s5052_s28 + $0x228] sm:$0xff] }
 0x461   : > { %1719 = vst.msk [vmem:[#allocation2 + $0xa] sm:$0x1] %vm1574_vm1, %v5827_v63  ;;  %1737 = vst.msk [vmem:[#allocation2 + $0xc] sm:$0x1] %vm1574_vm1, %v5829_v52  ;;  %v1763_v15 = vcombine.high %v5829_v52, %v5829_v52  ;;  %v1873_v24 = vpop.f32.mrf.mxu1  ;;  %1592 = vrot.lane.b32.xlu0 %v1591_v5, %s4818_s29  ;;  %3727 = vmatprep.subr.bf16.mxu0 %v4351_v39  ;;  %v1646_v9 = vcombine.high %v1639_v19, %v1639_v19  ;;  %v2217_v5 = vld [vmem:[%s5052_s28 + $0x240] sm:$0xff]  ;;  %v4240_v30 = vrot.slane %v5827_v63, 9 }
 0x462   : > { %2020 = vst.msk [vmem:[#allocation2 + $0xb] sm:$0x1] %vm1574_vm1, %v5833_v10  ;;  %2038 = vst.msk [vmem:[#allocation2 + $0xd] sm:$0x1] %vm1574_vm1, %v5835_v26  ;;  %v2064_v51 = vcombine.high %v5835_v26, %v5835_v26  ;;  %3767 = vmatpush2.bf16.xpose.msra.mxu1 %v4360_v8  ;;  %v4350_v7 = vcombine.low %v2233_v13, %v2237_v59  ;;  %v4343_v17 = vcombine.high %v2225_v0, %v2229_v55  ;;  %v2221_v40 = vld [vmem:[%s5052_s28 + $0x260] sm:$0xff]  ;;  %v2218_v24 = vld [vmem:[%s5052_s28 + $0x248] sm:$0xff] }
 0x463   : > { %v5851_v21 = vrot.slane %v1763_v15, %v5777_v14  ;;  %1621 = vrot.lane.b32.xlu1 %v1620_v50, %s4818_s29  ;;  %3768 = vmatprep.subr.bf16.mxu1 %v4353_v2  ;;  %v1673_v22 = vcombine.high %v5803_v25, %v5803_v25  ;;  %v4352_v45 = vcombine.low %v2234_v41, %v2238_v3  ;;  %v4235_v25 = vrot.slane %v1646_v9, 9  ;;  %v2222_v50 = vld [vmem:[%s5052_s28 + $0x268] sm:$0xff] }
 0x464   : > { %v5855_v20 = vrot.slane %v2064_v51, %v5777_v14  ;;  %v4345_v27 = vcombine.high %v2226_v53, %v2230_v16  ;;  %v1947_v36 = vcombine.high %v1940_v4, %v1940_v4  ;;  %v1974_v44 = vcombine.high %v5809_v11, %v5809_v11 }
 0x465   : > { %1772 = vst.msk [vmem:[#allocation2 + $0xe] sm:$0x1] %vm1574_vm1, %v5851_v21  ;;  %1895 = vrot.lane.b32.xlu0 %v1894_v37, %s4818_s29  ;;  %v4342_v15 = vcombine.low %v2225_v0, %v2229_v55  ;;  %v4335_v51 = vcombine.high %v2217_v5, %v2221_v40  ;;  %v4237_v37 = vrot.slane %v1673_v22, 9  ;;  %v4337_v54 = vcombine.high %v2218_v24, %v2222_v50 }
 0x466   : > { %2073 = vst.msk [vmem:[#allocation2 + $0xf] sm:$0x1] %vm1574_vm1, %v5855_v20  ;;  %v1692_v11 = vrot.slane %v5805_v23, %v5777_v14  ;;  %v4251_v47 = vrot.slane %v1947_v36, 9  ;;  %v4253_v32 = vrot.slane %v1974_v44, 9  ;;  %v1993_v23 = vrot.slane %v5811_v12, %v5777_v14 }
 0x467   : > { %1922 = vrot.lane.b32.xlu1 %v1921_v35, %s4818_s29  ;;  %v4344_v35 = vcombine.low %v2226_v53, %v2230_v16  ;;  %v4334_v56 = vcombine.low %v2217_v5, %v2221_v40  ;;  %v4336_v48 = vcombine.low %v2218_v24, %v2222_v50  ;;  %v4329_v12 = vcombine.high %v2210_v38, %v2214_v61 }
 0x468   : > { %3728 = vmatpush2.bf16.xpose.msra.mxu0 %v4350_v7  ;;  %v4238_v57 = vrot.slane %v1692_v11, 9  ;;  %v4254_v43 = vrot.slane %v1993_v23, 9  ;;  %v4256_v13 = vrot.slane %v5833_v10, 9  ;;  %v1699_v59 = vcombine.high %v1692_v11, %v1692_v11 }
 0x469   : > { %1599 = vrot.lane.b32.xlu0 %v4231_v46, %s4819_s14  ;;  %3729 = vmatprep.subr.bf16.mxu0 %v4343_v17  ;;  %v2213_v46 = vld [vmem:[%s5052_s28 + $0x220] sm:$0xff]  ;;  %v1726_v18 = vcombine.high %v5827_v63, %v5827_v63  ;;  %v4328_v41 = vcombine.low %v2210_v38, %v2214_v61  ;;  %v2000_v39 = vcombine.high %v1993_v23, %v1993_v23  ;;  %v4244_v55 = vrot.slane %v5851_v21, 9 }
 0x46a   : > { %3769 = vmatpush2.bf16.xpose.msra.mxu1 %v4352_v45  ;;  %v4327_v42 = vcombine.high %v2209_v6, %v2213_v46  ;;  %v4326_v4 = vcombine.low %v2209_v6, %v2213_v46  ;;  %v4239_v8 = vrot.slane %v1699_v59, 9  ;;  %v1745_v2 = vrot.slane %v5829_v52, %v5777_v14 }
 0x46b   : > { %1627 = vrot.lane.b32.xlu1 %v4233_v1, %s4819_s14  ;;  %3770 = vmatprep.subr.bf16.mxu1 %v4345_v27  ;;  %v5921_v1 = vld [vmem:[%s5052_s28 + $0x1f0] sm:$0xff]  ;;  %v4241_v63 = vrot.slane %v1726_v18, 9  ;;  %v4260_v52 = vrot.slane %v5855_v20, 9  ;;  %v2080_v16 = vcombine.high %v5855_v20, %v5855_v20 }
 0x46c   : > { %v4322_v19 = vcombine.low %v5918_v34, %v5921_v1  ;;  %v4242_v0 = vrot.slane %v1745_v2, 9  ;;  %v1752_v7 = vcombine.high %v1745_v2, %v1745_v2  ;;  %v2200_v2 = vld [vmem:[%s5052_s28 + $0x1b8] sm:$0xff] }
 0x46d   : > { %1901 = vrot.lane.b32.xlu0 %v4247_v58, %s4819_s14  ;;  %v5928_v58 = vld [vmem:[%s5052_s28 + $0x1d8] sm:$0xff] }
 0x46e   : > { %v4325_v3 = vcombine.high %v5928_v58, %v5931_v28  ;;  %v4243_v17 = vrot.slane %v1752_v7, 9 }
 0x46f   : > { %1928 = vrot.lane.b32.xlu1 %v4249_v62, %s4819_s14  ;;  %v4324_v62 = vcombine.low %v5928_v58, %v5931_v28 }
 0x470   : > { %3730 = vmatpush2.bf16.xpose.msra.mxu0 %v4342_v15 }
 0x471   : > { %1642 = vrot.lane.b32.xlu0 %v4234_v49, %s4817_s30  ;;  %3731 = vmatprep.subr.bf16.mxu0 %v4335_v51  ;;  %v4323_v49 = vcombine.high %v5918_v34, %v5921_v1  ;;  %v2188_v1 = vld [vmem:[%s5052_s28 + $0x158] sm:$0xff] }
 0x472   : > { %3771 = vmatpush2.bf16.xpose.msra.mxu1 %v4344_v35 }
 0x473   : > { %1669 = vrot.lane.b32.xlu1 %v4236_v31, %s4817_s30  ;;  %3772 = vmatprep.subr.bf16.mxu1 %v4337_v54  ;;  %v2027_v31 = vcombine.high %v5833_v10, %v5833_v10  ;;  %v2046_v10 = vrot.slane %v5835_v26, %v5777_v14  ;;  %v1779_v26 = vcombine.high %v5851_v21, %v5851_v21  ;;  %v4261_v21 = vrot.slane %v2080_v16, 9 }
 0x475   : > { %1943 = vrot.lane.b32.xlu0 %v4250_v60, %s4817_s30  ;;  %v4255_v60 = vrot.slane %v2000_v39, 9  ;;  %v2053_v53 = vcombine.high %v2046_v10, %v2046_v10 }
 0x477   : > { %1970 = vrot.lane.b32.xlu1 %v4252_v33, %s4817_s30  ;;  %v4257_v33 = vrot.slane %v2027_v31, 9  ;;  %v4259_v45 = vrot.slane %v2053_v53, 9 }
 0x478   : > { %3732 = vmatpush2.bf16.xpose.msra.mxu0 %v4334_v56 }
 0x479   : > { %1647 = vrot.lane.b32.xlu0 %v1646_v9, %s4818_s29  ;;  %3733 = vmatprep.subr.bf16.mxu0 %v4327_v42  ;;  %v4258_v9 = vrot.slane %v2046_v10, 9 }
 0x47a   : > { %3773 = vmatpush2.bf16.xpose.msra.mxu1 %v4336_v48 }
 0x47b   : > { %1674 = vrot.lane.b32.xlu1 %v1673_v22, %s4818_s29  ;;  %3774 = vmatprep.subr.bf16.mxu1 %v4329_v12  ;;  %v4245_v22 = vrot.slane %v1779_v26, 9 }
 0x47d   : > { %1948 = vrot.lane.b32.xlu0 %v1947_v36, %s4818_s29 }
 0x47f   : > { %1975 = vrot.lane.b32.xlu1 %v1974_v44, %s4818_s29 }
 0x480   : > { %3734 = vmatpush2.bf16.xpose.msra.mxu0 %v4326_v4 }
 0x481   : > { %1653 = vrot.lane.b32.xlu0 %v4235_v25, %s4819_s14  ;;  %3785 = vmatprep.subr.bf16.mxu0 %v4323_v49 }
 0x482   : > { %3775 = vmatpush2.bf16.xpose.msra.mxu1 %v4328_v41  ;;  %v2195_v41 = vld [vmem:[%s5052_s28 + $0x190] sm:$0xff] }
 0x483   : > { %1680 = vrot.lane.b32.xlu1 %v4237_v37, %s4819_s14  ;;  %3826 = vmatprep.subr.bf16.mxu1 %v4325_v3  ;;  %v2199_v3 = vld [vmem:[%s5052_s28 + $0x1b0] sm:$0xff] }
 0x484   : > { %v4315_v10 = vcombine.high %v2195_v41, %v2199_v3  ;;  %v4314_v34 = vcombine.low %v2195_v41, %v2199_v3  ;;  %v2155_v41 = vld [vmem:[%s5052_s28 + $0x50] sm:$0xff] }
 0x485   : > { %1954 = vrot.lane.b32.xlu0 %v4251_v47, %s4819_s14  ;;  %v2159_v3 = vld [vmem:[%s5052_s28 + $0x70] sm:$0xff] }
 0x487   : > { %1981 = vrot.lane.b32.xlu1 %v4253_v32, %s4819_s14 }
 0x489   : > { %1695 = vrot.lane.b32.xlu0 %v4238_v57, %s4817_s30 }
 0x48b   : > { %1722 = vrot.lane.b32.xlu1 %v4240_v30, %s4817_s30 }
 0x48d   : > { %1996 = vrot.lane.b32.xlu0 %v4254_v43, %s4817_s30 }
 0x48f   : > { %2023 = vrot.lane.b32.xlu1 %v4256_v13, %s4817_s30 }
 0x491   : > { %1700 = vrot.lane.b32.xlu0 %v1699_v59, %s4818_s29 }
 0x493   : > { %1727 = vrot.lane.b32.xlu1 %v1726_v18, %s4818_s29 }
 0x495   : > { %2001 = vrot.lane.b32.xlu0 %v2000_v39, %s4818_s29 }
 0x497   : > { %2028 = vrot.lane.b32.xlu1 %v2027_v31, %s4818_s29 }
 0x499   : > { %1706 = vrot.lane.b32.xlu0 %v4239_v8, %s4819_s14 }
 0x49b   : > { %1733 = vrot.lane.b32.xlu1 %v4241_v63, %s4819_s14  ;;  %v2196_v63 = vld [vmem:[%s5052_s28 + $0x198] sm:$0xff] }
 0x49c   : > { %v4316_v58 = vcombine.low %v2196_v63, %v2200_v2 }
 0x49d   : > { %2007 = vrot.lane.b32.xlu0 %v4255_v60, %s4819_s14 }
 0x49f   : > { %2034 = vrot.lane.b32.xlu1 %v4257_v33, %s4819_s14 }
 0x4a1   : > { %1748 = vrot.lane.b32.xlu0 %v4242_v0, %s4817_s30 }
 0x4a3   : > { %1775 = vrot.lane.b32.xlu1 %v4244_v55, %s4817_s30 }
 0x4a5   : > { %2049 = vrot.lane.b32.xlu0 %v4258_v9, %s4817_s30 }
 0x4a7   : > { %2076 = vrot.lane.b32.xlu1 %v4260_v52, %s4817_s30  ;;  %v4317_v52 = vcombine.high %v2196_v63, %v2200_v2  ;;  %v2160_v63 = vld [vmem:[%s5052_s28 + $0x78] sm:$0xff]  ;;  %v4275_v2 = vcombine.high %v2155_v41, %v2159_v3 }
 0x4a9   : > { %1753 = vrot.lane.b32.xlu0 %v1752_v7, %s4818_s29 }
 0x4ab   : > { %1780 = vrot.lane.b32.xlu1 %v1779_v26, %s4818_s29  ;;  %v2187_v26 = vld [vmem:[%s5052_s28 + $0x150] sm:$0xff] }
 0x4ad   : > { %2054 = vrot.lane.b32.xlu0 %v2053_v53, %s4818_s29  ;;  %v2191_v53 = vld [vmem:[%s5052_s28 + $0x170] sm:$0xff] }
 0x4af   : > { %2081 = vrot.lane.b32.xlu1 %v2080_v16, %s4818_s29 }
 0x4b1   : > { %1759 = vrot.lane.b32.xlu0 %v4243_v17, %s4819_s14 }
 0x4b3   : > { %1786 = vrot.lane.b32.xlu1 %v4245_v22, %s4819_s14  ;;  %v4307_v22 = vcombine.high %v2187_v26, %v2191_v53 }
 0x4b5   : > { %2060 = vrot.lane.b32.xlu0 %v4259_v45, %s4819_s14 }
 0x4b7   : > { %2087 = vrot.lane.b32.xlu1 %v4261_v21, %s4819_s14  ;;  %v2179_v21 = vld [vmem:[%s5052_s28 + $0x110] sm:$0xff] }
 0x4cb   : > { %v1587_v27 = vpop.permute.xlu0 %1586 }
 0x4cc   : > { %1590 = vst.msk [vmem:[#allocation2] sm:$0x1] %vm1589_vm2, %v1587_v27  ;;  %v2183_v27 = vld [vmem:[%s5052_s28 + $0x130] sm:$0xff] }
 0x4cd   : > { %v1617_v36 = vpop.permute.xlu1 %1616 }
 0x4ce   : > { %1619 = vst.msk [vmem:[#allocation2 + $0x2] sm:$0x1] %vm1589_vm2, %v1617_v36 }
 0x4cf   : > { %v1891_v20 = vpop.permute.xlu0 %1890 }
 0x4d0   : > { %1893 = vst.msk [vmem:[#allocation2 + $0x1] sm:$0x1] %vm1589_vm2, %v1891_v20  ;;  %v4306_v20 = vcombine.low %v2187_v26, %v2191_v53 }
 0x4d1   : > { %v1918_v44 = vpop.permute.xlu1 %1917 }
 0x4d2   : > { %1920 = vst.msk [vmem:[#allocation2 + $0x3] sm:$0x1] %vm1589_vm2, %v1918_v44  ;;  %v2180_v44 = vld [vmem:[%s5052_s28 + $0x118] sm:$0xff] }
 0x4d3   : > { %v1593_v5 = vpop.permute.xlu0 %1592 }
 0x4d4   : > { %1596 = vst.msk [vmem:[#allocation2] sm:$0x1] %vm1595_vm3, %v1593_v5  ;;  %v2184_v5 = vld [vmem:[%s5052_s28 + $0x138] sm:$0xff] }
 0x4d5   : > { %v1622_v40 = vpop.permute.xlu1 %1621 }
 0x4d6   : > { %1624 = vst.msk [vmem:[#allocation2 + $0x2] sm:$0x1] %vm1595_vm3, %v1622_v40 }
 0x4d7   : > { %v1896_v25 = vpop.permute.xlu0 %1895 }
 0x4d8   : > { %1898 = vst.msk [vmem:[#allocation2 + $0x1] sm:$0x1] %vm1595_vm3, %v1896_v25  ;;  %v4299_v25 = vcombine.high %v2179_v21, %v2183_v27 }
 0x4d9   : > { %v1923_v15 = vpop.permute.xlu1 %1922 }
 0x4da   : > { %1925 = vst.msk [vmem:[#allocation2 + $0x3] sm:$0x1] %vm1595_vm3, %v1923_v15 }
 0x4db   : > { %v1600_v24 = vpop.permute.xlu0 %1599 }
 0x4dc   : > { %1603 = vst.msk [vmem:[#allocation2] sm:$0x1] %vm1602_vm4, %v1600_v24 }
 0x4dd   : > { %v1628_v50 = vpop.permute.xlu1 %1627 }
 0x4de   : > { %1630 = vst.msk [vmem:[#allocation2 + $0x2] sm:$0x1] %vm1602_vm4, %v1628_v50  ;;  %v4301_v50 = vcombine.high %v2180_v44, %v2184_v5 }
 0x4df   : > { %v1902_v51 = vpop.permute.xlu0 %1901 }
 0x4e0   : > { %1904 = vst.msk [vmem:[#allocation2 + $0x1] sm:$0x1] %vm1602_vm4, %v1902_v51 }
 0x4e1   : > { %v1929_v37 = vpop.permute.xlu1 %1928 }
 0x4e2   : > { %1931 = vst.msk [vmem:[#allocation2 + $0x3] sm:$0x1] %vm1602_vm4, %v1929_v37  ;;  %v2171_v37 = vld [vmem:[%s5052_s28 + $0xd0] sm:$0xff] }
 0x4e3   : > { %v1643_v35 = vpop.permute.xlu0 %1642 }
 0x4e4   : > { %1645 = vst.msk [vmem:[#allocation2 + $0x4] sm:$0x1] %vm1589_vm2, %v1643_v35  ;;  %v2175_v35 = vld [vmem:[%s5052_s28 + $0xf0] sm:$0xff] }
 0x4e5   : > { %v1670_v54 = vpop.permute.xlu1 %1669 }
 0x4e6   : > { %1672 = vst.msk [vmem:[#allocation2 + $0x6] sm:$0x1] %vm1589_vm2, %v1670_v54 }
 0x4e7   : > { %v1944_v11 = vpop.permute.xlu0 %1943 }
 0x4e8   : > { %1946 = vst.msk [vmem:[#allocation2 + $0x5] sm:$0x1] %vm1589_vm2, %v1944_v11  ;;  %v4298_v11 = vcombine.low %v2179_v21, %v2183_v27  ;;  %v2267_v27 = vld [vmem:[%s5052_s28 + $0x3d0] sm:$0xff] }
 0x4e9   : > { %v1971_v47 = vpop.permute.xlu1 %1970 }
 0x4ea   : > { %1973 = vst.msk [vmem:[#allocation2 + $0x7] sm:$0x1] %vm1589_vm2, %v1971_v47  ;;  %v2172_v47 = vld [vmem:[%s5052_s28 + $0xd8] sm:$0xff] }
 0x4eb   : > { %v1648_v32 = vpop.permute.xlu0 %1647 }
 0x4ec   : > { %1650 = vst.msk [vmem:[#allocation2 + $0x4] sm:$0x1] %vm1595_vm3, %v1648_v32  ;;  %v2176_v32 = vld [vmem:[%s5052_s28 + $0xf8] sm:$0xff] }
 0x4ed   : > { %v1675_v6 = vpop.permute.xlu1 %1674 }
 0x4ee   : > { %1677 = vst.msk [vmem:[#allocation2 + $0x6] sm:$0x1] %vm1595_vm3, %v1675_v6 }
 0x4ef   : > { %v1949_v46 = vpop.permute.xlu0 %1948 }
 0x4f0   : > { %1951 = vst.msk [vmem:[#allocation2 + $0x5] sm:$0x1] %vm1595_vm3, %v1949_v46  ;;  %v4291_v46 = vcombine.high %v2171_v37, %v2175_v35 }
 0x4f1   : > { %v1976_v23 = vpop.permute.xlu1 %1975 }
 0x4f2   : > { %1978 = vst.msk [vmem:[#allocation2 + $0x7] sm:$0x1] %vm1595_vm3, %v1976_v23  ;;  %v4300_v23 = vcombine.low %v2180_v44, %v2184_v5  ;;  %v2268_v44 = vld [vmem:[%s5052_s28 + $0x3d8] sm:$0xff] }
 0x4f3   : > { %v1654_v57 = vpop.permute.xlu0 %1653  ;;  %v2272_v5 = vld [vmem:[%s5052_s28 + $0x3f8] sm:$0xff] }
 0x4f4   : > { %1656 = vst.msk [vmem:[#allocation2 + $0x4] sm:$0x1] %vm1602_vm4, %v1654_v57 }
 0x4f5   : > { %v1681_v56 = vpop.permute.xlu1 %1680 }
 0x4f6   : > { %1683 = vst.msk [vmem:[#allocation2 + $0x6] sm:$0x1] %vm1602_vm4, %v1681_v56  ;;  %v4293_v56 = vcombine.high %v2172_v47, %v2176_v32 }
 0x4f7   : > { %v1955_v38 = vpop.permute.xlu0 %1954 }
 0x4f8   : > { %1957 = vst.msk [vmem:[#allocation2 + $0x5] sm:$0x1] %vm1602_vm4, %v1955_v38 }
 0x4f9   : > { %v1982_v61 = vpop.permute.xlu1 %1981 }
 0x4fa   : > { %1984 = vst.msk [vmem:[#allocation2 + $0x7] sm:$0x1] %vm1602_vm4, %v1982_v61  ;;  %v2163_v61 = vld [vmem:[%s5052_s28 + $0x90] sm:$0xff] }
 0x4fb   : > { %v1696_v42 = vpop.permute.xlu0 %1695 }
 0x4fc   : > { %1698 = vst.msk [vmem:[#allocation2 + $0x8] sm:$0x1] %vm1589_vm2, %v1696_v42  ;;  %v2167_v42 = vld [vmem:[%s5052_s28 + $0xb0] sm:$0xff] }
 0x4fd   : > { %v1723_v30 = vpop.permute.xlu1 %1722 }
 0x4fe   : > { %1725 = vst.msk [vmem:[#allocation2 + $0xa] sm:$0x1] %vm1589_vm2, %v1723_v30 }
 0x4ff   : > { %v1997_v48 = vpop.permute.xlu0 %1996 }
 0x500   : > { %1999 = vst.msk [vmem:[#allocation2 + $0x9] sm:$0x1] %vm1589_vm2, %v1997_v48  ;;  %v4290_v48 = vcombine.low %v2171_v37, %v2175_v35  ;;  %v2260_v37 = vld [vmem:[%s5052_s28 + $0x398] sm:$0xff] }
 0x501   : > { %v2024_v12 = vpop.permute.xlu1 %2023  ;;  %v2091_v43 = vld [vmem:[#allocation2] sm:$0xff]  ;;  %v2264_v35 = vld [vmem:[%s5052_s28 + $0x3b8] sm:$0xff] }
 0x502   : > { %2026 = vst.msk [vmem:[#allocation2 + $0xb] sm:$0x1] %vm1589_vm2, %v2024_v12  ;;  %v2102_v13 = vrot.slane %v2091_v43, %v5777_v14  ;;  %v2095_v59 = vcombine.high %v2091_v43, %v2091_v43  ;;  %v2164_v12 = vld [vmem:[%s5052_s28 + $0x98] sm:$0xff] }
 0x503   : > { %v1701_v4 = vpop.permute.xlu0 %1700  ;;  %v2168_v43 = vld [vmem:[%s5052_s28 + $0xb8] sm:$0xff] }
 0x504   : > { %1703 = vst.msk [vmem:[#allocation2 + $0x8] sm:$0x1] %vm1595_vm3, %v1701_v4  ;;  %v2110_v49 = vcombine.high %v2102_v13, %v2102_v13  ;;  %v2109_v18 = vrot.slane %v2095_v59, %v5777_v14  ;;  %v6015_v33 = vpack.c.bf16 %v2102_v13, %v2102_v13  ;;  %v4283_v59 = vcombine.high %v2163_v61, %v2167_v42 }
 0x505   : > { %v1728_v39 = vpop.permute.xlu1 %1727  ;;  %v4292_v4 = vcombine.low %v2172_v47, %v2176_v32  ;;  %v4381_v47 = vcombine.high %v2260_v37, %v2264_v35  ;;  %v2251_v32 = vld [vmem:[%s5052_s28 + $0x350] sm:$0xff] }
 0x506   : > { %1730 = vst.msk [vmem:[#allocation2 + $0xa] sm:$0x1] %vm1595_vm3, %v1728_v39  ;;  %v6011_v31 = vpack.c.bf16 %v2110_v49, %v2110_v49  ;;  %v2111_v8 = vcombine.high %v2109_v18, %v2109_v18  ;;  %v6022_v9 = vpack.c.bf16 %v2109_v18, %v2109_v18  ;;  %v4285_v18 = vcombine.high %v2164_v12, %v2168_v43 }
 0x507   : > { %v2002_v60 = vpop.permute.xlu0 %2001  ;;  %v4282_v39 = vcombine.low %v2163_v61, %v2167_v42  ;;  %v2243_v42 = vld [vmem:[%s5052_s28 + $0x310] sm:$0xff] }
 0x508   : > { %2004 = vst.msk [vmem:[#allocation2 + $0x9] sm:$0x1] %vm1595_vm3, %v2002_v60  ;;  %3735 = vmatprep.mubr.bf16.mxu0 %v6011_v31  ;;  %v6019_v0 = vpack.c.bf16 %v2111_v8, %v2111_v8  ;;  %v2156_v8 = vld [vmem:[%s5052_s28 + $0x58] sm:$0xff]  ;;  %v4284_v60 = vcombine.low %v2164_v12, %v2168_v43 }
 0x509   : > { %3736 = vmatmul.mubr.bf16.vlgmr.msra.gmra.mxu0 %v6015_v33  ;;  %v2029_v55 = vpop.permute.xlu1 %2028  ;;  %v2244_v12 = vld [vmem:[%s5052_s28 + $0x318] sm:$0xff] }
 0x50a   : > { %3786 = vmatpush1.bf16.xpose.msra.mxu0 %v4322_v19  ;;  %2031 = vst.msk [vmem:[#allocation2 + $0xb] sm:$0x1] %vm1595_vm3, %v2029_v55  ;;  %3776 = vmatprep.mubr.bf16.mxu1 %v6019_v0  ;;  %v2192_v19 = vld [vmem:[%s5052_s28 + $0x178] sm:$0xff]  ;;  %v4277_v55 = vcombine.high %v2156_v8, %v2160_v63 }
 0x50b   : > { %3777 = vmatmul.mubr.bf16.vlgmr.msra.gmra.mxu1 %v6022_v9  ;;  %v1707_v7 = vpop.permute.xlu0 %1706  ;;  %3787 = vmatprep.subr.bf16.mxu0 %v4315_v10  ;;  %v4308_v15 = vcombine.low %v2188_v1, %v2192_v19  ;;  %v2248_v43 = vld [vmem:[%s5052_s28 + $0x338] sm:$0xff] }
 0x50c   : > { %3827 = vmatpush1.bf16.xpose.msra.mxu1 %v4324_v62  ;;  %1709 = vst.msk [vmem:[#allocation2 + $0x8] sm:$0x1] %vm1602_vm4, %v1707_v7  ;;  %v4309_v62 = vcombine.high %v2188_v1, %v2192_v19  ;;  %v4274_v1 = vcombine.low %v2155_v41, %v2159_v3  ;;  %v2236_v3 = vld [vmem:[%s5052_s28 + $0x2d8] sm:$0xff] }
 0x50d   : > { %v1734_v16 = vpop.permute.xlu1 %1733  ;;  %3828 = vmatprep.subr.bf16.mxu1 %v4317_v52 }
 0x50e   : > { %1736 = vst.msk [vmem:[#allocation2 + $0xa] sm:$0x1] %vm1602_vm4, %v1734_v16  ;;  %v2147_v16 = vld [vmem:[%s5052_s28 + $0x10] sm:$0xff] }
 0x50f   : > { %v2008_v17 = vpop.permute.xlu0 %2007 }
 0x510   : > { %2010 = vst.msk [vmem:[#allocation2 + $0x9] sm:$0x1] %vm1602_vm4, %v2008_v17 }
 0x511   : > { %v2035_v28 = vpop.permute.xlu1 %2034 }
 0x512   : > { %3788 = vmatpush1.bf16.xpose.msra.mxu0 %v4314_v34  ;;  %2037 = vst.msk [vmem:[#allocation2 + $0xb] sm:$0x1] %vm1602_vm4, %v2035_v28  ;;  %v2151_v34 = vld [vmem:[%s5052_s28 + $0x30] sm:$0xff] }
 0x513   : > { %v1749_v45 = vpop.permute.xlu0 %1748  ;;  %3789 = vmatprep.subr.bf16.mxu0 %v4307_v22  ;;  %v2148_v22 = vld [vmem:[%s5052_s28 + $0x18] sm:$0xff]  ;;  %v4267_v28 = vcombine.high %v2147_v16, %v2151_v34 }
 0x514   : > { %3829 = vmatpush1.bf16.xpose.msra.mxu1 %v4316_v58  ;;  %1751 = vst.msk [vmem:[#allocation2 + $0xc] sm:$0x1] %vm1589_vm2, %v1749_v45  ;;  %v2152_v58 = vld [vmem:[%s5052_s28 + $0x38] sm:$0xff] }
 0x515   : > { %v1776_v36 = vpop.permute.xlu1 %1775  ;;  %3830 = vmatprep.subr.bf16.mxu1 %v4309_v62  ;;  %v4276_v62 = vcombine.low %v2156_v8, %v2160_v63  ;;  %v4269_v21 = vcombine.high %v2148_v22, %v2152_v58  ;;  %v4364_v63 = vcombine.low %v2244_v12, %v2248_v43 }
 0x516   : > { %1778 = vst.msk [vmem:[#allocation2 + $0xe] sm:$0x1] %vm1589_vm2, %v1776_v36  ;;  %v2271_v36 = vld [vmem:[%s5052_s28 + $0x3f0] sm:$0xff] }
 0x517   : > { %v2050_v40 = vpop.permute.xlu0 %2049 }
 0x518   : > { %2052 = vst.msk [vmem:[#allocation2 + $0xd] sm:$0x1] %vm1589_vm2, %v2050_v40  ;;  %v4387_v40 = vcombine.high %v2267_v27, %v2271_v36 }
 0x519   : > { %v2077_v24 = vpop.permute.xlu1 %2076 }
 0x51a   : > { %3790 = vmatpush1.bf16.xpose.msra.mxu0 %v4306_v20  ;;  %2079 = vst.msk [vmem:[#allocation2 + $0xf] sm:$0x1] %vm1589_vm2, %v2077_v24  ;;  %v4266_v20 = vcombine.low %v2147_v16, %v2151_v34  ;;  %v2259_v24 = vld [vmem:[%s5052_s28 + $0x390] sm:$0xff] }
 0x51b   : > { %v1754_v51 = vpop.permute.xlu0 %1753  ;;  %3791 = vmatprep.subr.bf16.mxu0 %v4299_v25  ;;  %v4268_v25 = vcombine.low %v2148_v22, %v2152_v58  ;;  %v2223_v22 = vld [vmem:[%s5052_s28 + $0x270] sm:$0xff] }
 0x51c   : > { %3831 = vmatpush1.bf16.xpose.msra.mxu1 %v4308_v15  ;;  %1756 = vst.msk [vmem:[#allocation2 + $0xc] sm:$0x1] %vm1595_vm3, %v1754_v51  ;;  %v4389_v15 = vcombine.high %v2268_v44, %v2272_v5  ;;  %v4386_v51 = vcombine.low %v2267_v27, %v2271_v36 }
 0x51d   : > { %v1781_v54 = vpop.permute.xlu1 %1780  ;;  %3832 = vmatprep.subr.bf16.mxu1 %v4301_v50  ;;  %v2263_v50 = vld [vmem:[%s5052_s28 + $0x3b0] sm:$0xff] }
 0x51e   : > { %1783 = vst.msk [vmem:[#allocation2 + $0xe] sm:$0x1] %vm1595_vm3, %v1781_v54  ;;  %v4379_v54 = vcombine.high %v2259_v24, %v2263_v50 }
 0x51f   : > { %v2055_v6 = vpop.permute.xlu0 %2054 }
 0x520   : > { %2057 = vst.msk [vmem:[#allocation2 + $0xd] sm:$0x1] %vm1595_vm3, %v2055_v6  ;;  %v2255_v6 = vld [vmem:[%s5052_s28 + $0x370] sm:$0xff] }
 0x521   : > { %v2082_v57 = vpop.permute.xlu1 %2081 }
 0x522   : > { %3792 = vmatpush1.bf16.xpose.msra.mxu0 %v4298_v11  ;;  %2084 = vst.msk [vmem:[#allocation2 + $0xf] sm:$0x1] %vm1595_vm3, %v2082_v57  ;;  %v4388_v11 = vcombine.low %v2268_v44, %v2272_v5  ;;  %v2256_v57 = vld [vmem:[%s5052_s28 + $0x378] sm:$0xff]  ;;  %v2215_v44 = vld [vmem:[%s5052_s28 + $0x230] sm:$0xff] }
 0x523   : > { %v1760_v38 = vpop.permute.xlu0 %1759  ;;  %3793 = vmatprep.subr.bf16.mxu0 %v4291_v46  ;;  %v4378_v46 = vcombine.low %v2259_v24, %v2263_v50 }
 0x524   : > { %3833 = vmatpush1.bf16.xpose.msra.mxu1 %v4300_v23  ;;  %1762 = vst.msk [vmem:[#allocation2 + $0xc] sm:$0x1] %vm1602_vm4, %v1760_v38  ;;  %v2252_v23 = vld [vmem:[%s5052_s28 + $0x358] sm:$0xff]  ;;  %v4380_v38 = vcombine.low %v2260_v37, %v2264_v35  ;;  %v2333_v37 = vld [vmem:[%s5052_s28 + $0x5e0] sm:$0xff] }
 0x525   : > { %v1787_v30 = vpop.permute.xlu1 %1786  ;;  %3834 = vmatprep.subr.bf16.mxu1 %v4293_v56  ;;  %v4371_v56 = vcombine.high %v2251_v32, %v2255_v6  ;;  %v4373_v61 = vcombine.high %v2252_v23, %v2256_v57 }
 0x526   : > { %1789 = vst.msk [vmem:[#allocation2 + $0xe] sm:$0x1] %vm1602_vm4, %v1787_v30  ;;  %v2247_v30 = vld [vmem:[%s5052_s28 + $0x330] sm:$0xff] }
 0x527   : > { %v2061_v13 = vpop.permute.xlu0 %2060  ;;  %v4362_v41 = vcombine.low %v2243_v42, %v2247_v30 }
 0x528   : > { %2063 = vst.msk [vmem:[#allocation2 + $0xd] sm:$0x1] %vm1602_vm4, %v2061_v13  ;;  %v4363_v13 = vcombine.high %v2243_v42, %v2247_v30 }
 0x529   : > { %v2088_v49 = vpop.permute.xlu1 %2087 }
 0x52a   : > { %3794 = vmatpush1.bf16.xpose.msra.mxu0 %v4290_v48  ;;  %2090 = vst.msk [vmem:[#allocation2 + $0xf] sm:$0x1] %vm1602_vm4, %v2088_v49  ;;  %v4370_v48 = vcombine.low %v2251_v32, %v2255_v6  ;;  %v2235_v49 = vld [vmem:[%s5052_s28 + $0x2d0] sm:$0xff] }
 0x52b   : > { %3795 = vmatprep.subr.bf16.mxu0 %v4283_v59  ;;  %v4372_v59 = vcombine.low %v2252_v23, %v2256_v57  ;;  %v2325_v23 = vld [vmem:[%s5052_s28 + $0x5a0] sm:$0xff] }
 0x52c   : > { %3835 = vmatpush1.bf16.xpose.msra.mxu1 %v4292_v4  ;;  %v4365_v4 = vcombine.high %v2244_v12, %v2248_v43  ;;  %v2317_v43 = vld [vmem:[%s5052_s28 + $0x560] sm:$0xff] }
 0x52d   : > { %3836 = vmatprep.subr.bf16.mxu1 %v4285_v18  ;;  %v2239_v18 = vld [vmem:[%s5052_s28 + $0x2f0] sm:$0xff] }
 0x52e   : > { %v4355_v8 = vcombine.high %v2235_v49, %v2239_v18 }
 0x531   : > { %v2092_v10 = vld [vmem:[#allocation2 + $0x8] sm:$0xff] }
 0x532   : > { %3796 = vmatpush1.bf16.xpose.msra.mxu0 %v4282_v39  ;;  %v6070_v52 = vrot.slane %v2092_v10, %v5777_v14  ;;  %v2112_v7 = vcombine.high %v2092_v10, %v2092_v10  ;;  %v2240_v39 = vld [vmem:[%s5052_s28 + $0x2f8] sm:$0xff]  ;;  %v2231_v10 = vld [vmem:[%s5052_s28 + $0x2b0] sm:$0xff] }
 0x533   : > { %3797 = vmatprep.subr.bf16.mxu0 %v4275_v2  ;;  %v4357_v2 = vcombine.high %v2236_v3, %v2240_v39  ;;  %v4356_v34 = vcombine.low %v2236_v3, %v2240_v39  ;;  %v2306_v3 = vld [vmem:[%s5052_s28 + $0x508] sm:$0xff] }
 0x534   : > { %3837 = vmatpush1.bf16.xpose.msra.mxu1 %v4284_v60  ;;  %v2127_v26 = vcombine.high %v6070_v52, %v6070_v52  ;;  %v6075_v53 = vrot.slane %v2112_v7, %v5777_v14  ;;  %v2227_v60 = vld [vmem:[%s5052_s28 + $0x290] sm:$0xff]  ;;  %v2228_v7 = vld [vmem:[%s5052_s28 + $0x298] sm:$0xff]  ;;  %v2310_v39 = vld [vmem:[%s5052_s28 + $0x528] sm:$0xff] }
 0x535   : > { %3838 = vmatprep.subr.bf16.mxu1 %v4277_v55  ;;  %v4354_v55 = vcombine.low %v2235_v49, %v2239_v18  ;;  %v4347_v16 = vcombine.high %v2227_v60, %v2231_v10  ;;  %v4346_v58 = vcombine.low %v2227_v60, %v2231_v10  ;;  %v2297_v60 = vld [vmem:[%s5052_s28 + $0x4c0] sm:$0xff] }
 0x536   : > { %v6079_v19 = vpack.c.bf16 %v2127_v26, %v2127_v26  ;;  %v2128_v17 = vcombine.high %v6075_v53, %v6075_v53  ;;  %v2232_v26 = vld [vmem:[%s5052_s28 + $0x2b8] sm:$0xff]  ;;  %v2301_v10 = vld [vmem:[%s5052_s28 + $0x4e0] sm:$0xff] }
 0x537   : > { %v4348_v27 = vcombine.low %v2228_v7, %v2232_v26 }
 0x538   : > { %3817 = vmatprep.mubr.bf16.mxu0 %v6079_v19  ;;  %v6086_v45 = vpack.c.bf16 %v2128_v17, %v2128_v17  ;;  %v2219_v17 = vld [vmem:[%s5052_s28 + $0x250] sm:$0xff] }
 0x539   : > { %v4338_v5 = vcombine.low %v2219_v17, %v2223_v22 }
 0x53a   : > { %3798 = vmatpush1.bf16.xpose.msra.mxu0 %v4274_v1  ;;  %3858 = vmatprep.mubr.bf16.mxu1 %v6086_v45  ;;  %v4349_v1 = vcombine.high %v2228_v7, %v2232_v26  ;;  %v2298_v7 = vld [vmem:[%s5052_s28 + $0x4c8] sm:$0xff] }
 0x53b   : > { %3799 = vmatprep.subr.bf16.mxu0 %v4267_v28  ;;  %v2220_v28 = vld [vmem:[%s5052_s28 + $0x258] sm:$0xff]  ;;  %v2302_v26 = vld [vmem:[%s5052_s28 + $0x4e8] sm:$0xff] }
 0x53c   : > { %3839 = vmatpush1.bf16.xpose.msra.mxu1 %v4276_v62  ;;  %v2224_v62 = vld [vmem:[%s5052_s28 + $0x278] sm:$0xff] }
 0x53d   : > { %3840 = vmatprep.subr.bf16.mxu1 %v4269_v21  ;;  %v4339_v21 = vcombine.high %v2219_v17, %v2223_v22  ;;  %v4341_v36 = vcombine.high %v2220_v28, %v2224_v62  ;;  %v4340_v24 = vcombine.low %v2220_v28, %v2224_v62  ;;  %v2289_v17 = vld [vmem:[%s5052_s28 + $0x480] sm:$0xff]  ;;  %v2290_v28 = vld [vmem:[%s5052_s28 + $0x488] sm:$0xff] }
 0x53e   : > { %v2293_v22 = vld [vmem:[%s5052_s28 + $0x4a0] sm:$0xff]  ;;  %v2294_v62 = vld [vmem:[%s5052_s28 + $0x4a8] sm:$0xff] }
 0x542   : > { %3800 = vmatpush1.bf16.xpose.msra.mxu0 %v4266_v20  ;;  %v2211_v20 = vld [vmem:[%s5052_s28 + $0x210] sm:$0xff] }
 0x543   : > { %3801 = vmatprep.subr.bf16.mxu0 %v4387_v40  ;;  %v2212_v40 = vld [vmem:[%s5052_s28 + $0x218] sm:$0xff]  ;;  %v4330_v35 = vcombine.low %v2211_v20, %v2215_v44 }
 0x544   : > { %3841 = vmatpush1.bf16.xpose.msra.mxu1 %v4268_v25  ;;  %v2216_v25 = vld [vmem:[%s5052_s28 + $0x238] sm:$0xff] }
 0x545   : > { %3842 = vmatprep.subr.bf16.mxu1 %v4389_v15  ;;  %v4331_v15 = vcombine.high %v2211_v20, %v2215_v44  ;;  %v4333_v50 = vcombine.high %v2212_v40, %v2216_v25  ;;  %v4332_v32 = vcombine.low %v2212_v40, %v2216_v25  ;;  %v2281_v20 = vld [vmem:[%s5052_s28 + $0x440] sm:$0xff]  ;;  %v2282_v40 = vld [vmem:[%s5052_s28 + $0x448] sm:$0xff] }
 0x546   : > { %v2285_v44 = vld [vmem:[%s5052_s28 + $0x460] sm:$0xff]  ;;  %v2286_v25 = vld [vmem:[%s5052_s28 + $0x468] sm:$0xff] }
 0x54a   : > { %3802 = vmatpush2.bf16.xpose.msra.mxu0 %v4386_v51  ;;  %v2329_v51 = vld [vmem:[%s5052_s28 + $0x5c0] sm:$0xff] }
 0x54b   : > { %3803 = vmatprep.subr.bf16.mxu0 %v4379_v54  ;;  %v2330_v54 = vld [vmem:[%s5052_s28 + $0x5c8] sm:$0xff]  ;;  %v4446_v57 = vcombine.low %v2329_v51, %v2333_v37 }
 0x54c   : > { %3843 = vmatpush2.bf16.xpose.msra.mxu1 %v4388_v11  ;;  %v2334_v11 = vld [vmem:[%s5052_s28 + $0x5e8] sm:$0xff] }
 0x54d   : > { %3844 = vmatprep.subr.bf16.mxu1 %v4381_v47  ;;  %v4447_v47 = vcombine.high %v2329_v51, %v2333_v37  ;;  %v4449_v6 = vcombine.high %v2330_v54, %v2334_v11  ;;  %v4448_v30 = vcombine.low %v2330_v54, %v2334_v11  ;;  %v2273_v51 = vld [vmem:[%s5052_s28 + $0x400] sm:$0xff]  ;;  %v2274_v54 = vld [vmem:[%s5052_s28 + $0x408] sm:$0xff] }
 0x54e   : > { %v2277_v37 = vld [vmem:[%s5052_s28 + $0x420] sm:$0xff]  ;;  %v2278_v11 = vld [vmem:[%s5052_s28 + $0x428] sm:$0xff] }
 0x552   : > { %3804 = vmatpush2.bf16.xpose.msra.mxu0 %v4378_v46  ;;  %v2321_v46 = vld [vmem:[%s5052_s28 + $0x580] sm:$0xff] }
 0x553   : > { %3805 = vmatprep.subr.bf16.mxu0 %v4371_v56  ;;  %v2322_v56 = vld [vmem:[%s5052_s28 + $0x588] sm:$0xff]  ;;  %v4439_v42 = vcombine.high %v2321_v46, %v2325_v23 }
 0x554   : > { %3845 = vmatpush2.bf16.xpose.msra.mxu1 %v4380_v38  ;;  %v2326_v38 = vld [vmem:[%s5052_s28 + $0x5a8] sm:$0xff] }
 0x555   : > { %3846 = vmatprep.subr.bf16.mxu1 %v4373_v61  ;;  %v6131_v61 = vpack.c.bf16 %v6070_v52, %v6070_v52  ;;  %v4441_v12 = vcombine.high %v2322_v56, %v2326_v38  ;;  %v2313_v52 = vld [vmem:[%s5052_s28 + $0x540] sm:$0xff]  ;;  %v4440_v49 = vcombine.low %v2322_v56, %v2326_v38  ;;  %v2394_v56 = vld [vmem:[%s5052_s28 + $0x7c8] sm:$0xff] }
 0x556   : > { %v2398_v38 = vld [vmem:[%s5052_s28 + $0x7e8] sm:$0xff] }
 0x55a   : > { %3806 = vmatpush2.bf16.xpose.msra.mxu0 %v4370_v48  ;;  %v6136_v48 = vpack.c.bf16 %v6075_v53, %v6075_v53  ;;  %v2314_v53 = vld [vmem:[%s5052_s28 + $0x548] sm:$0xff] }
 0x55b   : > { %3807 = vmatprep.subr.bf16.mxu0 %v4363_v13  ;;  %v4438_v13 = vcombine.low %v2321_v46, %v2325_v23  ;;  %v2393_v46 = vld [vmem:[%s5052_s28 + $0x7c0] sm:$0xff] }
 0x55c   : > { %3847 = vmatpush2.bf16.xpose.msra.mxu1 %v4372_v59  ;;  %v2318_v59 = vld [vmem:[%s5052_s28 + $0x568] sm:$0xff]  ;;  %v2397_v23 = vld [vmem:[%s5052_s28 + $0x7e0] sm:$0xff] }
 0x55d   : > { %3848 = vmatprep.subr.bf16.mxu1 %v4365_v4  ;;  %v4431_v4 = vcombine.high %v2313_v52, %v2317_v43  ;;  %v4433_v18 = vcombine.high %v2314_v53, %v2318_v59 }
 0x562   : > { %3808 = vmatpush2.bf16.xpose.msra.mxu0 %v4362_v41  ;;  %v2309_v41 = vld [vmem:[%s5052_s28 + $0x520] sm:$0xff] }
 0x563   : > { %3809 = vmatprep.subr.bf16.mxu0 %v4355_v8 }
 0x564   : > { %3849 = vmatpush2.bf16.xpose.msra.mxu1 %v4364_v63  ;;  %v4432_v63 = vcombine.low %v2314_v53, %v2318_v59  ;;  %v2385_v53 = vld [vmem:[%s5052_s28 + $0x780] sm:$0xff] }
 0x565   : > { %3850 = vmatprep.subr.bf16.mxu1 %v4357_v2  ;;  %v4425_v2 = vcombine.high %v2306_v3, %v2310_v39  ;;  %v2389_v59 = vld [vmem:[%s5052_s28 + $0x7a0] sm:$0xff] }
 0x56a   : > { %3810 = vmatpush2.bf16.xpose.msra.mxu0 %v4354_v55 }
 0x56b   : > { %3811 = vmatprep.subr.bf16.mxu0 %v4347_v16  ;;  %v4415_v16 = vcombine.high %v2297_v60, %v2301_v10 }
 0x56c   : > { %3851 = vmatpush2.bf16.xpose.msra.mxu1 %v4356_v34  ;;  %v4424_v34 = vcombine.low %v2306_v3, %v2310_v39 }
 0x56d   : > { %3852 = vmatprep.subr.bf16.mxu1 %v4349_v1  ;;  %v4417_v1 = vcombine.high %v2298_v7, %v2302_v26 }
 0x572   : > { %3812 = vmatpush2.bf16.xpose.msra.mxu0 %v4346_v58  ;;  %v4414_v58 = vcombine.low %v2297_v60, %v2301_v10 }
 0x573   : > { %3813 = vmatprep.subr.bf16.mxu0 %v4339_v21  ;;  %v4407_v21 = vcombine.high %v2289_v17, %v2293_v22 }
 0x574   : > { %3853 = vmatpush2.bf16.xpose.msra.mxu1 %v4348_v27  ;;  %v4416_v27 = vcombine.low %v2298_v7, %v2302_v26  ;;  %v2377_v7 = vld [vmem:[%s5052_s28 + $0x740] sm:$0xff] }
 0x575   : > { %3854 = vmatprep.subr.bf16.mxu1 %v4341_v36  ;;  %v4409_v36 = vcombine.high %v2290_v28, %v2294_v62  ;;  %v2381_v26 = vld [vmem:[%s5052_s28 + $0x760] sm:$0xff] }
 0x57a   : > { %3814 = vmatpush2.bf16.xpose.msra.mxu0 %v4338_v5  ;;  %v4406_v5 = vcombine.low %v2289_v17, %v2293_v22  ;;  %v4502_v17 = vcombine.low %v2385_v53, %v2389_v59  ;;  %v2378_v22 = vld [vmem:[%s5052_s28 + $0x748] sm:$0xff] }
 0x57b   : > { %3815 = vmatprep.subr.bf16.mxu0 %v4331_v15  ;;  %v4399_v15 = vcombine.high %v2281_v20, %v2285_v44 }
 0x57c   : > { %3855 = vmatpush2.bf16.xpose.msra.mxu1 %v4340_v24  ;;  %v4408_v24 = vcombine.low %v2290_v28, %v2294_v62 }
 0x57d   : > { %3856 = vmatprep.subr.bf16.mxu1 %v4333_v50  ;;  %v4401_v50 = vcombine.high %v2282_v40, %v2286_v25 }
 0x582   : > { %3816 = vmatpush2.bf16.xpose.msra.mxu0 %v4330_v35  ;;  %v4398_v35 = vcombine.low %v2281_v20, %v2285_v44  ;;  %v2369_v44 = vld [vmem:[%s5052_s28 + $0x700] sm:$0xff] }
 0x583   : > { %3867 = vmatprep.subr.bf16.mxu0 %v4447_v47  ;;  %v4391_v47 = vcombine.high %v2273_v51, %v2277_v37 }
 0x584   : > { %3857 = vmatpush2.bf16.xpose.msra.mxu1 %v4332_v32  ;;  %v4400_v32 = vcombine.low %v2282_v40, %v2286_v25  ;;  %v4494_v40 = vcombine.low %v2377_v7, %v2381_v26  ;;  %v2370_v25 = vld [vmem:[%s5052_s28 + $0x708] sm:$0xff] }
 0x585   : > { %3908 = vmatprep.subr.bf16.mxu1 %v4449_v6  ;;  %v4393_v6 = vcombine.high %v2274_v54, %v2278_v11 }
 0x589   : > { %3818 = vmatmul.mubr.bf16.vlgmr.msra.gmra.mxu0 %v6131_v61 }
 0x58a   : > { %3868 = vmatpush1.bf16.xpose.msra.mxu0 %v4446_v57  ;;  %3899 = vmatprep.mubr.bf16.mxu0 %v6011_v31  ;;  %v2305_v31 = vld [vmem:[%s5052_s28 + $0x500] sm:$0xff]  ;;  %v4390_v57 = vcombine.low %v2273_v51, %v2277_v37 }
 0x58b   : > { %3859 = vmatmul.mubr.bf16.vlgmr.msra.gmra.mxu1 %v6136_v48  ;;  %3869 = vmatprep.subr.bf16.mxu0 %v4439_v42  ;;  %v4423_v8 = vcombine.high %v2305_v31, %v2309_v41  ;;  %v4422_v55 = vcombine.low %v2305_v31, %v2309_v41  ;;  %v4511_v42 = vcombine.high %v2393_v46, %v2397_v23  ;;  %v2390_v31 = vld [vmem:[%s5052_s28 + $0x7a8] sm:$0xff]  ;;  %v2361_v37 = vld [vmem:[%s5052_s28 + $0x6c0] sm:$0xff] }
 0x58c   : > { %3909 = vmatpush1.bf16.xpose.msra.mxu1 %v4448_v30  ;;  %3940 = vmatprep.mubr.bf16.mxu1 %v6019_v0  ;;  %v4430_v0 = vcombine.low %v2313_v52, %v2317_v43  ;;  %v4392_v30 = vcombine.low %v2274_v54, %v2278_v11  ;;  %v2405_v52 = vsub.s32 0, %v5772_v29  ;;  %v6171_v43 = vld [vmem:[%s374_s27] sm:$0xf]  ;;  %v4503_v41 = vcombine.high %v2385_v53, %v2389_v59  ;;  %v2362_v11 = vld [vmem:[%s5052_s28 + $0x6c8] sm:$0xff] }
 0x58d   : > { %3910 = vmatprep.subr.bf16.mxu1 %v4441_v12  ;;  %v4513_v12 = vcombine.high %v2394_v56, %v2398_v38  ;;  %v2349_v53 = vld [vmem:[%s5052_s28 + $0x660] sm:$0xff] }
 0x592   : > { %3870 = vmatpush1.bf16.xpose.msra.mxu0 %v4438_v13  ;;  %v2409_v13 = vsub.s32 1, %v5772_v29 }
 0x593   : > { %3871 = vmatprep.subr.bf16.mxu0 %v4431_v4  ;;  %v4510_v4 = vcombine.low %v2393_v46, %v2397_v23  ;;  %v2353_v23 = vld [vmem:[%s5052_s28 + $0x680] sm:$0xff] }
 0x594   : > { %3911 = vmatpush1.bf16.xpose.msra.mxu1 %v4440_v49  ;;  %v2406_v49 = vrot.slane %v6171_v43, %v2405_v52  ;;  %v2410_v3 = vrot.slane %v6171_v43, %v2409_v13  ;;  %v2345_v13 = vld [vmem:[%s5052_s28 + $0x640] sm:$0xff] }
 0x595   : > { %3912 = vmatprep.subr.bf16.mxu1 %v4433_v18  ;;  %v2386_v18 = vld [vmem:[%s5052_s28 + $0x788] sm:$0xff] }
 0x59a   : > { %3872 = vmatpush1.bf16.xpose.msra.mxu0 %v4430_v0  ;;  %v4512_v0 = vcombine.low %v2394_v56, %v2398_v38  ;;  %v2354_v38 = vld [vmem:[%s5052_s28 + $0x688] sm:$0xff] }
 0x59b   : > { %3873 = vmatprep.subr.bf16.mxu0 %v4423_v8  ;;  %v4505_v8 = vcombine.high %v2386_v18, %v2390_v31 }
 0x59c   : > { %3913 = vmatpush1.bf16.xpose.msra.mxu1 %v4432_v63 }
 0x59d   : > { %3914 = vmatprep.subr.bf16.mxu1 %v4425_v2 }
 0x5a2   : > { %3874 = vmatpush1.bf16.xpose.msra.mxu0 %v4422_v55 }
 0x5a3   : > { %3875 = vmatprep.subr.bf16.mxu0 %v4415_v16 }
 0x5a4   : > { %3915 = vmatpush1.bf16.xpose.msra.mxu1 %v4424_v34 }
 0x5a5   : > { %3916 = vmatprep.subr.bf16.mxu1 %v4417_v1 }
 0x5aa   : > { %3876 = vmatpush1.bf16.xpose.msra.mxu0 %v4414_v58  ;;  %v2382_v58 = vld [vmem:[%s5052_s28 + $0x768] sm:$0xff] }
 0x5ab   : > { %3877 = vmatprep.subr.bf16.mxu0 %v4407_v21  ;;  %v4495_v21 = vcombine.high %v2377_v7, %v2381_v26  ;;  %v4497_v20 = vcombine.high %v2378_v22, %v2382_v58  ;;  %v2331_v7 = vld [vmem:[%s5052_s28 + $0x5d0] sm:$0xff] }
 0x5ac   : > { %3917 = vmatpush1.bf16.xpose.msra.mxu1 %v4416_v27  ;;  %v4504_v27 = vcombine.low %v2386_v18, %v2390_v31  ;;  %v4463_v18 = vcombine.high %v2345_v13, %v2349_v53  ;;  %v2335_v26 = vld [vmem:[%s5052_s28 + $0x5f0] sm:$0xff] }
 0x5ad   : > { %3918 = vmatprep.subr.bf16.mxu1 %v4409_v36 }
 0x5b2   : > { %3878 = vmatpush1.bf16.xpose.msra.mxu0 %v4406_v5  ;;  %v2373_v5 = vld [vmem:[%s5052_s28 + $0x720] sm:$0xff] }
 0x5b3   : > { %3879 = vmatprep.subr.bf16.mxu0 %v4399_v15  ;;  %v2374_v15 = vld [vmem:[%s5052_s28 + $0x728] sm:$0xff]  ;;  %v4486_v54 = vcombine.low %v2369_v44, %v2373_v5 }
 0x5b4   : > { %3919 = vmatpush1.bf16.xpose.msra.mxu1 %v4408_v24  ;;  %v4487_v24 = vcombine.high %v2369_v44, %v2373_v5  ;;  %v4489_v51 = vcombine.high %v2370_v25, %v2374_v15 }
 0x5b5   : > { %3920 = vmatprep.subr.bf16.mxu1 %v4401_v50  ;;  %v4496_v50 = vcombine.low %v2378_v22, %v2382_v58  ;;  %v4451_v22 = vcombine.high %v2331_v7, %v2335_v26 }
 0x5ba   : > { %3880 = vmatpush1.bf16.xpose.msra.mxu0 %v4398_v35  ;;  %v2365_v35 = vld [vmem:[%s5052_s28 + $0x6e0] sm:$0xff] }
 0x5bb   : > { %3881 = vmatprep.subr.bf16.mxu0 %v4391_v47  ;;  %v2366_v47 = vld [vmem:[%s5052_s28 + $0x6e8] sm:$0xff]  ;;  %v4478_v56 = vcombine.low %v2361_v37, %v2365_v35 }
 0x5bc   : > { %3921 = vmatpush1.bf16.xpose.msra.mxu1 %v4400_v32  ;;  %v4479_v32 = vcombine.high %v2361_v37, %v2365_v35  ;;  %v4481_v46 = vcombine.high %v2362_v11, %v2366_v47 }
 0x5bd   : > { %3922 = vmatprep.subr.bf16.mxu1 %v4393_v6  ;;  %v4488_v6 = vcombine.low %v2370_v25, %v2374_v15  ;;  %v2315_v25 = vld [vmem:[%s5052_s28 + $0x550] sm:$0xff] }
 0x5be   : > { %v2319_v15 = vld [vmem:[%s5052_s28 + $0x570] sm:$0xff] }
 0x5c2   : > { %3882 = vmatpush1.bf16.xpose.msra.mxu0 %v4390_v57  ;;  %v2357_v57 = vld [vmem:[%s5052_s28 + $0x6a0] sm:$0xff] }
 0x5c3   : > { %3883 = vmatprep.subr.bf16.mxu0 %v4511_v42  ;;  %v2358_v42 = vld [vmem:[%s5052_s28 + $0x6a8] sm:$0xff]  ;;  %v4470_v59 = vcombine.low %v2353_v23, %v2357_v57 }
 0x5c4   : > { %3923 = vmatpush1.bf16.xpose.msra.mxu1 %v4392_v30  ;;  %v4471_v30 = vcombine.high %v2353_v23, %v2357_v57  ;;  %v4473_v52 = vcombine.high %v2354_v38, %v2358_v42  ;;  %v4472_v31 = vcombine.low %v2354_v38, %v2358_v42  ;;  %v2303_v23 = vld [vmem:[%s5052_s28 + $0x4f0] sm:$0xff]  ;;  %v2304_v38 = vld [vmem:[%s5052_s28 + $0x4f8] sm:$0xff] }
 0x5c5   : > { %3924 = vmatprep.subr.bf16.mxu1 %v4513_v12  ;;  %v4480_v12 = vcombine.low %v2362_v11, %v2366_v47  ;;  %v2312_v11 = vld [vmem:[%s5052_s28 + $0x538] sm:$0xff] }
 0x5c9   : > { %v3737_v39 = vpop.f32.mrf.mxu0 }
 0x5ca   : > { %v3738_v63 = vadd.f32 %v3737_v39, %v2406_v49  ;;  %3884 = vmatpush2.bf16.xpose.msra.mxu0 %v4510_v4  ;;  %v2346_v4 = vld [vmem:[%s5052_s28 + $0x648] sm:$0xff]  ;;  %v4462_v39 = vcombine.low %v2345_v13, %v2349_v53  ;;  %v2295_v13 = vld [vmem:[%s5052_s28 + $0x4b0] sm:$0xff] }
 0x5cb   : > { %v3739_v2 = vpop.f32.mrf.mxu0  ;;  %v3778_v60 = vpop.f32.mrf.mxu1  ;;  %3885 = vmatprep.subr.bf16.mxu0 %v4503_v41  ;;  %v2350_v49 = vld [vmem:[%s5052_s28 + $0x668] sm:$0xff] }
 0x5cc   : > { %v3740_v10 = vadd.f32 %v3739_v2, %v2410_v3  ;;  %v6180_v55 = vadd.f32 %v3778_v60, %v3738_v63  ;;  %3925 = vmatpush2.bf16.xpose.msra.mxu1 %v4512_v0  ;;  %v4465_v41 = vcombine.high %v2346_v4, %v2350_v49  ;;  %v2337_v0 = vld [vmem:[%s5052_s28 + $0x600] sm:$0xff]  ;;  %v2342_v63 = vld [vmem:[%s5052_s28 + $0x628] sm:$0xff]  ;;  %v4464_v60 = vcombine.low %v2346_v4, %v2350_v49  ;;  %v2296_v4 = vld [vmem:[%s5052_s28 + $0x4b8] sm:$0xff] }
 0x5cd   : > { %v3741_v16 = vpop.f32.mrf.mxu0  ;;  %v3780_v34 = vpop.f32.mrf.mxu1  ;;  %3926 = vmatprep.subr.bf16.mxu1 %v4505_v8  ;;  %v2341_v3 = vld [vmem:[%s5052_s28 + $0x620] sm:$0xff]  ;;  %v2338_v8 = vld [vmem:[%s5052_s28 + $0x608] sm:$0xff] }
 0x5ce   : > { %v6184_v1 = vadd.f32 %v3780_v34, %v3740_v10  ;;  %v4455_v2 = vcombine.high %v2337_v0, %v2341_v3  ;;  %v4457_v10 = vcombine.high %v2338_v8, %v2342_v63  ;;  %v4454_v16 = vcombine.low %v2337_v0, %v2341_v3  ;;  %v2332_v34 = vld [vmem:[%s5052_s28 + $0x5d8] sm:$0xff]  ;;  %v2287_v0 = vld [vmem:[%s5052_s28 + $0x470] sm:$0xff] }
 0x5cf   : > { %v3742_v28 = vpop.f32.mrf.mxu0  ;;  %v3782_v62 = vpop.f32.mrf.mxu1  ;;  %v4456_v58 = vcombine.low %v2338_v8, %v2342_v63  ;;  %v2288_v8 = vld [vmem:[%s5052_s28 + $0x478] sm:$0xff] }
 0x5d0   : > { %v2323_v62 = vld [vmem:[%s5052_s28 + $0x590] sm:$0xff] }
 0x5d1   : > { %v3783_v36 = vpop.f32.mrf.mxu1 }
 0x5d2   : > { %3886 = vmatpush2.bf16.xpose.msra.mxu0 %v4502_v17  ;;  %v2336_v17 = vld [vmem:[%s5052_s28 + $0x5f8] sm:$0xff] }
 0x5d3   : > { %3887 = vmatprep.subr.bf16.mxu0 %v4495_v21  ;;  %v4453_v28 = vcombine.high %v2332_v34, %v2336_v17  ;;  %v2327_v21 = vld [vmem:[%s5052_s28 + $0x5b0] sm:$0xff]  ;;  %v2324_v36 = vld [vmem:[%s5052_s28 + $0x598] sm:$0xff]  ;;  %v4452_v5 = vcombine.low %v2332_v34, %v2336_v17 }
 0x5d4   : > { %3927 = vmatpush2.bf16.xpose.msra.mxu1 %v4504_v27  ;;  %v4450_v27 = vcombine.low %v2331_v7, %v2335_v26  ;;  %v4443_v44 = vcombine.high %v2323_v62, %v2327_v21  ;;  %v2279_v7 = vld [vmem:[%s5052_s28 + $0x430] sm:$0xff]  ;;  %v2280_v34 = vld [vmem:[%s5052_s28 + $0x438] sm:$0xff] }
 0x5d5   : > { %3928 = vmatprep.subr.bf16.mxu1 %v4497_v20  ;;  %v2328_v20 = vld [vmem:[%s5052_s28 + $0x5b8] sm:$0xff] }
 0x5d6   : > { %v4444_v37 = vcombine.low %v2324_v36, %v2328_v20 }
 0x5da   : > { %3888 = vmatpush2.bf16.xpose.msra.mxu0 %v4494_v40  ;;  %v4445_v40 = vcombine.high %v2324_v36, %v2328_v20  ;;  %v2400_v36 = vld [vmem:[%s5052_s28 + $0x7f8] sm:$0xff] }
 0x5db   : > { %3889 = vmatprep.subr.bf16.mxu0 %v4487_v24  ;;  %v4442_v24 = vcombine.low %v2323_v62, %v2327_v21  ;;  %v2399_v62 = vld [vmem:[%s5052_s28 + $0x7f0] sm:$0xff] }
 0x5dc   : > { %3929 = vmatpush2.bf16.xpose.msra.mxu1 %v4496_v50  ;;  %v2316_v50 = vld [vmem:[%s5052_s28 + $0x558] sm:$0xff] }
 0x5dd   : > { %3930 = vmatprep.subr.bf16.mxu1 %v4489_v51  ;;  %v4435_v51 = vcombine.high %v2315_v25, %v2319_v15 }
 0x5e2   : > { %3890 = vmatpush2.bf16.xpose.msra.mxu0 %v4486_v54  ;;  %v2308_v54 = vld [vmem:[%s5052_s28 + $0x518] sm:$0xff] }
 0x5e3   : > { %3891 = vmatprep.subr.bf16.mxu0 %v4479_v32 }
 0x5e4   : > { %3931 = vmatpush2.bf16.xpose.msra.mxu1 %v4488_v6  ;;  %v4429_v6 = vcombine.high %v2308_v54, %v2312_v11 }
 0x5e5   : > { %3932 = vmatprep.subr.bf16.mxu1 %v4481_v46  ;;  %v2299_v46 = vld [vmem:[%s5052_s28 + $0x4d0] sm:$0xff] }
 0x5e6   : > { %v4419_v42 = vcombine.high %v2299_v46, %v2303_v23  ;;  %v4418_v53 = vcombine.low %v2299_v46, %v2303_v23 }
 0x5ea   : > { %3892 = vmatpush2.bf16.xpose.msra.mxu0 %v4478_v56  ;;  %v2300_v56 = vld [vmem:[%s5052_s28 + $0x4d8] sm:$0xff] }
 0x5eb   : > { %3893 = vmatprep.subr.bf16.mxu0 %v4471_v30  ;;  %v4428_v30 = vcombine.low %v2308_v54, %v2312_v11 }
 0x5ec   : > { %3933 = vmatpush2.bf16.xpose.msra.mxu1 %v4480_v12  ;;  %v4421_v12 = vcombine.high %v2300_v56, %v2304_v38 }
 0x5ed   : > { %3934 = vmatprep.subr.bf16.mxu1 %v4473_v52  ;;  %v2291_v52 = vld [vmem:[%s5052_s28 + $0x490] sm:$0xff] }
 0x5ee   : > { %v4411_v49 = vcombine.high %v2291_v52, %v2295_v13  ;;  %v4410_v3 = vcombine.low %v2291_v52, %v2295_v13 }
 0x5f2   : > { %3894 = vmatpush2.bf16.xpose.msra.mxu0 %v4470_v59  ;;  %v2292_v59 = vld [vmem:[%s5052_s28 + $0x498] sm:$0xff] }
 0x5f3   : > { %3895 = vmatprep.subr.bf16.mxu0 %v4463_v18  ;;  %v4420_v18 = vcombine.low %v2300_v56, %v2304_v38  ;;  %v2384_v56 = vld [vmem:[%s5052_s28 + $0x778] sm:$0xff] }
 0x5f4   : > { %3935 = vmatpush2.bf16.xpose.msra.mxu1 %v4472_v31  ;;  %v4413_v31 = vcombine.high %v2292_v59, %v2296_v4 }
 0x5f5   : > { %3936 = vmatprep.subr.bf16.mxu1 %v4465_v41  ;;  %v2283_v41 = vld [vmem:[%s5052_s28 + $0x450] sm:$0xff] }
 0x5f6   : > { %v4403_v63 = vcombine.high %v2283_v41, %v2287_v0  ;;  %v4402_v26 = vcombine.low %v2283_v41, %v2287_v0 }
 0x5fa   : > { %3896 = vmatpush2.bf16.xpose.msra.mxu0 %v4462_v39  ;;  %v2284_v39 = vld [vmem:[%s5052_s28 + $0x458] sm:$0xff] }
 0x5fb   : > { %3897 = vmatprep.subr.bf16.mxu0 %v4455_v2  ;;  %v4412_v2 = vcombine.low %v2292_v59, %v2296_v4  ;;  %v2375_v59 = vld [vmem:[%s5052_s28 + $0x730] sm:$0xff] }
 0x5fc   : > { %3937 = vmatpush2.bf16.xpose.msra.mxu1 %v4464_v60  ;;  %v4405_v60 = vcombine.high %v2284_v39, %v2288_v8 }
 0x5fd   : > { %3938 = vmatprep.subr.bf16.mxu1 %v4457_v10  ;;  %v2275_v10 = vld [vmem:[%s5052_s28 + $0x410] sm:$0xff] }
 0x5fe   : > { %v4395_v17 = vcombine.high %v2275_v10, %v2279_v7  ;;  %v4394_v21 = vcombine.low %v2275_v10, %v2279_v7 }
 0x602   : > { %3898 = vmatpush2.bf16.xpose.msra.mxu0 %v4454_v16  ;;  %v2276_v16 = vld [vmem:[%s5052_s28 + $0x418] sm:$0xff] }
 0x603   : > { %3949 = vmatprep.subr.bf16.mxu0 %v4451_v22  ;;  %v4404_v22 = vcombine.low %v2284_v39, %v2288_v8  ;;  %v2367_v39 = vld [vmem:[%s5052_s28 + $0x6f0] sm:$0xff] }
 0x604   : > { %3939 = vmatpush2.bf16.xpose.msra.mxu1 %v4456_v58  ;;  %v4397_v58 = vcombine.high %v2276_v16, %v2280_v34 }
 0x605   : > { %3990 = vmatprep.subr.bf16.mxu1 %v4453_v28  ;;  %v2395_v28 = vld [vmem:[%s5052_s28 + $0x7d0] sm:$0xff] }
 0x606   : > { %v4515_v20 = vcombine.high %v2395_v28, %v2399_v62 }
 0x609   : > { %3900 = vmatmul.mubr.bf16.vlgmr.msra.gmra.mxu0 %v6015_v33  ;;  %v2320_v33 = vld [vmem:[%s5052_s28 + $0x578] sm:$0xff] }
 0x60a   : > { %3950 = vmatpush1.bf16.xpose.msra.mxu0 %v4450_v27  ;;  %3981 = vmatprep.mubr.bf16.mxu0 %v6079_v19  ;;  %v4437_v35 = vcombine.high %v2316_v50, %v2320_v33  ;;  %v2311_v19 = vld [vmem:[%s5052_s28 + $0x530] sm:$0xff]  ;;  %v4436_v32 = vcombine.low %v2316_v50, %v2320_v33  ;;  %v2396_v27 = vld [vmem:[%s5052_s28 + $0x7d8] sm:$0xff] }
 0x60b   : > { %3941 = vmatmul.mubr.bf16.vlgmr.msra.gmra.mxu1 %v6022_v9  ;;  %3951 = vmatprep.subr.bf16.mxu0 %v4443_v44  ;;  %v2307_v9 = vld [vmem:[%s5052_s28 + $0x510] sm:$0xff]  ;;  %v4396_v44 = vcombine.low %v2276_v16, %v2280_v34  ;;  %v2392_v50 = vld [vmem:[%s5052_s28 + $0x7b8] sm:$0xff] }
 0x60c   : > { %3991 = vmatpush1.bf16.xpose.msra.mxu1 %v4452_v5  ;;  %4022 = vmatprep.mubr.bf16.mxu1 %v6086_v45  ;;  %v4434_v45 = vcombine.low %v2315_v25, %v2319_v15  ;;  %v4427_v47 = vcombine.high %v2307_v9, %v2311_v19  ;;  %v4426_v57 = vcombine.low %v2307_v9, %v2311_v19  ;;  %v2391_v25 = vld [vmem:[%s5052_s28 + $0x7b0] sm:$0xff] }
 0x60d   : > { %3992 = vmatprep.subr.bf16.mxu1 %v4445_v40  ;;  %v4517_v5 = vcombine.high %v2396_v27, %v2400_v36  ;;  %v2387_v40 = vld [vmem:[%s5052_s28 + $0x790] sm:$0xff]  ;;  %v4514_v15 = vcombine.low %v2395_v28, %v2399_v62 }
 0x60e   : > { %v4507_v33 = vcombine.high %v2387_v40, %v2391_v25  ;;  %v2359_v16 = vld [vmem:[%s5052_s28 + $0x6b0] sm:$0xff] }
 0x612   : > { %3952 = vmatpush1.bf16.xpose.msra.mxu0 %v4442_v24  ;;  %v2388_v24 = vld [vmem:[%s5052_s28 + $0x798] sm:$0xff] }
 0x613   : > { %3953 = vmatprep.subr.bf16.mxu0 %v4435_v51  ;;  %v4516_v51 = vcombine.low %v2396_v27, %v2400_v36  ;;  %v2351_v27 = vld [vmem:[%s5052_s28 + $0x670] sm:$0xff] }
 0x614   : > { %3993 = vmatpush1.bf16.xpose.msra.mxu1 %v4444_v37 }
 0x615   : > { %3994 = vmatprep.subr.bf16.mxu1 %v4437_v35  ;;  %v4509_v35 = vcombine.high %v2388_v24, %v2392_v50 }
 0x61a   : > { %3954 = vmatpush1.bf16.xpose.msra.mxu0 %v4434_v45 }
 0x61b   : > { %3955 = vmatprep.subr.bf16.mxu0 %v4427_v47  ;;  %v2379_v47 = vld [vmem:[%s5052_s28 + $0x750] sm:$0xff] }
 0x61c   : > { %3995 = vmatpush1.bf16.xpose.msra.mxu1 %v4436_v32  ;;  %v2383_v32 = vld [vmem:[%s5052_s28 + $0x770] sm:$0xff] }
 0x61d   : > { %3996 = vmatprep.subr.bf16.mxu1 %v4429_v6  ;;  %v4498_v4 = vcombine.low %v2379_v47, %v2383_v32 }
 0x622   : > { %3956 = vmatpush1.bf16.xpose.msra.mxu0 %v4426_v57  ;;  %v2380_v57 = vld [vmem:[%s5052_s28 + $0x758] sm:$0xff] }
 0x623   : > { %3957 = vmatprep.subr.bf16.mxu0 %v4419_v42  ;;  %v4501_v13 = vcombine.high %v2380_v57, %v2384_v56  ;;  %v4500_v41 = vcombine.low %v2380_v57, %v2384_v56 }
 0x624   : > { %3997 = vmatpush1.bf16.xpose.msra.mxu1 %v4428_v30 }
 0x625   : > { %3998 = vmatprep.subr.bf16.mxu1 %v4421_v12  ;;  %v4508_v12 = vcombine.low %v2388_v24, %v2392_v50  ;;  %v2343_v24 = vld [vmem:[%s5052_s28 + $0x630] sm:$0xff] }
 0x62a   : > { %3958 = vmatpush1.bf16.xpose.msra.mxu0 %v4418_v53  ;;  %v2371_v53 = vld [vmem:[%s5052_s28 + $0x710] sm:$0xff] }
 0x62b   : > { %3959 = vmatprep.subr.bf16.mxu0 %v4411_v49  ;;  %v2372_v49 = vld [vmem:[%s5052_s28 + $0x718] sm:$0xff]  ;;  %v4490_v8 = vcombine.low %v2371_v53, %v2375_v59 }
 0x62c   : > { %3999 = vmatpush1.bf16.xpose.msra.mxu1 %v4420_v18  ;;  %v2376_v18 = vld [vmem:[%s5052_s28 + $0x738] sm:$0xff] }
 0x62d   : > { %4000 = vmatprep.subr.bf16.mxu1 %v4413_v31  ;;  %v4491_v31 = vcombine.high %v2371_v53, %v2375_v59  ;;  %v4493_v0 = vcombine.high %v2372_v49, %v2376_v18  ;;  %v4492_v10 = vcombine.low %v2372_v49, %v2376_v18 }
 0x632   : > { %3960 = vmatpush1.bf16.xpose.msra.mxu0 %v4410_v3  ;;  %v2363_v3 = vld [vmem:[%s5052_s28 + $0x6d0] sm:$0xff] }
 0x633   : > { %3961 = vmatprep.subr.bf16.mxu0 %v4403_v63  ;;  %v2364_v63 = vld [vmem:[%s5052_s28 + $0x6d8] sm:$0xff]  ;;  %v4482_v34 = vcombine.low %v2363_v3, %v2367_v39 }
 0x634   : > { %4001 = vmatpush1.bf16.xpose.msra.mxu1 %v4412_v2  ;;  %v2368_v2 = vld [vmem:[%s5052_s28 + $0x6f8] sm:$0xff] }
 0x635   : > { %4002 = vmatprep.subr.bf16.mxu1 %v4405_v60  ;;  %v4483_v60 = vcombine.high %v2363_v3, %v2367_v39  ;;  %v4485_v7 = vcombine.high %v2364_v63, %v2368_v2  ;;  %v4484_v28 = vcombine.low %v2364_v63, %v2368_v2 }
 0x63a   : > { %3962 = vmatpush1.bf16.xpose.msra.mxu0 %v4402_v26  ;;  %v2355_v26 = vld [vmem:[%s5052_s28 + $0x690] sm:$0xff] }
 0x63b   : > { %3963 = vmatprep.subr.bf16.mxu0 %v4395_v17  ;;  %v2356_v17 = vld [vmem:[%s5052_s28 + $0x698] sm:$0xff]  ;;  %v4474_v36 = vcombine.low %v2355_v26, %v2359_v16 }
 0x63c   : > { %4003 = vmatpush1.bf16.xpose.msra.mxu1 %v4404_v22  ;;  %v2360_v22 = vld [vmem:[%s5052_s28 + $0x6b8] sm:$0xff] }
 0x63d   : > { %4004 = vmatprep.subr.bf16.mxu1 %v4397_v58  ;;  %v4475_v58 = vcombine.high %v2355_v26, %v2359_v16  ;;  %v4477_v62 = vcombine.high %v2356_v17, %v2360_v22 }
 0x642   : > { %3964 = vmatpush1.bf16.xpose.msra.mxu0 %v4394_v21  ;;  %v2347_v21 = vld [vmem:[%s5052_s28 + $0x650] sm:$0xff] }
 0x643   : > { %3965 = vmatprep.subr.bf16.mxu0 %v4515_v20  ;;  %v2348_v20 = vld [vmem:[%s5052_s28 + $0x658] sm:$0xff]  ;;  %v4466_v50 = vcombine.low %v2347_v21, %v2351_v27 }
 0x644   : > { %4005 = vmatpush1.bf16.xpose.msra.mxu1 %v4396_v44  ;;  %v2352_v44 = vld [vmem:[%s5052_s28 + $0x678] sm:$0xff] }
 0x645   : > { %4006 = vmatprep.subr.bf16.mxu1 %v4517_v5  ;;  %v4467_v5 = vcombine.high %v2347_v21, %v2351_v27 }
 0x649   : > { %v3819_v37 = vpop.f32.mrf.mxu0 }
 0x64a   : > { %v3820_v9 = vadd.f32 %v3819_v37, %v6180_v55  ;;  %3966 = vmatpush2.bf16.xpose.msra.mxu0 %v4514_v15  ;;  %v4506_v55 = vcombine.low %v2387_v40, %v2391_v25  ;;  %v4476_v40 = vcombine.low %v2356_v17, %v2360_v22  ;;  %v4469_v25 = vcombine.high %v2348_v20, %v2352_v44  ;;  %v2339_v15 = vld [vmem:[%s5052_s28 + $0x610] sm:$0xff] }
 0x64b   : > { %v3821_v19 = vpop.f32.mrf.mxu0  ;;  %v3860_v45 = vpop.f32.mrf.mxu1  ;;  %3967 = vmatprep.subr.bf16.mxu0 %v4507_v33  ;;  %v2340_v33 = vld [vmem:[%s5052_s28 + $0x618] sm:$0xff]  ;;  %v4459_v37 = vcombine.high %v2339_v15, %v2343_v24 }
 0x64c   : > { %v3822_v54 = vadd.f32 %v3821_v19, %v6184_v1  ;;  %v6254_v11 = vadd.f32 %v3860_v45, %v3820_v9  ;;  %4007 = vmatpush2.bf16.xpose.msra.mxu1 %v4516_v51  ;;  %v4499_v1 = vcombine.high %v2379_v47, %v2383_v32  ;;  %v2344_v51 = vld [vmem:[%s5052_s28 + $0x638] sm:$0xff]  ;;  %v4458_v19 = vcombine.low %v2339_v15, %v2343_v24  ;;  %s4195_s28 = sshll.u32 %s5049_s24, 3 }
 0x64d   : > { %v3823_v6 = vpop.f32.mrf.mxu0  ;;  %v3862_v46 = vpop.f32.mrf.mxu1  ;;  %4008 = vmatprep.subr.bf16.mxu1 %v4509_v35  ;;  %v4468_v35 = vcombine.low %v2348_v20, %v2352_v44  ;;  %v4461_v9 = vcombine.high %v2340_v33, %v2344_v51  ;;  %v4460_v45 = vcombine.low %v2340_v33, %v2344_v51  ;;  %v2417_v47 = vsub.s32 3, %v5772_v29  ;;  %s413_s26 = scalar_lea.vmem [#allocation10], %s4195_s28 }
 0x64e   : > { %v6258_v23 = vadd.f32 %v3862_v46, %v3822_v54  ;;  %v2413_v54 = vsub.s32 2, %v5772_v29  ;;  %s4069_s25 = sshll.u32 %s413_s26, 4  ;;  %s4070_s25 = int_to_ptr.vmem [resolvable:$true] %s4069_s25 }
 0x64f   : > { %v3824_v38 = vpop.f32.mrf.mxu0  ;;  %v3864_v42 = vpop.f32.mrf.mxu1  ;;  %v2418_v6 = vrot.slane %v6171_v43, %v2417_v47  ;;  %s4733_s7 = scalar_lea.vmem %s4070_s25, 128  ;;  %p4740_p10 = scmp.lt.s32.totalorder %s4070_s25, %s4738_s3 }
 0x650   : > { %v4035_v30 = vcombine.low %v6254_v11, %v6258_v23  ;;  %v2414_v32 = vrot.slane %v6171_v43, %v2413_v54  ;;  %p4734_p13 = scmp.ne.s32.totalorder %s4070_s25, %s4733_s7  ;;  %p4741_p1 = scmp.lt.s32.totalorder %s4739_s23, %s4733_s7 }
 0x651   : > { %v3865_v52 = vpop.f32.mrf.mxu1 }
 0x652   : > { %3968 = vmatpush2.bf16.xpose.msra.mxu0 %v4506_v55  ;;  %v4043_v63 = vrot.slane %v4035_v30, %v5777_v14  ;;  %p4735_p3 = pnand %p4734_p13, %p6516_p7  ;;  %p4742_p5 = por %p4741_p1, %p4740_p10 }
 0x653   : > { %3969 = vmatprep.subr.bf16.mxu0 %v4499_v1 }
 0x654   : > { %4009 = vmatpush2.bf16.xpose.msra.mxu1 %v4508_v12  ;;  %p4736_p9 = pneg %p4735_p3 }
 0x655   : > { %4010 = vmatprep.subr.bf16.mxu1 %v4501_v13 }
 0x656   : > { %p4743_p12 = pnand %p4742_p5, %p4736_p9 }
 0x65a   : > { %3970 = vmatpush2.bf16.xpose.msra.mxu0 %v4498_v4 }
 0x65b   : > { %3971 = vmatprep.subr.bf16.mxu0 %v4491_v31 }
 0x65c   : > { %4011 = vmatpush2.bf16.xpose.msra.mxu1 %v4500_v41 }
 0x65d   : > { %4012 = vmatprep.subr.bf16.mxu1 %v4493_v0 }
 0x662   : > { %3972 = vmatpush2.bf16.xpose.msra.mxu0 %v4490_v8 }
 0x663   : > { %3973 = vmatprep.subr.bf16.mxu0 %v4483_v60 }
 0x664   : > { %4013 = vmatpush2.bf16.xpose.msra.mxu1 %v4492_v10 }
 0x665   : > { %4014 = vmatprep.subr.bf16.mxu1 %v4485_v7 }
 0x66a   : > { %3974 = vmatpush2.bf16.xpose.msra.mxu0 %v4482_v34 }
 0x66b   : > { %3975 = vmatprep.subr.bf16.mxu0 %v4475_v58 }
 0x66c   : > { %4015 = vmatpush2.bf16.xpose.msra.mxu1 %v4484_v28 }
 0x66d   : > { %4016 = vmatprep.subr.bf16.mxu1 %v4477_v62 }
 0x672   : > { %3976 = vmatpush2.bf16.xpose.msra.mxu0 %v4474_v36 }
 0x673   : > { %3977 = vmatprep.subr.bf16.mxu0 %v4467_v5 }
 0x674   : > { %4017 = vmatpush2.bf16.xpose.msra.mxu1 %v4476_v40 }
 0x675   : > { %4018 = vmatprep.subr.bf16.mxu1 %v4469_v25 }
 0x67a   : > { %3978 = vmatpush2.bf16.xpose.msra.mxu0 %v4466_v50 }
 0x67b   : > { %3979 = vmatprep.subr.bf16.mxu0 %v4459_v37 }
 0x67c   : > { %4019 = vmatpush2.bf16.xpose.msra.mxu1 %v4468_v35 }
 0x67d   : > { %4020 = vmatprep.subr.bf16.mxu1 %v4461_v9 }
 0x682   : > { %3980 = vmatpush2.bf16.xpose.msra.mxu0 %v4458_v19 }
 0x684   : > { %4021 = vmatpush2.bf16.xpose.msra.mxu1 %v4460_v45 }
 0x689   : > { %3982 = vmatmul.mubr.bf16.vlgmr.msra.gmra.mxu0 %v6131_v61 }
 0x68b   : > { %4023 = vmatmul.mubr.bf16.vlgmr.msra.gmra.mxu1 %v6136_v48 }
 0x6c9   : > { %v3901_v46 = vpop.f32.mrf.mxu0 }
 0x6ca   : > { %v3902_v55 = vadd.f32 %v3901_v46, %v2414_v32 }
 0x6cb   : > { %v3903_v57 = vpop.f32.mrf.mxu0  ;;  %v3942_v56 = vpop.f32.mrf.mxu1 }
 0x6cc   : > { %v3904_v38 = vadd.f32 %v3903_v57, %v2418_v6  ;;  %v3943_v42 = vadd.f32 %v3942_v56, %v3902_v55 }
 0x6cd   : > { %v3905_v1 = vpop.f32.mrf.mxu0  ;;  %v3944_v12 = vpop.f32.mrf.mxu1 }
 0x6ce   : > { %v3945_v61 = vadd.f32 %v3944_v12, %v3904_v38 }
 0x6cf   : > { %v3906_v52 = vpop.f32.mrf.mxu0  ;;  %v3946_v48 = vpop.f32.mrf.mxu1 }
 0x6d1   : > { %v3947_v13 = vpop.f32.mrf.mxu1 }
 0x749   : > { %v3983_v53 = vpop.f32.mrf.mxu0 }
 0x74a   : > { %v3984_v29 = vadd.f32 %v3983_v53, %v3943_v42 }
 0x74b   : > { %v3985_v59 = vpop.f32.mrf.mxu0  ;;  %v4024_v4 = vpop.f32.mrf.mxu1 }
 0x74c   : > { %v3986_v43 = vadd.f32 %v3985_v59, %v3945_v61  ;;  %v4025_v31 = vadd.f32 %v4024_v4, %v3984_v29 }
 0x74d   : > { %v3987_v49 = vpop.f32.mrf.mxu0  ;;  %v4026_v18 = vpop.f32.mrf.mxu1 }
 0x74e   : > { %v4027_v41 = vadd.f32 %v4026_v18, %v3986_v43 }
 0x74f   : > { %v3988_v0 = vpop.f32.mrf.mxu0  ;;  %v4028_v3 = vpop.f32.mrf.mxu1 }
 0x750   : > { %v4036_v39 = vcombine.low %v4025_v31, %v4027_v41 }
 0x751   : > { %v4029_v8 = vpop.f32.mrf.mxu1 }
 0x752   : > { %v4050_v2 = vrot.slane %v4036_v39, %v5777_v14 }
 0x754   : > { %v4051_v60 = vcombine.low %v4043_v63, %v4050_v2 }
 0x756   : > { %4053 = vst [vmem:[%s413_s26] sm:$0xff] %v4051_v60 }
 0x757   : > { %4746 = shalt.err (!%p4743_p12)
}
 0x758   : > { %s4747_s16 = scalar_lea.hbm %s4067_s18, 128  ;;  %s4751_s29 = scalar_lea.hbm %s6515_s22, 256 }
 0x759   : > { %p4748_p8 = scmp.ne.s32.totalorder %s4067_s18, %s4747_s16  ;;  %p4752_p0 = scmp.lt.s32.totalorder %s4067_s18, %s6515_s22 }
 0x75a   : > { %p4753_p4 = scmp.lt.s32.totalorder %s4751_s29, %s4747_s16 }
 0x75b   : > { %p4749_p2 = pnand %p4748_p8, %p6516_p7 }
 0x75c   : > { %p4754_p6 = por %p4753_p4, %p4752_p0 }
 0x75d   : > { %p4750_p11 = pneg %p4749_p2 }
 0x75f   : > { %p4755_p13 = pnand %p4754_p6, %p4750_p11 }
 0x761   : > { %4758 = shalt.err (!%p4755_p13)
}
 0x762   : > { %4539 = dma.vmem_to_hbm [thread:$0]  (%p6516_p7), %s4070_s25, 128, %s4067_s18, %s4055_s9  }
 0x763 PF: > { %s6517_s27 = sld [smem:[#allocation15_spill]]  ;;  %p6520_p9 = scmp.ge.s32.totalorder %s4805_s12, 2 }
 0x764   : > { %s6518_s28 = sld [smem:[#allocation18_spill]] }
 0x769   : > { %s4081_s20 = sand.u32 1, %s6517_s27  }
 0x76a   : > { %p6519_p3 = scmp.ne.s32.totalorder %s6518_s28, 0  ;;  %s4082_s26 = scalar_lea.sflag [#allocation5], %s4081_s20 }
 0x76c   : > { %p4556_p10 = pnand %p6520_p9, %p6519_p3 }
 0x76e   : > { %p4557_p1 = pneg %p4556_p10 }
 0x770   : > { %4788 = dma.done.wait (%p4557_p1), %s4082_s26, 128  }
 0x771   : > { %4790 = vsyncadd (%p4557_p1), %s4082_s26, 4294967168  ;;  %s6521_s12 = sld [smem:[#allocation16_spill]]  ;;  %s6523_s30 = smov %s4797_s10 }
 0x772   : > { %s6522_s19 = sld [smem:[#allocation17_spill]]  ;;  %s6524_s10 = smov %s4801_s11 }
 0x777   : > { %p21_p5 = scmp.ge.s32.totalorder %s6521_s12, 4  }
 0x778   : > { %s6525_s11 = smov %s6522_s19 }
 0x779   :  { %23 = sbr.rel (!%p21_p5) target bundleno = 9 (0x9), region = 119 }
 0x77e   :  { %4087 = vsyncpa [#allocation4], 1 }
 0x77f   :  { %4089 = vsyncpa [#allocation4 + $0x1], 1 }
 0x780   :  { %4090 = vsyncpa [#allocation7], 1 }
 0x781   :  { %4091 = vsyncpa [#allocation5], 1 }
 0x782   :  { %4093 = vsyncpa [#allocation5 + $0x1], 1 }

</bundles_post_ra>
